<compile_context>
chip_gen: v6e
topology: v6e:2x2x1
jax: 0.10.0
libtpu: 0.0.40
codegen_flags: <defaults>
</compile_context>

<pallas_src>
import functools

import jax
import jax.numpy as jnp
from jax.experimental import pallas as pl
from jax.experimental.pallas import tpu as pltpu

GAMMA = 5.0 / 3.0
N_NETS = 4
HIDDEN = 32
N_PAD = 8          # ensemble axis padded to 8 sublanes
TILE_B = 4096      # max batch tile (lane axis); actual tile adapts to the batch


def _recip(x):
    """f32-accurate reciprocal: single-pass EUP approx + one VPU Newton step."""
    r = pl.reciprocal(x, approx=True)
    return r * (2.0 - x * r)


# --------------------------------------------------------------------------- #
# Pallas kernel
# --------------------------------------------------------------------------- #
def _ensemble_raref_kernel(P_ref, W1_ref, W2_ref, b2_ref, W3_ref, b3_ref,
                           out_ref, *, sign, gamma, n_nets, n_pad, bf16_tanh):
    hi = jax.lax.Precision.HIGHEST
    P = P_ref[...]                      # (3, TB) feature-major
    rhoa = P[0:1, :]                    # (1, TB)
    pa   = P[1:2, :]
    vela = P[2:3, :]

    gm1 = gamma - 1.0

    # csa^2 = gamma*p / (rho*h_a), h_a = 1 + gamma/(gamma-1)*p/rho
    #       = gamma*p / (rho + gamma/(gamma-1)*p)   -> one reciprocal, no divides
    csa2 = gamma * pa * _recip(rhoa + (gamma / gm1) * pa)
    csa = jnp.sqrt(csa2)                                   # (1, TB)

    # ---- fused ensemble MLP (all nets stacked along the sublane axis) ----
    # First layer on the MXU: (NH, 8) weight slab (bias folded via the ones row)
    # times an (8, TB) feature slab [log rho; log p; v; 1; 0; 0; 0; 0].
    log_rho = jnp.log(rhoa)
    log_p   = jnp.log(pa)
    ones = jnp.ones_like(vela)
    zeros = jnp.zeros((4, vela.shape[-1]), jnp.float32)
    feat = jnp.concatenate([log_rho, log_p, vela, ones, zeros], axis=0)   # (8, TB)

    def _tanh(x):
        if bf16_tanh:   # optional v6e/v7x fast path (off by default)
            return jnp.tanh(x.astype(jnp.bfloat16)).astype(jnp.float32)
        return jnp.tanh(x)

    pre1 = jnp.dot(W1_ref[...], feat,
                   preferred_element_type=jnp.float32, precision=hi)     # (NH, TB)
    h1 = _tanh(pre1)

    # hidden layer: single block-diagonal MXU dot (NH,NH) @ (NH,TB)
    pre2 = jnp.dot(W2_ref[...], h1,
                   preferred_element_type=jnp.float32, precision=hi) + b2_ref[...]
    h2 = _tanh(pre2)

    # output layer: single (NP,NH) @ (NH,TB) dot; rows >= n_nets are zero pad
    z = jnp.dot(W3_ref[...], h2,
                preferred_element_type=jnp.float32, precision=hi) + b3_ref[...]
    xi = 0.5 + 0.5 * jnp.tanh(0.5 * z)     # sigmoid via one tanh (single EUP pass)
    cs_pred = csa * xi                     # affine xi_to_x (a=0, b=csa), (NP, TB)

    # ---- rarefaction residual for every ensemble member ----
    sqgm1 = gm1 ** 0.5
    base_a = (sqgm1 - csa) * _recip(sqgm1 + csa)          # (1, TB), shared factor
    base = (sqgm1 + cs_pred) * _recip(sqgm1 - cs_pred) * base_a
    A = jnp.exp((sign * 2.0 / sqgm1) * jnp.log(base))
    opv = 1.0 + vela
    omv = 1.0 - vela
    num = opv * A - omv
    den = opv * A + omv
    res = num * _recip(den) - sign * cs_pred              # (NP, TB)

    # ---- select member with smallest |residual| (first index on ties) ----
    row_ids = jax.lax.broadcasted_iota(jnp.int32, res.shape, 0)
    valid = row_ids < n_nets
    abs_res = jnp.where(valid, jnp.abs(res), jnp.float32(1e30))
    min_res = jnp.min(abs_res, axis=0, keepdims=True)
    masked_ids = jnp.where(abs_res == min_res, row_ids, n_pad)
    best_idx = jnp.min(masked_ids, axis=0, keepdims=True)            # (1, TB)
    onehot = (row_ids == best_idx).astype(jnp.float32)
    cs = jnp.sum(cs_pred * onehot, axis=0, keepdims=True)            # (1, TB)

    # ---- state inside the rarefaction fan at xi = 0 ----
    vel = sign * cs
    cs2 = cs * cs
    inv_den = _recip(gm1 - cs2)
    ratio = cs2 * (gm1 - csa2) * _recip(csa2) * inv_den
    inv_gm1 = 1.0 / gm1
    if abs(inv_gm1 - 1.5) < 1e-9:
        # gamma = 5/3: exponent 1/(gamma-1) = 1.5 -> avoid exp/log
        rho = rhoa * (ratio * jnp.sqrt(ratio))
    else:
        rho = rhoa * jnp.exp(inv_gm1 * jnp.log(ratio))
    p = cs2 * gm1 * rho * inv_den * (1.0 / gamma)
    h = 1.0 + (gamma / gm1) * p * _recip(rho)

    # direct row stores into the output tile (no sublane concatenate)
    out_ref[0:1, :] = rho
    out_ref[1:2, :] = p
    out_ref[2:3, :] = h
    out_ref[3:4, :] = vel


# --------------------------------------------------------------------------- #
# Parameter fusion (host side)
# --------------------------------------------------------------------------- #
def _fuse_params(params, n_pad=N_PAD):
    """Stack the ensemble into fused, MXU-friendly weight slabs."""
    W1, b1, W2, b2, W3, b3 = params
    n_nets, hidden, _ = W1.shape
    nh = n_nets * hidden

    # first layer weights + bias -> one (NH, 8) slab (last 4 columns zero pad)
    W1f = jnp.asarray(W1, jnp.float32).reshape(nh, 3)
    b1f = jnp.asarray(b1, jnp.float32).reshape(nh, 1)
    W1slab = jnp.concatenate([W1f, b1f, jnp.zeros((nh, 4), jnp.float32)], axis=1)

    W2bd = jnp.zeros((nh, nh), jnp.float32)
    for n in range(n_nets):
        W2bd = W2bd.at[n * hidden:(n + 1) * hidden,
                       n * hidden:(n + 1) * hidden].set(W2[n])
    b2f = jnp.asarray(b2, jnp.float32).reshape(nh, 1)

    npad = max(n_pad, n_nets)
    W3f = jnp.zeros((npad, nh), jnp.float32)
    for n in range(n_nets):
        W3f = W3f.at[n, n * hidden:(n + 1) * hidden].set(W3[n, :, 0])
    b3f = jnp.zeros((npad, 1), jnp.float32).at[:n_nets, 0].set(b3[:, 0, 0])

    return (W1slab, W2bd, b2f, W3f, b3f), n_nets, npad


def _prefer_multi_step():
    """>=2 grid steps only pay off on v7x (2 TensorCores, 'parallel' sharding)."""
    try:
        return "v7" in jax.devices()[0].device_kind.lower()
    except Exception:
        return False


# --------------------------------------------------------------------------- #
# Wrapper
# --------------------------------------------------------------------------- #
def ensemble_raref_forward(P, left_params, right_params, sign, gamma=GAMMA,
                           tile_b=TILE_B, bf16_tanh=False):
    """P: (batch, 3) float32, sign in {+1, -1}. Returns (rho, p, h, vel), each (batch,)."""
    assert sign in (+1, -1)
    params = left_params if sign == +1 else right_params
    (W1slab, W2bd, b2f, W3f, b3f), n_nets, n_pad = _fuse_params(params)

    batch = P.shape[0]
    padded = ((batch + 127) // 128) * 128

    # Largest 128-multiple tile that divides the padded batch (<= tile_b).
    # On v7x only, prefer >= 2 grid steps so both TensorCores get work;
    # on v5e/v6e the grid is a sequential loop -> single biggest tile wins.
    cands = [t for t in range(128, min(tile_b, padded) + 1, 128)
             if padded % t == 0]
    tb = max(cands)
    if _prefer_multi_step():
        multi = [t for t in cands if padded // t >= 2]
        if multi:
            tb = max(multi)
    grid = (padded // tb,)

    Pt = jnp.asarray(P, jnp.float32).T                    # (3, batch) feature-major
    if padded > batch:
        pad_cols = jnp.tile(jnp.array([[1.0], [1.0], [0.0]], jnp.float32),
                            (1, padded - batch))          # safe (rho=1, p=1, v=0)
        Pt = jnp.concatenate([Pt, pad_cols], axis=1)

    kernel = functools.partial(_ensemble_raref_kernel,
                               sign=float(sign), gamma=float(gamma),
                               n_nets=n_nets, n_pad=n_pad, bf16_tanh=bf16_tanh)

    def full(a):
        return pl.BlockSpec(a.shape, lambda i: (0,) * a.ndim)

    out = pl.pallas_call(
        kernel,
        out_shape=jax.ShapeDtypeStruct((4, padded), jnp.float32),
        grid_spec=pltpu.PrefetchScalarGridSpec(
            num_scalar_prefetch=0,
            grid=grid,
            in_specs=[
                pl.BlockSpec((3, tb), lambda i: (0, i)),   # P (feature-major)
                full(W1slab), full(W2bd), full(b2f), full(W3f), full(b3f),
            ],
            out_specs=pl.BlockSpec((4, tb), lambda i: (0, i)),
        ),
        compiler_params=pltpu.CompilerParams(
            dimension_semantics=("parallel",),
            vmem_limit_bytes=32 * 1024 * 1024),
    )(Pt, W1slab, W2bd, b2f, W3f, b3f)

    return out[0, :batch], out[1, :batch], out[2, :batch], out[3, :batch]


# --------------------------------------------------------------------------- #
# Deterministic parameter init (synthetic ensemble)
# --------------------------------------------------------------------------- #
def init_ensemble_params(key, n_nets=N_NETS, hidden=HIDDEN, scale=0.5):
    ks = jax.random.split(key, 6)
    W1 = scale * jax.random.normal(ks[0], (n_nets, hidden, 3), jnp.float32)
    b1 = scale * jax.random.normal(ks[1], (n_nets, hidden, 1), jnp.float32)
    W2 = (scale / hidden ** 0.5) * jax.random.normal(ks[2], (n_nets, hidden, hidden), jnp.float32)
    b2 = scale * jax.random.normal(ks[3], (n_nets, hidden, 1), jnp.float32)
    W3 = (scale / hidden ** 0.5) * jax.random.normal(ks[4], (n_nets, hidden, 1), jnp.float32)
    b3 = scale * jax.random.normal(ks[5], (n_nets, 1, 1), jnp.float32)
    return (W1, b1, W2, b2, W3, b3)


# --------------------------------------------------------------------------- #
# Pure-JAX reference (for verification)
# --------------------------------------------------------------------------- #
def reference_forward(P, params, sign, gamma=GAMMA):
    W1, b1, W2, b2, W3, b3 = params
    hi = jax.lax.Precision.HIGHEST
    rhoa, pa, vela = P[:, 0], P[:, 1], P[:, 2]
    h_a = 1.0 + gamma / (gamma - 1.0) * pa / rhoa
    csa = jnp.sqrt(gamma * pa / (rhoa * h_a))
    prims = jnp.stack([jnp.log(rhoa), jnp.log(pa), vela], axis=1)          # (B,3)
    cs_list = []
    for n in range(W1.shape[0]):
        h1 = jnp.tanh(jnp.dot(prims, W1[n].T, precision=hi) + b1[n, :, 0])
        h2 = jnp.tanh(jnp.dot(h1, W2[n].T, precision=hi) + b2[n, :, 0])
        z = jnp.dot(h2, W3[n], precision=hi)[:, 0] + b3[n, 0, 0]
        xi = 1.0 / (1.0 + jnp.exp(-z))
        cs_list.append(csa * xi)
    cs_pred = jnp.stack(cs_list, axis=1)                                   # (B,N)
    sqgm1 = (gamma - 1.0) ** 0.5
    base = (sqgm1 + cs_pred) / (sqgm1 - cs_pred) * ((sqgm1 - csa) / (sqgm1 + csa))[:, None]
    A = base ** (sign * 2.0 / sqgm1)
    v = ((1.0 + vela[:, None]) * A - (1.0 - vela[:, None])) / \
        ((1.0 + vela[:, None]) * A + (1.0 - vela[:, None]))
    res = v - sign * cs_pred
    idx = jnp.argmin(jnp.abs(res), axis=1)
    cs = cs_pred[jnp.arange(P.shape[0]), idx]
    vel = sign * cs
    ratio = cs ** 2 * (gamma - 1.0 - csa ** 2) / (csa ** 2 * (gamma - 1.0 - cs ** 2))
    rho = rhoa * ratio ** (1.0 / (gamma - 1.0))
    p = cs ** 2 * (gamma - 1.0) * rho / (gamma - 1.0 - cs ** 2) / gamma
    h = 1.0 + gamma / (gamma - 1.0) * p / rho
    return rho, p, h, vel


# --------------------------------------------------------------------------- #
if __name__ == "__main__":
    batch = 200   # small, non-multiple of 128 to exercise batch padding
    key = jax.random.PRNGKey(0)
    k_rho, k_p, k_v, k_left, k_right = jax.random.split(key, 5)

    rhoa = jax.random.uniform(k_rho, (batch,), jnp.float32, 0.5, 2.0)
    pa   = jax.random.uniform(k_p,   (batch,), jnp.float32, 0.1, 1.0)
    vela = jax.random.uniform(k_v,   (batch,), jnp.float32, -0.5, 0.5)
    P = jnp.stack([rhoa, pa, vela], axis=1)               # (batch, 3) as in PyTorch

    left_params  = init_ensemble_params(k_left)
    right_params = init_ensemble_params(k_right)

    outs_l = ensemble_raref_forward(P, left_params, right_params, sign=+1)
    outs_r = ensemble_raref_forward(P, left_params, right_params, sign=-1)
    jax.block_until_ready(outs_l)
    jax.block_until_ready(outs_r)

    ref_l = reference_forward(P, left_params, +1)
    ref_r = reference_forward(P, right_params, -1)
    ok = True
    for got, want in list(zip(outs_l, ref_l)) + list(zip(outs_r, ref_r)):
        ok = ok and bool(jnp.allclose(got, want, rtol=1e-3, atol=1e-3))
    assert ok, "Pallas kernel does not match pure-JAX reference"

    print("KERNEL_OK")
</pallas_src>

<mosaic_0001>
module attributes {stable_mosaic.version = 11 : i64} {
  func.func @_ensemble_raref_kernel(%arg0: i32, %arg1: memref<3x256xf32, #tpu.memory_space<vmem>>, %arg2: memref<128x8xf32, #tpu.memory_space<vmem>>, %arg3: memref<128x128xf32, #tpu.memory_space<vmem>>, %arg4: memref<128x1xf32, #tpu.memory_space<vmem>>, %arg5: memref<8x128xf32, #tpu.memory_space<vmem>>, %arg6: memref<8x1xf32, #tpu.memory_space<vmem>>, %arg7: memref<4x256xf32, #tpu.memory_space<vmem>>) attributes {dimension_semantics = [#tpu.dimension_semantics<parallel>], iteration_bounds = array<i64: 1>, scalar_prefetch = 0 : i64, scratch_operands = 0 : i64, tpu.core_type = #tpu.core_type<tc>, window_params = [{transform_indices = @transform_0, window_bounds = array<i64: 3, 256>}, {pipeline_mode = #tpu.pipeline_mode<synchronous>, transform_indices = @transform_1, window_bounds = array<i64: 128, 8>}, {pipeline_mode = #tpu.pipeline_mode<synchronous>, transform_indices = @transform_2, window_bounds = array<i64: 128, 128>}, {pipeline_mode = #tpu.pipeline_mode<synchronous>, transform_indices = @transform_3, window_bounds = array<i64: 128, 1>}, {pipeline_mode = #tpu.pipeline_mode<synchronous>, transform_indices = @transform_4, window_bounds = array<i64: 8, 128>}, {pipeline_mode = #tpu.pipeline_mode<synchronous>, transform_indices = @transform_5, window_bounds = array<i64: 8, 1>}, {transform_indices = @transform_6, window_bounds = array<i64: 4, 256>}]} {
    %c0 = arith.constant 0 : index
    %c0_0 = arith.constant 0 : index
    %0 = vector.load %arg1[%c0, %c0_0] : memref<3x256xf32, #tpu.memory_space<vmem>>, vector<3x256xf32>
    %1 = vector.extract_strided_slice %0 {offsets = [0, 0], sizes = [1, 256], strides = [1, 1]} : vector<3x256xf32> to vector<1x256xf32>
    %2 = vector.extract_strided_slice %0 {offsets = [1, 0], sizes = [1, 256], strides = [1, 1]} : vector<3x256xf32> to vector<1x256xf32>
    %3 = vector.extract_strided_slice %0 {offsets = [2, 0], sizes = [1, 256], strides = [1, 1]} : vector<3x256xf32> to vector<1x256xf32>
    %cst = arith.constant 1.66666663 : f32
    %4 = vector.broadcast %cst : f32 to vector<1x256xf32>
    %5 = arith.mulf %4, %2 : vector<1x256xf32>
    %cst_1 = arith.constant 2.500000e+00 : f32
    %6 = vector.broadcast %cst_1 : f32 to vector<1x256xf32>
    %7 = arith.mulf %6, %2 : vector<1x256xf32>
    %8 = arith.addf %1, %7 : vector<1x256xf32>
    %9 = tpu.reciprocal %8 {approx = true} : vector<1x256xf32> -> vector<1x256xf32>
    %10 = arith.mulf %8, %9 : vector<1x256xf32>
    %cst_2 = arith.constant 2.000000e+00 : f32
    %11 = vector.broadcast %cst_2 : f32 to vector<1x256xf32>
    %12 = arith.subf %11, %10 : vector<1x256xf32>
    %13 = arith.mulf %9, %12 : vector<1x256xf32>
    %14 = arith.mulf %5, %13 : vector<1x256xf32>
    %15 = math.sqrt %14 : vector<1x256xf32>
    %16 = math.log %1 : vector<1x256xf32>
    %17 = math.log %2 : vector<1x256xf32>
    %cst_3 = arith.constant 1.000000e+00 : f32
    %18 = vector.broadcast %cst_3 : f32 to vector<1x256xf32>
    %cst_4 = arith.constant 0.000000e+00 : f32
    %19 = vector.broadcast %cst_4 : f32 to vector<4x256xf32>
    %20 = tpu.concatenate %16, %17, %3, %18, %19 in 0 : vector<1x256xf32>, vector<1x256xf32>, vector<1x256xf32>, vector<1x256xf32>, vector<4x256xf32> -> vector<8x256xf32>
    %c0_5 = arith.constant 0 : index
    %c0_6 = arith.constant 0 : index
    %21 = vector.load %arg2[%c0_5, %c0_6] : memref<128x8xf32, #tpu.memory_space<vmem>>, vector<128x8xf32>
    %cst_7 = arith.constant dense<0.000000e+00> : vector<128x256xf32>
    %22 = tpu.matmul %21, %20, %cst_7 {dimension_numbers = #tpu.dot_dimension_numbers<[1], [0], [0], [1], [0, 0, 1, 1], [], []>, precision = #tpu.contract_precision<fp32>} : vector<128x8xf32>, vector<8x256xf32>, vector<128x256xf32> -> vector<128x256xf32>
    %23 = math.tanh %22 : vector<128x256xf32>
    %c0_8 = arith.constant 0 : index
    %c0_9 = arith.constant 0 : index
    %24 = vector.load %arg3[%c0_8, %c0_9] : memref<128x128xf32, #tpu.memory_space<vmem>>, vector<128x128xf32>
    %cst_10 = arith.constant dense<0.000000e+00> : vector<128x256xf32>
    %25 = tpu.matmul %24, %23, %cst_10 {dimension_numbers = #tpu.dot_dimension_numbers<[1], [0], [0], [1], [0, 0, 1, 1], [], []>, precision = #tpu.contract_precision<fp32>} : vector<128x128xf32>, vector<128x256xf32>, vector<128x256xf32> -> vector<128x256xf32>
    %c0_11 = arith.constant 0 : index
    %c0_12 = arith.constant 0 : index
    %26 = vector.load %arg4[%c0_11, %c0_12] : memref<128x1xf32, #tpu.memory_space<vmem>>, vector<128x1xf32>
    %27 = vector.broadcast %26 : vector<128x1xf32> to vector<128x256xf32>
    %28 = arith.addf %25, %27 : vector<128x256xf32>
    %29 = math.tanh %28 : vector<128x256xf32>
    %c0_13 = arith.constant 0 : index
    %c0_14 = arith.constant 0 : index
    %30 = vector.load %arg5[%c0_13, %c0_14] : memref<8x128xf32, #tpu.memory_space<vmem>>, vector<8x128xf32>
    %cst_15 = arith.constant dense<0.000000e+00> : vector<8x256xf32>
    %31 = tpu.matmul %30, %29, %cst_15 {dimension_numbers = #tpu.dot_dimension_numbers<[1], [0], [0], [1], [0, 0, 1, 1], [], []>, precision = #tpu.contract_precision<fp32>} : vector<8x128xf32>, vector<128x256xf32>, vector<8x256xf32> -> vector<8x256xf32>
    %c0_16 = arith.constant 0 : index
    %c0_17 = arith.constant 0 : index
    %32 = vector.load %arg6[%c0_16, %c0_17] : memref<8x1xf32, #tpu.memory_space<vmem>>, vector<8x1xf32>
    %33 = vector.broadcast %32 : vector<8x1xf32> to vector<8x256xf32>
    %34 = arith.addf %31, %33 : vector<8x256xf32>
    %cst_18 = arith.constant 5.000000e-01 : f32
    %35 = vector.broadcast %cst_18 : f32 to vector<8x256xf32>
    %36 = arith.mulf %35, %34 : vector<8x256xf32>
    %37 = math.tanh %36 : vector<8x256xf32>
    %cst_19 = arith.constant 5.000000e-01 : f32
    %38 = vector.broadcast %cst_19 : f32 to vector<8x256xf32>
    %39 = arith.mulf %38, %37 : vector<8x256xf32>
    %cst_20 = arith.constant 5.000000e-01 : f32
    %40 = vector.broadcast %cst_20 : f32 to vector<8x256xf32>
    %41 = arith.addf %40, %39 : vector<8x256xf32>
    %42 = vector.broadcast %15 : vector<1x256xf32> to vector<8x256xf32>
    %43 = arith.mulf %42, %41 : vector<8x256xf32>
    %cst_21 = arith.constant 0.816496611 : f32
    %44 = vector.broadcast %cst_21 : f32 to vector<1x256xf32>
    %45 = arith.subf %44, %15 : vector<1x256xf32>
    %cst_22 = arith.constant 0.816496611 : f32
    %46 = vector.broadcast %cst_22 : f32 to vector<1x256xf32>
    %47 = arith.addf %46, %15 : vector<1x256xf32>
    %48 = tpu.reciprocal %47 {approx = true} : vector<1x256xf32> -> vector<1x256xf32>
    %49 = arith.mulf %47, %48 : vector<1x256xf32>
    %cst_23 = arith.constant 2.000000e+00 : f32
    %50 = vector.broadcast %cst_23 : f32 to vector<1x256xf32>
    %51 = arith.subf %50, %49 : vector<1x256xf32>
    %52 = arith.mulf %48, %51 : vector<1x256xf32>
    %53 = arith.mulf %45, %52 : vector<1x256xf32>
    %cst_24 = arith.constant 0.816496611 : f32
    %54 = vector.broadcast %cst_24 : f32 to vector<8x256xf32>
    %55 = arith.addf %54, %43 : vector<8x256xf32>
    %cst_25 = arith.constant 0.816496611 : f32
    %56 = vector.broadcast %cst_25 : f32 to vector<8x256xf32>
    %57 = arith.subf %56, %43 : vector<8x256xf32>
    %58 = tpu.reciprocal %57 {approx = true} : vector<8x256xf32> -> vector<8x256xf32>
    %59 = arith.mulf %57, %58 : vector<8x256xf32>
    %cst_26 = arith.constant 2.000000e+00 : f32
    %60 = vector.broadcast %cst_26 : f32 to vector<8x256xf32>
    %61 = arith.subf %60, %59 : vector<8x256xf32>
    %62 = arith.mulf %58, %61 : vector<8x256xf32>
    %63 = arith.mulf %55, %62 : vector<8x256xf32>
    %64 = vector.broadcast %53 : vector<1x256xf32> to vector<8x256xf32>
    %65 = arith.mulf %63, %64 : vector<8x256xf32>
    %66 = math.log %65 : vector<8x256xf32>
    %cst_27 = arith.constant 2.44948983 : f32
    %67 = vector.broadcast %cst_27 : f32 to vector<8x256xf32>
    %68 = arith.mulf %67, %66 : vector<8x256xf32>
    %69 = math.exp %68 : vector<8x256xf32>
    %cst_28 = arith.constant 1.000000e+00 : f32
    %70 = vector.broadcast %cst_28 : f32 to vector<1x256xf32>
    %71 = arith.addf %70, %3 : vector<1x256xf32>
    %cst_29 = arith.constant 1.000000e+00 : f32
    %72 = vector.broadcast %cst_29 : f32 to vector<1x256xf32>
    %73 = arith.subf %72, %3 : vector<1x256xf32>
    %74 = vector.broadcast %71 : vector<1x256xf32> to vector<8x256xf32>
    %75 = arith.mulf %74, %69 : vector<8x256xf32>
    %76 = vector.broadcast %73 : vector<1x256xf32> to vector<8x256xf32>
    %77 = arith.subf %75, %76 : vector<8x256xf32>
    %78 = vector.broadcast %71 : vector<1x256xf32> to vector<8x256xf32>
    %79 = arith.mulf %78, %69 : vector<8x256xf32>
    %80 = vector.broadcast %73 : vector<1x256xf32> to vector<8x256xf32>
    %81 = arith.addf %79, %80 : vector<8x256xf32>
    %82 = tpu.reciprocal %81 {approx = true} : vector<8x256xf32> -> vector<8x256xf32>
    %83 = arith.mulf %81, %82 : vector<8x256xf32>
    %cst_30 = arith.constant 2.000000e+00 : f32
    %84 = vector.broadcast %cst_30 : f32 to vector<8x256xf32>
    %85 = arith.subf %84, %83 : vector<8x256xf32>
    %86 = arith.mulf %82, %85 : vector<8x256xf32>
    %87 = arith.mulf %77, %86 : vector<8x256xf32>
    %cst_31 = arith.constant 1.000000e+00 : f32
    %88 = vector.broadcast %cst_31 : f32 to vector<8x256xf32>
    %89 = arith.mulf %88, %43 : vector<8x256xf32>
    %90 = arith.subf %87, %89 : vector<8x256xf32>
    %91 = tpu.iota {dimensions = array<i32: 0>} : vector<8x256xi32>
    %c4_i32 = arith.constant 4 : i32
    %92 = vector.broadcast %c4_i32 : i32 to vector<8x256xi32>
    %93 = arith.cmpi slt, %91, %92 : vector<8x256xi32>
    %94 = math.absf %90 : vector<8x256xf32>
    %cst_32 = arith.constant 1.000000e+30 : f32
    %95 = vector.broadcast %cst_32 : f32 to vector<8x256xf32>
    %96 = arith.select %93, %94, %95 : vector<8x256xi1>, vector<8x256xf32>
    %cst_33 = arith.constant dense<0x7F800000> : vector<256xf32>
    %97 = vector.multi_reduction <minimumf>, %96, %cst_33 [0] : vector<8x256xf32> to vector<256xf32>
    %98 = vector.shape_cast %97 : vector<256xf32> to vector<1x256xf32>
    %99 = vector.broadcast %98 : vector<1x256xf32> to vector<8x256xf32>
    %100 = arith.cmpf oeq, %96, %99 : vector<8x256xf32>
    %c8_i32 = arith.constant 8 : i32
    %101 = vector.broadcast %c8_i32 : i32 to vector<8x256xi32>
    %102 = arith.select %100, %91, %101 : vector<8x256xi1>, vector<8x256xi32>
    %cst_34 = arith.constant dense<2147483647> : vector<256xi32>
    %103 = vector.multi_reduction <minsi>, %102, %cst_34 [0] : vector<8x256xi32> to vector<256xi32>
    %104 = vector.shape_cast %103 : vector<256xi32> to vector<1x256xi32>
    %105 = vector.broadcast %104 : vector<1x256xi32> to vector<8x256xi32>
    %106 = arith.cmpi eq, %91, %105 : vector<8x256xi32>
    %107 = arith.extui %106 : vector<8x256xi1> to vector<8x256xi32>
    %108 = arith.sitofp %107 : vector<8x256xi32> to vector<8x256xf32>
    %109 = arith.mulf %43, %108 : vector<8x256xf32>
    %cst_35 = arith.constant dense<0.000000e+00> : vector<256xf32>
    %110 = vector.multi_reduction <add>, %109, %cst_35 [0] : vector<8x256xf32> to vector<256xf32>
    %111 = vector.shape_cast %110 : vector<256xf32> to vector<1x256xf32>
    %cst_36 = arith.constant 1.000000e+00 : f32
    %112 = vector.broadcast %cst_36 : f32 to vector<1x256xf32>
    %113 = arith.mulf %112, %111 : vector<1x256xf32>
    %114 = arith.mulf %111, %111 : vector<1x256xf32>
    %cst_37 = arith.constant 0.666666686 : f32
    %115 = vector.broadcast %cst_37 : f32 to vector<1x256xf32>
    %116 = arith.subf %115, %114 : vector<1x256xf32>
    %117 = tpu.reciprocal %116 {approx = true} : vector<1x256xf32> -> vector<1x256xf32>
    %118 = arith.mulf %116, %117 : vector<1x256xf32>
    %cst_38 = arith.constant 2.000000e+00 : f32
    %119 = vector.broadcast %cst_38 : f32 to vector<1x256xf32>
    %120 = arith.subf %119, %118 : vector<1x256xf32>
    %121 = arith.mulf %117, %120 : vector<1x256xf32>
    %cst_39 = arith.constant 0.666666686 : f32
    %122 = vector.broadcast %cst_39 : f32 to vector<1x256xf32>
    %123 = arith.subf %122, %14 : vector<1x256xf32>
    %124 = arith.mulf %114, %123 : vector<1x256xf32>
    %125 = tpu.reciprocal %14 {approx = true} : vector<1x256xf32> -> vector<1x256xf32>
    %126 = arith.mulf %14, %125 : vector<1x256xf32>
    %cst_40 = arith.constant 2.000000e+00 : f32
    %127 = vector.broadcast %cst_40 : f32 to vector<1x256xf32>
    %128 = arith.subf %127, %126 : vector<1x256xf32>
    %129 = arith.mulf %125, %128 : vector<1x256xf32>
    %130 = arith.mulf %124, %129 : vector<1x256xf32>
    %131 = arith.mulf %130, %121 : vector<1x256xf32>
    %132 = math.sqrt %131 : vector<1x256xf32>
    %133 = arith.mulf %131, %132 : vector<1x256xf32>
    %134 = arith.mulf %1, %133 : vector<1x256xf32>
    %cst_41 = arith.constant 0.666666686 : f32
    %135 = vector.broadcast %cst_41 : f32 to vector<1x256xf32>
    %136 = arith.mulf %114, %135 : vector<1x256xf32>
    %137 = arith.mulf %136, %134 : vector<1x256xf32>
    %138 = arith.mulf %137, %121 : vector<1x256xf32>
    %cst_42 = arith.constant 6.000000e-01 : f32
    %139 = vector.broadcast %cst_42 : f32 to vector<1x256xf32>
    %140 = arith.mulf %138, %139 : vector<1x256xf32>
    %cst_43 = arith.constant 2.500000e+00 : f32
    %141 = vector.broadcast %cst_43 : f32 to vector<1x256xf32>
    %142 = arith.mulf %141, %140 : vector<1x256xf32>
    %143 = tpu.reciprocal %134 {approx = true} : vector<1x256xf32> -> vector<1x256xf32>
    %144 = arith.mulf %134, %143 : vector<1x256xf32>
    %cst_44 = arith.constant 2.000000e+00 : f32
    %145 = vector.broadcast %cst_44 : f32 to vector<1x256xf32>
    %146 = arith.subf %145, %144 : vector<1x256xf32>
    %147 = arith.mulf %143, %146 : vector<1x256xf32>
    %148 = arith.mulf %142, %147 : vector<1x256xf32>
    %cst_45 = arith.constant 1.000000e+00 : f32
    %149 = vector.broadcast %cst_45 : f32 to vector<1x256xf32>
    %150 = arith.addf %149, %148 : vector<1x256xf32>
    %c0_46 = arith.constant 0 : index
    %c0_47 = arith.constant 0 : index
    %151 = vector.load %arg7[%c0_46, %c0_47] : memref<4x256xf32, #tpu.memory_space<vmem>>, vector<1x256xf32>
    tpu.vector_store %arg7[%c0_46, %c0_47], %134 {strides = array<i32>} : memref<4x256xf32, #tpu.memory_space<vmem>>, vector<1x256xf32>,
    %c1 = arith.constant 1 : index
    %c0_48 = arith.constant 0 : index
    %152 = vector.load %arg7[%c1, %c0_48] : memref<4x256xf32, #tpu.memory_space<vmem>>, vector<1x256xf32>
    tpu.vector_store %arg7[%c1, %c0_48], %140 {strides = array<i32>} : memref<4x256xf32, #tpu.memory_space<vmem>>, vector<1x256xf32>,
    %c2 = arith.constant 2 : index
    %c0_49 = arith.constant 0 : index
    %153 = vector.load %arg7[%c2, %c0_49] : memref<4x256xf32, #tpu.memory_space<vmem>>, vector<1x256xf32>
    tpu.vector_store %arg7[%c2, %c0_49], %150 {strides = array<i32>} : memref<4x256xf32, #tpu.memory_space<vmem>>, vector<1x256xf32>,
    %c3 = arith.constant 3 : index
    %c0_50 = arith.constant 0 : index
    %154 = vector.load %arg7[%c3, %c0_50] : memref<4x256xf32, #tpu.memory_space<vmem>>, vector<1x256xf32>
    tpu.vector_store %arg7[%c3, %c0_50], %113 {strides = array<i32>} : memref<4x256xf32, #tpu.memory_space<vmem>>, vector<1x256xf32>,
    return
  }
  func.func @transform_0(%arg0: i32) -> (i32, i32) {
    %c0_i32 = arith.constant 0 : i32
    %c0_i32_0 = arith.constant 0 : i32
    return %c0_i32, %arg0 : i32, i32
  }
  func.func @transform_1(%arg0: i32) -> (i32, i32) {
    %c0_i32 = arith.constant 0 : i32
    %c0_i32_0 = arith.constant 0 : i32
    %c0_i32_1 = arith.constant 0 : i32
    return %c0_i32, %c0_i32_0 : i32, i32
  }
  func.func @transform_2(%arg0: i32) -> (i32, i32) {
    %c0_i32 = arith.constant 0 : i32
    %c0_i32_0 = arith.constant 0 : i32
    %c0_i32_1 = arith.constant 0 : i32
    return %c0_i32, %c0_i32_0 : i32, i32
  }
  func.func @transform_3(%arg0: i32) -> (i32, i32) {
    %c0_i32 = arith.constant 0 : i32
    %c0_i32_0 = arith.constant 0 : i32
    %c0_i32_1 = arith.constant 0 : i32
    return %c0_i32, %c0_i32_0 : i32, i32
  }
  func.func @transform_4(%arg0: i32) -> (i32, i32) {
    %c0_i32 = arith.constant 0 : i32
    %c0_i32_0 = arith.constant 0 : i32
    %c0_i32_1 = arith.constant 0 : i32
    return %c0_i32, %c0_i32_0 : i32, i32
  }
  func.func @transform_5(%arg0: i32) -> (i32, i32) {
    %c0_i32 = arith.constant 0 : i32
    %c0_i32_0 = arith.constant 0 : i32
    %c0_i32_1 = arith.constant 0 : i32
    return %c0_i32, %c0_i32_0 : i32, i32
  }
  func.func @transform_6(%arg0: i32) -> (i32, i32) {
    %c0_i32 = arith.constant 0 : i32
    %c0_i32_0 = arith.constant 0 : i32
    return %c0_i32, %arg0 : i32, i32
  }
}

</mosaic_0001>

<bundles_post_ra>
// kernel: tpu_custom_call.1
= control target key start
LH: loop header
LB: loop body
LE: loop exit
PB: predicated region body
PF: predicated region fallthrough
CT: control target
= control target key end

     0   :  { %vm109_vm0 = vcmask 64512   ;;  %v7453_v2 = vmov 0.0   ;;  %v7452_v3 = vlaneseq  ;;  %s7445_s0 = inlined_call_operand.vmem [shape: f32[3,256], index: 0, kind: input, shape index: {}]   ;;  %s7446_s1 = inlined_call_operand.vmem [shape: f32[128,8], index: 1, kind: input, shape index: {}]   ;;  %s7447_s2 = inlined_call_operand.vmem [shape: f32[128,128], index: 2, kind: input, shape index: {}]   ;;  %s7448_s3 = inlined_call_operand.vmem [shape: f32[128,1], index: 3, kind: input, shape index: {}]   ;;  %s7449_s4 = inlined_call_operand.vmem [shape: f32[8,128], index: 4, kind: input, shape index: {}]   ;;  %s7450_s5 = inlined_call_operand.vmem [shape: f32[8,1], index: 5, kind: input, shape index: {}]   ;;  %s7451_s6 = inlined_call_operand.hbm [shape: f32[4,256], index: 6, kind: output, shape index: {}]  }
   0x1   :  { %v24_v0 = vld [vmem:[%s7445_s0] sm:$0x77]  ;;  %224 = vmatprep.mubr.f32.mxu0 %v7453_v2  ;;  %475 = vmatprep.mubr.f32.mxu1 %v7453_v2  ;;  %v94_v5 = vld [vmem:[%s7446_s1 + $0x8] sm:$0xff] }
   0x2   :  { %4395 = vlog2.f32 %v24_v0  ;;  %v93_v1 = vld [vmem:[%s7446_s1] sm:$0xff] }
   0x3   :  { %v111_v4 = vsel %vm109_vm0, %v93_v1, 0 }
   0x4   :  { %v4637_v6 = vand.u32 4294901760, %v111_v4 }
   0x5   :  { %11 = vsyncpa [#allocation3], 0  ;;  %v4640_v7 = vshrl.u32 %v7452_v3, 7  ;;  %v114_v8 = vsel %vm109_vm0, %v94_v5, 0  ;;  %v95_v9 = vld [vmem:[%s7446_s1 + $0x10] sm:$0xff]  ;;  %v96_v15 = vld [vmem:[%s7446_s1 + $0x18] sm:$0xff] }
   0x6   :  { %v4647_v10 = vsub.f32 %v111_v4, %v4637_v6  ;;  %v4649_v11 = vand.u32 4294901760, %v114_v8  ;;  %v117_v12 = vsel %vm109_vm0, %v95_v9, 0  ;;  %vm81_vm1 = vcmask 1040384   ;;  %v97_v26 = vld [vmem:[%s7446_s1 + $0x20] sm:$0xff]  ;;  %v98_v36 = vld [vmem:[%s7446_s1 + $0x28] sm:$0xff]  ;;  %v99_v55 = vld [vmem:[%s7446_s1 + $0x30] sm:$0xff] }
   0x7   :  { %7627 = vst [vmem:[#allocation5_spill] sm:$0xff] %v4640_v7  ;;  %v4653_v13 = vsub.s32 6, %v4640_v7  ;;  %v4656_v14 = vsub.s32 2, %v4640_v7  ;;  %v4662_v16 = vsub.s32 4, %v4640_v7  ;;  %v4665_v17 = vsub.s32 5, %v4640_v7  ;;  %v100_v4 = vld [vmem:[%s7446_s1 + $0x38] sm:$0xff] }
   0x8   :  { %v4668_v18 = vsub.s32 0, %v4640_v7  ;;  %v4671_v19 = vsub.s32 1, %v4640_v7  ;;  %v4673_v21 = vand.u32 4294901760, %v117_v12  ;;  %v227_v23 = vand.u32 4294901760, %v4647_v10 }
   0x9   :  { %7628 = vst [vmem:[#allocation6_spill] sm:$0xff] %v4653_v13  ;;  %7629 = vst [vmem:[#allocation7_spill] sm:$0xff] %v4656_v14  ;;  %v4677_v24 = vsub.f32 %v114_v8, %v4649_v11  ;;  %v120_v25 = vsel %vm109_vm0, %v96_v15, 0  ;;  %v78_v27 = vrot.slane %v24_v0, %v4653_v13  ;;  %vm84_vm2 = vcmask 1041408  }
   0xa   :  { %7630 = vst [vmem:[#allocation8_spill] sm:$0xff] %v4662_v16  ;;  %7631 = vst [vmem:[#allocation9_spill] sm:$0xff] %v4665_v17  ;;  %vm87_vm3 = vcmask 1042432   ;;  %v74_v28 = vrot.slane %v24_v0, %v4656_v14  ;;  %vm90_vm4 = vcmask 1043456   ;;  %v4690_v33 = vsub.f32 %v117_v12, %v4673_v21 }
   0xb   :  { %7632 = vst [vmem:[#allocation10_spill] sm:$0xff] %v4668_v18  ;;  %7633 = vst [vmem:[#allocation11_spill] sm:$0xff] %v4671_v19  ;;  %v4692_v34 = vand.u32 4294901760, %v120_v25  ;;  %v123_v35 = vsel %vm109_vm0, %v97_v26, 0  ;;  %v228_v39 = vsub.f32 %v4647_v10, %v227_v23  ;;  %v238_v40 = vand.u32 4294901760, %v4677_v24 }
   0xc   :  { %v4708_v45 = vand.u32 4294901760, %v123_v35  ;;  %v126_v46 = vsel %vm109_vm0, %v98_v36, 0  ;;  %v249_v49 = vand.u32 4294901760, %v4690_v33  ;;  %v129_v61 = vsel %vm109_vm0, %v99_v55, 0 }
   0xd   :  { %v4715_v50 = vsub.f32 %v120_v25, %v4692_v34  ;;  %v229_v53 = vand.u32 4294901760, %v228_v39  ;;  %v239_v54 = vsub.f32 %v4677_v24, %v238_v40  ;;  %v4735_v60 = vand.u32 4294901760, %v126_v46 }
   0xe   :  { %v250_v58 = vsub.f32 %v4690_v33, %v249_v49  ;;  %v4733_v59 = vsub.f32 %v123_v35, %v4708_v45  ;;  %v4752_v15 = vand.u32 4294901760, %v129_v61 }
   0xf   :  { %v4396_v20 = vpop.eup %4395  ;;  %v240_v62 = vand.u32 4294901760, %v239_v54  ;;  %v260_v1 = vand.u32 4294901760, %v4715_v50  ;;  %v4750_v12 = vsub.f32 %v126_v46, %v4735_v60  ;;  %v103_v46 = vld [vmem:[%s7446_s1 + $0x50] sm:$0xff] }
  0x10   :  { %v48_v22 = vmul.f32 0.6931472, %v4396_v20  ;;  %v271_v9 = vand.u32 4294901760, %v4733_v59  ;;  %v132_v20 = vsel %vm109_vm0, %v100_v4, 0  ;;  %v251_v26 = vand.u32 4294901760, %v250_v58 }
  0x11   :  { %v282_v35 = vand.u32 4294901760, %v4750_v12 }
  0x12   :  { %v57_v29 = vrot.slane %v48_v22, %v4662_v16  ;;  %v67_v30 = vrot.slane %v48_v22, %v4665_v17  ;;  %v53_v31 = vrot.slane %v48_v22, %v4668_v18  ;;  %v63_v32 = vrot.slane %v48_v22, %v4671_v19 }
  0x14   :  { %v83_v37 = vsel %vm81_vm1, %v57_v29, %v67_v30  ;;  %v82_v38 = vsel %vm81_vm1, %v53_v31, %v63_v32  ;;  %v4763_v29 = vsub.f32 %v129_v61, %v4752_v15  ;;  %v4765_v30 = vand.u32 4294901760, %v132_v20 }
  0x15   :  { %v86_v41 = vsel %vm84_vm2, %v83_v37, %v78_v27  ;;  %v85_v42 = vsel %vm84_vm2, %v82_v38, %v74_v28  ;;  %v261_v27 = vsub.f32 %v4715_v50, %v260_v1  ;;  %v101_v28 = vld [vmem:[%s7446_s1 + $0x40] sm:$0xff]  ;;  %v272_v32 = vsub.f32 %v4733_v59, %v271_v9  ;;  %v102_v37 = vld [vmem:[%s7446_s1 + $0x48] sm:$0xff] }
  0x16   :  { %v89_v43 = vsel %vm87_vm3, %v86_v41, 1.0  ;;  %v88_v44 = vsel %vm87_vm3, %v85_v42, 1.0  ;;  %v135_v36 = vsel %vm109_vm0, %v101_v28, 0  ;;  %v293_v38 = vand.u32 4294901760, %v4763_v29 }
  0x17   :  { %v92_v47 = vsel %vm90_vm4, %v89_v43, 0.0  ;;  %v91_v48 = vsel %vm90_vm4, %v88_v44, 0.0  ;;  %v262_v31 = vand.u32 4294901760, %v261_v27  ;;  %v4780_v39 = vsub.f32 %v132_v20, %v4765_v30 }
  0x18   :  { %v188_v51 = vand.u32 4294901760, %v92_v47  ;;  %v4717_v52 = vand.u32 4294901760, %v91_v48  ;;  %v273_v41 = vand.u32 4294901760, %v272_v32  ;;  %v283_v42 = vsub.f32 %v4750_v12, %v282_v35 }
  0x19   :  { %v4787_v43 = vand.u32 4294901760, %v135_v36  ;;  %v138_v44 = vsel %vm109_vm0, %v102_v37, 0  ;;  %v294_v54 = vsub.f32 %v4763_v29, %v293_v38 }
  0x1a   :  { %189 = vmatprep.subr.mxu0 %v188_v51  ;;  %v432_v56 = vsub.f32 %v92_v47, %v188_v51  ;;  %v4726_v57 = vsub.f32 %v91_v48, %v4717_v52  ;;  %v304_v47 = vand.u32 4294901760, %v4780_v39  ;;  %v4796_v48 = vand.u32 4294901760, %v138_v44 }
  0x1b   :  { %191 = vmatpush1.msra.mxu0 %v4717_v52  ;;  %v4803_v55 = vsub.f32 %v135_v36, %v4787_v43 }
  0x1c   :  { %230 = vmatmul.mubr.f32.vlgmr.msra.gmra.mxu0 %v229_v53  ;;  %v433_v63 = vand.u32 4294901760, %v432_v56  ;;  %v439_v0 = vand.u32 4294901760, %v4726_v57  ;;  %620 = vmatprep.subr.mxu0 %v432_v56  ;;  %v284_v53 = vand.u32 4294901760, %v283_v42  ;;  %v305_v58 = vsub.f32 %v4780_v39, %v304_v47 }
  0x1d   :  { %235 = vmatprep.mubr.f32.mxu0 %v7453_v2  ;;  %623 = vmatpush1.msra.mxu0 %v4726_v57  ;;  %v4815_v61 = vsub.f32 %v138_v44, %v4796_v48 }
  0x1e   :  { %v434_v5 = vsub.f32 %v432_v56, %v433_v63  ;;  %v440_v8 = vsub.f32 %v4726_v57, %v439_v0  ;;  %1029 = vmatprep.subr.mxu0 %v433_v63  ;;  %v104_v56 = vld [vmem:[%s7446_s1 + $0x58] sm:$0xff]  ;;  %v315_v63 = vand.u32 4294901760, %v4803_v55  ;;  %v306_v20 = vand.u32 4294901760, %v305_v58 }
  0x20   :  { %241 = vmatmul.mubr.f32.gmra.mxu0 %v240_v62  ;;  %v435_v22 = vand.u32 4294901760, %v434_v5  ;;  %v441_v25 = vand.u32 4294901760, %v440_v8  ;;  %v295_v62 = vand.u32 4294901760, %v294_v54  ;;  %v144_v5 = vsel %vm109_vm0, %v104_v56, 0  ;;  %v105_v8 = vld [vmem:[%s7446_s1 + $0x60] sm:$0xff] }
  0x21   :  { %246 = vmatprep.mubr.f32.mxu0 %v7453_v2  ;;  %v4835_v27 = vand.u32 4294901760, %v144_v5  ;;  %v147_v28 = vsel %vm109_vm0, %v105_v8, 0 }
  0x22   :  { %436 = vmatprep.subr.mxu1 %v435_v22  ;;  %v326_v22 = vand.u32 4294901760, %v4815_v61  ;;  %v4843_v32 = vand.u32 4294901760, %v147_v28 }
  0x23   :  { %442 = vmatpush1.msra.mxu1 %v441_v25  ;;  %v316_v25 = vsub.f32 %v4803_v55, %v315_v63  ;;  %v4851_v42 = vsub.f32 %v144_v5, %v4835_v27  ;;  %v108_v5 = vld [vmem:[%s7446_s1 + $0x78] sm:$0xff] }
  0x24   :  { %252 = vmatmul.mubr.f32.gmra.mxu0 %v251_v26  ;;  %477 = vmatmul.mubr.f32.vlgmr.msra.gmra.mxu1 %v4637_v6  ;;  %v327_v37 = vsub.f32 %v4815_v61, %v326_v22 }
  0x25   :  { %257 = vmatprep.mubr.f32.mxu0 %v7453_v2  ;;  %482 = vmatprep.mubr.f32.mxu1 %v7453_v2  ;;  %v317_v36 = vand.u32 4294901760, %v316_v25  ;;  %v348_v56 = vand.u32 4294901760, %v4851_v42 }
  0x26   :  { %816 = vmatprep.subr.mxu1 %v188_v51  ;;  %v328_v54 = vand.u32 4294901760, %v327_v37 }
  0x27   :  { %818 = vmatpush1.msra.mxu1 %v4717_v52  ;;  %v349_v25 = vsub.f32 %v4851_v42, %v348_v56 }
  0x28   :  { %263 = vmatmul.mubr.f32.gmra.mxu0 %v262_v31  ;;  %484 = vmatmul.mubr.f32.gmra.mxu1 %v4649_v11  ;;  %v106_v31 = vld [vmem:[%s7446_s1 + $0x68] sm:$0xff] }
  0x29   :  { %268 = vmatprep.mubr.f32.mxu0 %v7453_v2  ;;  %489 = vmatprep.mubr.f32.mxu1 %v7453_v2  ;;  %v150_v44 = vsel %vm109_vm0, %v106_v31, 0 }
  0x2a   :  { %1210 = vmatprep.subr.mxu1 %v188_v51  ;;  %v141_v51 = vsel %vm109_vm0, %v103_v46, 0  ;;  %v107_v46 = vld [vmem:[%s7446_s1 + $0x70] sm:$0xff]  ;;  %v4867_v58 = vand.u32 4294901760, %v150_v44 }
  0x2b   :  { %v4819_v4 = vand.u32 4294901760, %v141_v51 }
  0x2c   :  { %274 = vmatmul.mubr.f32.gmra.mxu0 %v273_v41  ;;  %491 = vmatmul.mubr.f32.gmra.mxu1 %v4673_v21 }
  0x2d   :  { %279 = vmatprep.mubr.f32.mxu0 %v7453_v2  ;;  %496 = vmatprep.mubr.f32.mxu1 %v7453_v2  ;;  %v4833_v26 = vsub.f32 %v141_v51, %v4819_v4 }
  0x2f   :  { %v337_v41 = vand.u32 4294901760, %v4833_v26 }
  0x30   :  { %285 = vmatmul.mubr.f32.gmra.mxu0 %v284_v53  ;;  %498 = vmatmul.mubr.f32.gmra.mxu1 %v4692_v34  ;;  %v4860_v53 = vsub.f32 %v147_v28, %v4843_v32  ;;  %v4881_v28 = vsub.f32 %v150_v44, %v4867_v58 }
  0x31   :  { %290 = vmatprep.mubr.f32.mxu0 %v7453_v2  ;;  %503 = vmatprep.mubr.f32.mxu1 %v7453_v2  ;;  %v338_v51 = vsub.f32 %v4833_v26, %v337_v41 }
  0x32   :  { %v359_v8 = vand.u32 4294901760, %v4860_v53 }
  0x34   :  { %296 = vmatmul.mubr.f32.gmra.mxu0 %v295_v62  ;;  %505 = vmatmul.mubr.f32.gmra.mxu1 %v4708_v45  ;;  %v153_v62 = vsel %vm109_vm0, %v107_v46, 0  ;;  %v360_v37 = vsub.f32 %v4860_v53, %v359_v8  ;;  %v350_v46 = vand.u32 4294901760, %v349_v25 }
  0x35   :  { %301 = vmatprep.mubr.f32.mxu0 %v7453_v2  ;;  %510 = vmatprep.mubr.f32.mxu1 %v7453_v2  ;;  %v4883_v31 = vand.u32 4294901760, %v153_v62 }
  0x37   :  { %v4894_v44 = vsub.f32 %v153_v62, %v4883_v31 }
  0x38   :  { %307 = vmatmul.mubr.f32.gmra.mxu0 %v306_v20  ;;  %512 = vmatmul.mubr.f32.gmra.mxu1 %v4735_v60  ;;  %v339_v20 = vand.u32 4294901760, %v338_v51 }
  0x39   :  { %312 = vmatprep.mubr.f32.mxu0 %v7453_v2  ;;  %517 = vmatprep.mubr.f32.mxu1 %v7453_v2  ;;  %v381_v25 = vand.u32 4294901760, %v4894_v44 }
  0x3c   :  { %318 = vmatmul.mubr.f32.gmra.mxu0 %v317_v36  ;;  %519 = vmatmul.mubr.f32.gmra.mxu1 %v4752_v15  ;;  %v156_v36 = vsel %vm109_vm0, %v108_v5, 0  ;;  %v361_v5 = vand.u32 4294901760, %v360_v37  ;;  %v382_v37 = vsub.f32 %v4894_v44, %v381_v25 }
  0x3d   :  { %323 = vmatprep.mubr.f32.mxu0 %v7453_v2  ;;  %524 = vmatprep.mubr.f32.mxu1 %v7453_v2  ;;  %v4896_v51 = vand.u32 4294901760, %v156_v36 }
  0x3f   :  { %v4906_v3 = vsub.f32 %v156_v36, %v4896_v51  ;;  %v383_v36 = vand.u32 4294901760, %v382_v37 }
  0x40   :  { %329 = vmatmul.mubr.f32.gmra.mxu0 %v328_v54  ;;  %526 = vmatmul.mubr.f32.gmra.mxu1 %v4765_v30  ;;  %v370_v54 = vand.u32 4294901760, %v4881_v28 }
  0x41   :  { %334 = vmatprep.mubr.f32.mxu0 %v7453_v2  ;;  %531 = vmatprep.mubr.f32.mxu1 %v7453_v2 }
  0x44   :  { %340 = vmatmul.mubr.f32.gmra.mxu0 %v339_v20  ;;  %533 = vmatmul.mubr.f32.gmra.mxu1 %v4787_v43  ;;  %v371_v20 = vsub.f32 %v4881_v28, %v370_v54 }
  0x45   :  { %345 = vmatprep.mubr.f32.mxu0 %v7453_v2  ;;  %538 = vmatprep.mubr.f32.mxu1 %v7453_v2 }
  0x46   :  { %v372_v62 = vand.u32 4294901760, %v371_v20 }
  0x48   :  { %351 = vmatmul.mubr.f32.gmra.mxu0 %v350_v46  ;;  %540 = vmatmul.mubr.f32.gmra.mxu1 %v4796_v48  ;;  %v392_v46 = vand.u32 4294901760, %v4906_v3 }
  0x49   :  { %356 = vmatprep.mubr.f32.mxu0 %v7453_v2  ;;  %545 = vmatprep.mubr.f32.mxu1 %v7453_v2 }
  0x4c   :  { %362 = vmatmul.mubr.f32.gmra.mxu0 %v361_v5  ;;  %547 = vmatmul.mubr.f32.gmra.mxu1 %v4819_v4  ;;  %v393_v5 = vsub.f32 %v4906_v3, %v392_v46 }
  0x4d   :  { %367 = vmatprep.mubr.f32.mxu0 %v7453_v2  ;;  %552 = vmatprep.mubr.f32.mxu1 %v7453_v2 }
  0x4e   :  { %v394_v20 = vand.u32 4294901760, %v393_v5 }
  0x50   :  { %373 = vmatmul.mubr.f32.gmra.mxu0 %v372_v62  ;;  %554 = vmatmul.mubr.f32.gmra.mxu1 %v4835_v27 }
  0x51   :  { %378 = vmatprep.mubr.f32.mxu0 %v7453_v2  ;;  %559 = vmatprep.mubr.f32.mxu1 %v7453_v2 }
  0x54   :  { %384 = vmatmul.mubr.f32.gmra.mxu0 %v383_v36  ;;  %561 = vmatmul.mubr.f32.gmra.mxu1 %v4843_v32 }
  0x55   :  { %389 = vmatprep.mubr.f32.mxu0 %v7453_v2  ;;  %566 = vmatprep.mubr.f32.mxu1 %v7453_v2 }
  0x58   :  { %395 = vmatmul.mubr.f32.gmra.mxu0 %v394_v20  ;;  %568 = vmatmul.mubr.f32.gmra.mxu1 %v4867_v58 }
  0x59   :  { %573 = vmatprep.mubr.f32.mxu1 %v7453_v2  ;;  %656 = vmatprep.mubr.f32.mxu0 %v7453_v2 }
  0x5c   :  { %575 = vmatmul.mubr.f32.gmra.mxu1 %v4883_v31  ;;  %659 = vmatmul.mubr.f32.vlgmr.msra.gmra.mxu0 %v4647_v10 }
  0x5d   :  { %580 = vmatprep.mubr.f32.mxu1 %v7453_v2  ;;  %664 = vmatprep.mubr.f32.mxu0 %v7453_v2 }
  0x5e   :  { %1033 = vmatpush1.msra.mxu0 %v439_v0 }
  0x60   :  { %582 = vmatmul.mubr.f32.gmra.mxu1 %v4896_v51  ;;  %667 = vmatmul.mubr.f32.gmra.mxu0 %v4677_v24 }
  0x61   :  { %672 = vmatprep.mubr.f32.mxu0 %v7453_v2  ;;  %851 = vmatprep.mubr.f32.mxu1 %v7453_v2 }
  0x64   :  { %675 = vmatmul.mubr.f32.gmra.mxu0 %v4690_v33  ;;  %855 = vmatmul.mubr.f32.vlgmr.msra.gmra.mxu1 %v227_v23 }
  0x65   :  { %680 = vmatprep.mubr.f32.mxu0 %v7453_v2  ;;  %860 = vmatprep.mubr.f32.mxu1 %v7453_v2 }
  0x66   :  { %1212 = vmatpush1.msra.mxu1 %v4717_v52 }
  0x68   :  { %683 = vmatmul.mubr.f32.gmra.mxu0 %v4715_v50  ;;  %864 = vmatmul.mubr.f32.gmra.mxu1 %v238_v40 }
  0x69   :  { %688 = vmatprep.mubr.f32.mxu0 %v7453_v2  ;;  %869 = vmatprep.mubr.f32.mxu1 %v7453_v2 }
  0x6c   :  { %691 = vmatmul.mubr.f32.gmra.mxu0 %v4733_v59  ;;  %873 = vmatmul.mubr.f32.gmra.mxu1 %v249_v49 }
  0x6d   :  { %696 = vmatprep.mubr.f32.mxu0 %v7453_v2  ;;  %878 = vmatprep.mubr.f32.mxu1 %v7453_v2 }
  0x70   :  { %699 = vmatmul.mubr.f32.gmra.mxu0 %v4750_v12  ;;  %882 = vmatmul.mubr.f32.gmra.mxu1 %v260_v1 }
  0x71   :  { %704 = vmatprep.mubr.f32.mxu0 %v7453_v2  ;;  %887 = vmatprep.mubr.f32.mxu1 %v7453_v2 }
  0x74   :  { %707 = vmatmul.mubr.f32.gmra.mxu0 %v4763_v29  ;;  %891 = vmatmul.mubr.f32.gmra.mxu1 %v271_v9 }
  0x75   :  { %712 = vmatprep.mubr.f32.mxu0 %v7453_v2  ;;  %896 = vmatprep.mubr.f32.mxu1 %v7453_v2 }
  0x78   :  { %715 = vmatmul.mubr.f32.gmra.mxu0 %v4780_v39  ;;  %900 = vmatmul.mubr.f32.gmra.mxu1 %v282_v35 }
  0x79   :  { %720 = vmatprep.mubr.f32.mxu0 %v7453_v2  ;;  %905 = vmatprep.mubr.f32.mxu1 %v7453_v2 }
  0x7c   :  { %723 = vmatmul.mubr.f32.gmra.mxu0 %v4803_v55  ;;  %909 = vmatmul.mubr.f32.gmra.mxu1 %v293_v38 }
  0x7d   :  { %728 = vmatprep.mubr.f32.mxu0 %v7453_v2  ;;  %914 = vmatprep.mubr.f32.mxu1 %v7453_v2 }
  0x80   :  { %731 = vmatmul.mubr.f32.gmra.mxu0 %v4815_v61  ;;  %918 = vmatmul.mubr.f32.gmra.mxu1 %v304_v47 }
  0x81   :  { %736 = vmatprep.mubr.f32.mxu0 %v7453_v2  ;;  %923 = vmatprep.mubr.f32.mxu1 %v7453_v2 }
  0x84   :  { %739 = vmatmul.mubr.f32.gmra.mxu0 %v4833_v26  ;;  %927 = vmatmul.mubr.f32.gmra.mxu1 %v315_v63 }
  0x85   :  { %744 = vmatprep.mubr.f32.mxu0 %v7453_v2  ;;  %932 = vmatprep.mubr.f32.mxu1 %v7453_v2 }
  0x88   :  { %747 = vmatmul.mubr.f32.gmra.mxu0 %v4851_v42  ;;  %936 = vmatmul.mubr.f32.gmra.mxu1 %v326_v22 }
  0x89   :  { %752 = vmatprep.mubr.f32.mxu0 %v7453_v2  ;;  %941 = vmatprep.mubr.f32.mxu1 %v7453_v2 }
  0x8c   :  { %755 = vmatmul.mubr.f32.gmra.mxu0 %v4860_v53  ;;  %945 = vmatmul.mubr.f32.gmra.mxu1 %v337_v41 }
  0x8d   :  { %760 = vmatprep.mubr.f32.mxu0 %v7453_v2  ;;  %950 = vmatprep.mubr.f32.mxu1 %v7453_v2 }
  0x90   :  { %763 = vmatmul.mubr.f32.gmra.mxu0 %v4881_v28  ;;  %954 = vmatmul.mubr.f32.gmra.mxu1 %v348_v56 }
  0x91   :  { %768 = vmatprep.mubr.f32.mxu0 %v7453_v2  ;;  %959 = vmatprep.mubr.f32.mxu1 %v7453_v2 }
  0x94   :  { %771 = vmatmul.mubr.f32.gmra.mxu0 %v4894_v44  ;;  %963 = vmatmul.mubr.f32.gmra.mxu1 %v359_v8 }
  0x95   :  { %776 = vmatprep.mubr.f32.mxu0 %v7453_v2  ;;  %968 = vmatprep.mubr.f32.mxu1 %v7453_v2 }
  0x98   :  { %779 = vmatmul.mubr.f32.gmra.mxu0 %v4906_v3  ;;  %972 = vmatmul.mubr.f32.gmra.mxu1 %v370_v54 }
  0x99   :  { %977 = vmatprep.mubr.f32.mxu1 %v7453_v2  ;;  %1066 = vmatprep.mubr.f32.mxu0 %v7453_v2 }
  0x9c   :  { %981 = vmatmul.mubr.f32.gmra.mxu1 %v381_v25  ;;  %1068 = vmatmul.mubr.f32.vlgmr.msra.gmra.mxu0 %v4637_v6 }
  0x9d   :  { %986 = vmatprep.mubr.f32.mxu1 %v7453_v2  ;;  %1073 = vmatprep.mubr.f32.mxu0 %v7453_v2 }
  0xa0   :  { %990 = vmatmul.mubr.f32.gmra.mxu1 %v392_v46  ;;  %1075 = vmatmul.mubr.f32.gmra.mxu0 %v4649_v11 }
  0xa1   :  { %1080 = vmatprep.mubr.f32.mxu0 %v7453_v2  ;;  %1245 = vmatprep.mubr.f32.mxu1 %v7453_v2 }
  0xa4   :  { %1082 = vmatmul.mubr.f32.gmra.mxu0 %v4673_v21  ;;  %1247 = vmatmul.mubr.f32.vlgmr.msra.gmra.mxu1 %v4637_v6 }
  0xa5   :  { %1087 = vmatprep.mubr.f32.mxu0 %v7453_v2  ;;  %1252 = vmatprep.mubr.f32.mxu1 %v7453_v2 }
  0xa8   :  { %1089 = vmatmul.mubr.f32.gmra.mxu0 %v4692_v34  ;;  %1254 = vmatmul.mubr.f32.gmra.mxu1 %v4649_v11 }
  0xa9   :  { %1094 = vmatprep.mubr.f32.mxu0 %v7453_v2  ;;  %1259 = vmatprep.mubr.f32.mxu1 %v7453_v2 }
  0xac   :  { %1096 = vmatmul.mubr.f32.gmra.mxu0 %v4708_v45  ;;  %1261 = vmatmul.mubr.f32.gmra.mxu1 %v4673_v21 }
  0xad   :  { %1101 = vmatprep.mubr.f32.mxu0 %v7453_v2  ;;  %1266 = vmatprep.mubr.f32.mxu1 %v7453_v2 }
  0xb0   :  { %1103 = vmatmul.mubr.f32.gmra.mxu0 %v4735_v60  ;;  %1268 = vmatmul.mubr.f32.gmra.mxu1 %v4692_v34 }
  0xb1   :  { %1108 = vmatprep.mubr.f32.mxu0 %v7453_v2  ;;  %1273 = vmatprep.mubr.f32.mxu1 %v7453_v2 }
  0xb4   :  { %1110 = vmatmul.mubr.f32.gmra.mxu0 %v4752_v15  ;;  %1275 = vmatmul.mubr.f32.gmra.mxu1 %v4708_v45 }
  0xb5   :  { %1115 = vmatprep.mubr.f32.mxu0 %v7453_v2  ;;  %1280 = vmatprep.mubr.f32.mxu1 %v7453_v2 }
  0xb8   :  { %1117 = vmatmul.mubr.f32.gmra.mxu0 %v4765_v30  ;;  %1282 = vmatmul.mubr.f32.gmra.mxu1 %v4735_v60 }
  0xb9   :  { %1122 = vmatprep.mubr.f32.mxu0 %v7453_v2  ;;  %1287 = vmatprep.mubr.f32.mxu1 %v7453_v2 }
  0xbc   :  { %1124 = vmatmul.mubr.f32.gmra.mxu0 %v4787_v43  ;;  %1289 = vmatmul.mubr.f32.gmra.mxu1 %v4752_v15 }
  0xbd   :  { %1129 = vmatprep.mubr.f32.mxu0 %v7453_v2  ;;  %1294 = vmatprep.mubr.f32.mxu1 %v7453_v2 }
  0xc0   :  { %1131 = vmatmul.mubr.f32.gmra.mxu0 %v4796_v48  ;;  %1296 = vmatmul.mubr.f32.gmra.mxu1 %v4765_v30 }
  0xc1   :  { %1136 = vmatprep.mubr.f32.mxu0 %v7453_v2  ;;  %1301 = vmatprep.mubr.f32.mxu1 %v7453_v2 }
  0xc4   :  { %1138 = vmatmul.mubr.f32.gmra.mxu0 %v4819_v4  ;;  %1303 = vmatmul.mubr.f32.gmra.mxu1 %v4787_v43 }
  0xc5   :  { %1143 = vmatprep.mubr.f32.mxu0 %v7453_v2  ;;  %1308 = vmatprep.mubr.f32.mxu1 %v7453_v2 }
  0xc8   :  { %1145 = vmatmul.mubr.f32.gmra.mxu0 %v4835_v27  ;;  %1310 = vmatmul.mubr.f32.gmra.mxu1 %v4796_v48 }
  0xc9   :  { %1150 = vmatprep.mubr.f32.mxu0 %v7453_v2  ;;  %1315 = vmatprep.mubr.f32.mxu1 %v7453_v2 }
  0xcc   :  { %1152 = vmatmul.mubr.f32.gmra.mxu0 %v4843_v32  ;;  %1317 = vmatmul.mubr.f32.gmra.mxu1 %v4819_v4 }
  0xcd   :  { %1157 = vmatprep.mubr.f32.mxu0 %v7453_v2  ;;  %1322 = vmatprep.mubr.f32.mxu1 %v7453_v2 }
  0xd0   :  { %1159 = vmatmul.mubr.f32.gmra.mxu0 %v4867_v58  ;;  %1324 = vmatmul.mubr.f32.gmra.mxu1 %v4835_v27 }
  0xd1   :  { %1164 = vmatprep.mubr.f32.mxu0 %v7453_v2  ;;  %1329 = vmatprep.mubr.f32.mxu1 %v7453_v2 }
  0xd4   :  { %1166 = vmatmul.mubr.f32.gmra.mxu0 %v4883_v31  ;;  %1331 = vmatmul.mubr.f32.gmra.mxu1 %v4843_v32 }
  0xd5   :  { %1171 = vmatprep.mubr.f32.mxu0 %v7453_v2  ;;  %1336 = vmatprep.mubr.f32.mxu1 %v7453_v2 }
  0xd8   :  { %1173 = vmatmul.mubr.f32.gmra.mxu0 %v4896_v51  ;;  %1338 = vmatmul.mubr.f32.gmra.mxu1 %v4867_v58 }
  0xd9   :  { %1343 = vmatprep.mubr.f32.mxu1 %v7453_v2  ;;  %1598 = vmatprep.mubr.f32.mxu0 %v7453_v2 }
  0xdc   :  { %v231_v3 = vpop.f32.mrf.mxu0  ;;  %1345 = vmatmul.mubr.f32.gmra.mxu1 %v4883_v31 }
  0xdd   :  { %1350 = vmatprep.mubr.f32.mxu1 %v7453_v2 }
  0xde   :  { %v5078_v6 = vpop.f32.mrf.mxu0 }
  0xe0   :  { %v242_v10 = vpop.f32.mrf.mxu0  ;;  %1352 = vmatmul.mubr.f32.gmra.mxu1 %v4896_v51 }
  0xe1   :  { %1999 = vmatprep.mubr.f32.mxu1 %v7453_v2 }
  0xe2   :  { %v5082_v11 = vpop.f32.mrf.mxu0 }
  0xe4   :  { %v253_v21 = vpop.f32.mrf.mxu0  ;;  %v478_v23 = vpop.f32.mrf.mxu1 }
  0xe5   :  { %v5084_v24 = vadd.f32 %v478_v23, %v231_v3 }
  0xe6   :  { %v5086_v33 = vpop.f32.mrf.mxu0  ;;  %v5088_v34 = vpop.f32.mrf.mxu1 }
  0xe8   :  { %v264_v40 = vpop.f32.mrf.mxu0  ;;  %v485_v45 = vpop.f32.mrf.mxu1 }
  0xe9   :  { %v5090_v49 = vadd.f32 %v485_v45, %v242_v10 }
  0xea   :  { %v5092_v50 = vpop.f32.mrf.mxu0  ;;  %v5094_v52 = vpop.f32.mrf.mxu1 }
  0xec   :  { %v275_v57 = vpop.f32.mrf.mxu0  ;;  %v492_v59 = vpop.f32.mrf.mxu1 }
  0xed   :  { %v5096_v60 = vadd.f32 %v492_v59, %v253_v21 }
  0xee   :  { %v5098_v0 = vpop.f32.mrf.mxu0  ;;  %v5100_v1 = vpop.f32.mrf.mxu1 }
  0xf0   :  { %v286_v9 = vpop.f32.mrf.mxu0  ;;  %v499_v12 = vpop.f32.mrf.mxu1 }
  0xf1   :  { %v5102_v15 = vadd.f32 %v499_v12, %v264_v40 }
  0xf2   :  { %v5104_v29 = vpop.f32.mrf.mxu0  ;;  %v5106_v30 = vpop.f32.mrf.mxu1 }
  0xf4   :  { %v297_v35 = vpop.f32.mrf.mxu0  ;;  %v506_v38 = vpop.f32.mrf.mxu1 }
  0xf5   :  { %v5108_v39 = vadd.f32 %v506_v38, %v275_v57 }
  0xf6   :  { %v5110_v43 = vpop.f32.mrf.mxu0  ;;  %v5112_v47 = vpop.f32.mrf.mxu1 }
  0xf8   :  { %v308_v48 = vpop.f32.mrf.mxu0  ;;  %v513_v55 = vpop.f32.mrf.mxu1 }
  0xf9   :  { %v5114_v61 = vadd.f32 %v513_v55, %v286_v9 }
  0xfa   :  { %v5116_v63 = vpop.f32.mrf.mxu0  ;;  %v5118_v4 = vpop.f32.mrf.mxu1 }
  0xfc   :  { %v319_v22 = vpop.f32.mrf.mxu0  ;;  %v520_v26 = vpop.f32.mrf.mxu1 }
  0xfd   :  { %v5120_v27 = vadd.f32 %v520_v26, %v297_v35 }
  0xfe   :  { %v5122_v32 = vpop.f32.mrf.mxu0  ;;  %v5124_v41 = vpop.f32.mrf.mxu1 }
 0x100   :  { %v330_v42 = vpop.f32.mrf.mxu0  ;;  %v527_v53 = vpop.f32.mrf.mxu1 }
 0x101   :  { %v5126_v56 = vadd.f32 %v527_v53, %v308_v48 }
 0x102   :  { %v5128_v58 = vpop.f32.mrf.mxu0  ;;  %v5130_v8 = vpop.f32.mrf.mxu1 }
 0x104   :  { %v341_v28 = vpop.f32.mrf.mxu0  ;;  %v534_v31 = vpop.f32.mrf.mxu1 }
 0x105   :  { %v5132_v54 = vadd.f32 %v534_v31, %v319_v22 }
 0x106   :  { %v5134_v44 = vpop.f32.mrf.mxu0  ;;  %v5136_v51 = vpop.f32.mrf.mxu1 }
 0x108   :  { %v352_v25 = vpop.f32.mrf.mxu0  ;;  %v541_v62 = vpop.f32.mrf.mxu1 }
 0x109   :  { %v5138_v37 = vadd.f32 %v541_v62, %v330_v42 }
 0x10a   :  { %v5140_v46 = vpop.f32.mrf.mxu0  ;;  %v5142_v36 = vpop.f32.mrf.mxu1 }
 0x10c   :  { %v363_v5 = vpop.f32.mrf.mxu0  ;;  %v548_v20 = vpop.f32.mrf.mxu1 }
 0x10d   :  { %v5144_v3 = vadd.f32 %v548_v20, %v341_v28 }
 0x10e   :  { %v5146_v10 = vpop.f32.mrf.mxu0  ;;  %v5148_v21 = vpop.f32.mrf.mxu1 }
 0x110   :  { %v374_v23 = vpop.f32.mrf.mxu0  ;;  %v555_v40 = vpop.f32.mrf.mxu1 }
 0x111   :  { %v5150_v45 = vadd.f32 %v555_v40, %v352_v25 }
 0x112   :  { %v5152_v57 = vpop.f32.mrf.mxu0  ;;  %v5154_v59 = vpop.f32.mrf.mxu1 }
 0x114   :  { %v385_v9 = vpop.f32.mrf.mxu0  ;;  %v562_v12 = vpop.f32.mrf.mxu1 }
 0x115   :  { %v5156_v35 = vadd.f32 %v562_v12, %v363_v5 }
 0x116   :  { %v5158_v38 = vpop.f32.mrf.mxu0  ;;  %v5160_v48 = vpop.f32.mrf.mxu1 }
 0x117   :  { %7634 = vst [vmem:[#allocation12_spill] sm:$0xff] %v5158_v38 }
 0x118   :  { %v396_v55 = vpop.f32.mrf.mxu0  ;;  %v569_v22 = vpop.f32.mrf.mxu1 }
 0x119   :  { %v5162_v26 = vadd.f32 %v569_v22, %v374_v23 }
 0x11a   :  { %v5164_v42 = vpop.f32.mrf.mxu0  ;;  %v5166_v53 = vpop.f32.mrf.mxu1 }
 0x11b   :  { %7635 = vst [vmem:[#allocation13_spill] sm:$0xff] %v5164_v42 }
 0x11c   :  { %v576_v28 = vpop.f32.mrf.mxu1  ;;  %v660_v31 = vpop.f32.mrf.mxu0 }
 0x11d   :  { %v5168_v25 = vadd.f32 %v576_v28, %v385_v9  ;;  %v661_v62 = vadd.f32 %v660_v31, %v5084_v24 }
 0x11e   :  { %v5171_v5 = vpop.f32.mrf.mxu1  ;;  %v5173_v20 = vpop.f32.mrf.mxu0 }
 0x11f   :  { %7636 = vst [vmem:[#allocation14_spill] sm:$0xff] %v5171_v5  ;;  %7637 = vst [vmem:[#allocation15_spill] sm:$0xff] %v5173_v20 }
 0x120   :  { %v583_v40 = vpop.f32.mrf.mxu1  ;;  %v668_v12 = vpop.f32.mrf.mxu0 }
 0x121   :  { %v5175_v2 = vadd.f32 %v583_v40, %v396_v55  ;;  %v669_v23 = vadd.f32 %v668_v12, %v5090_v49 }
 0x122   :  { %v5178_v22 = vpop.f32.mrf.mxu1  ;;  %v5180_v16 = vpop.f32.mrf.mxu0 }
 0x123   :  { %7638 = vst [vmem:[#allocation16_spill] sm:$0xff] %v5175_v2  ;;  %7639 = vst [vmem:[#allocation17_spill] sm:$0xff] %v5178_v22 }
 0x124   :  { %v676_v18 = vpop.f32.mrf.mxu0  ;;  %v856_v7 = vpop.f32.mrf.mxu1 }
 0x125   :  { %v677_v9 = vadd.f32 %v676_v18, %v5096_v60  ;;  %v5183_v28 = vadd.f32 %v856_v7, %v661_v62 }
 0x126   :  { %v5185_v24 = vpop.f32.mrf.mxu0  ;;  %v5187_v31 = vpop.f32.mrf.mxu1 }
 0x127   :  { %7640 = vst [vmem:[#allocation18_spill] sm:$0xff] %v5187_v31 }
 0x128   :  { %v684_v13 = vpop.f32.mrf.mxu0  ;;  %v865_v14 = vpop.f32.mrf.mxu1 }
 0x129   :  { %v685_v55 = vadd.f32 %v684_v13, %v5102_v15  ;;  %v5190_v40 = vadd.f32 %v865_v14, %v669_v23 }
 0x12a   :  { %v5192_v49 = vpop.f32.mrf.mxu0  ;;  %v5194_v12 = vpop.f32.mrf.mxu1 }
 0x12c   :  { %v692_v17 = vpop.f32.mrf.mxu0  ;;  %v874_v19 = vpop.f32.mrf.mxu1 }
 0x12d   :  { %v693_v18 = vadd.f32 %v692_v17, %v5108_v39  ;;  %v5197_v7 = vadd.f32 %v874_v19, %v677_v9 }
 0x12e   :  { %v5199_v60 = vpop.f32.mrf.mxu0  ;;  %v5201_v62 = vpop.f32.mrf.mxu1 }
 0x130   :  { %v700_v31 = vpop.f32.mrf.mxu0  ;;  %v883_v2 = vpop.f32.mrf.mxu1 }
 0x131   :  { %v701_v13 = vadd.f32 %v700_v31, %v5114_v61  ;;  %v5204_v14 = vadd.f32 %v883_v2, %v685_v55 }
 0x132   :  { %v5206_v15 = vpop.f32.mrf.mxu0  ;;  %v5208_v23 = vpop.f32.mrf.mxu1 }
 0x133   :  { %7641 = vst [vmem:[#allocation19_spill] sm:$0xff] %v5206_v15 }
 0x134   :  { %v708_v22 = vpop.f32.mrf.mxu0  ;;  %v892_v42 = vpop.f32.mrf.mxu1 }
 0x135   :  { %v709_v17 = vadd.f32 %v708_v22, %v5120_v27  ;;  %v5211_v19 = vadd.f32 %v892_v42, %v693_v18 }
 0x136   :  { %v5213_v39 = vpop.f32.mrf.mxu0  ;;  %v5215_v9 = vpop.f32.mrf.mxu1 }
 0x137   :  { %7642 = vst [vmem:[#allocation20_spill] sm:$0xff] %v5213_v39  ;;  %7643 = vst [vmem:[#allocation21_spill] sm:$0xff] %v5215_v9 }
 0x138   :  { %v716_v20 = vpop.f32.mrf.mxu0  ;;  %v901_v5 = vpop.f32.mrf.mxu1 }
 0x139   :  { %v717_v61 = vadd.f32 %v716_v20, %v5126_v56  ;;  %v5218_v2 = vadd.f32 %v901_v5, %v701_v13 }
 0x13a   :  { %v5220_v31 = vpop.f32.mrf.mxu0  ;;  %v5222_v55 = vpop.f32.mrf.mxu1 }
 0x13b   :  { %7644 = vst [vmem:[#allocation22_spill] sm:$0xff] %v5218_v2  ;;  %7645 = vst [vmem:[#allocation23_spill] sm:$0xff] %v5222_v55 }
 0x13c   :  { %v724_v15 = vpop.f32.mrf.mxu0  ;;  %v910_v38 = vpop.f32.mrf.mxu1 }
 0x13d   :  { %v725_v27 = vadd.f32 %v724_v15, %v5132_v54  ;;  %v5225_v42 = vadd.f32 %v910_v38, %v709_v17 }
 0x13e   :  { %v5227_v22 = vpop.f32.mrf.mxu0  ;;  %v5229_v18 = vpop.f32.mrf.mxu1 }
 0x13f   :  { %7646 = vst [vmem:[#allocation24_spill] sm:$0xff] %v5225_v42  ;;  %7647 = vst [vmem:[#allocation25_spill] sm:$0xff] %v5229_v18 }
 0x140   :  { %v732_v9 = vpop.f32.mrf.mxu0  ;;  %v919_v39 = vpop.f32.mrf.mxu1 }
 0x141   :  { %v733_v56 = vadd.f32 %v732_v9, %v5138_v37  ;;  %v5232_v5 = vadd.f32 %v919_v39, %v717_v61 }
 0x142   :  { %v5234_v20 = vpop.f32.mrf.mxu0  ;;  %v5236_v13 = vpop.f32.mrf.mxu1 }
 0x143   :  { %7648 = vst [vmem:[#allocation26_spill] sm:$0xff] %v5232_v5  ;;  %7649 = vst [vmem:[#allocation27_spill] sm:$0xff] %v5234_v20 }
 0x144   :  { %v740_v2 = vpop.f32.mrf.mxu0  ;;  %v928_v55 = vpop.f32.mrf.mxu1 }
 0x145   :  { %v741_v54 = vadd.f32 %v740_v2, %v5144_v3  ;;  %v5239_v38 = vadd.f32 %v928_v55, %v725_v27 }
 0x146   :  { %v5241_v15 = vpop.f32.mrf.mxu0  ;;  %v5243_v17 = vpop.f32.mrf.mxu1 }
 0x147   :  { %7650 = vst [vmem:[#allocation28_spill] sm:$0xff] %v5239_v38  ;;  %7651 = vst [vmem:[#allocation29_spill] sm:$0xff] %v5243_v17 }
 0x148   :  { %v748_v42 = vpop.f32.mrf.mxu0  ;;  %v937_v18 = vpop.f32.mrf.mxu1 }
 0x149   :  { %v749_v37 = vadd.f32 %v748_v42, %v5150_v45  ;;  %v5246_v39 = vadd.f32 %v937_v18, %v733_v56 }
 0x14a   :  { %v5248_v9 = vpop.f32.mrf.mxu0  ;;  %v5250_v61 = vpop.f32.mrf.mxu1 }
 0x14b   :  { %7652 = vst [vmem:[#allocation30_spill] sm:$0xff] %v5246_v39  ;;  %7653 = vst [vmem:[#allocation31_spill] sm:$0xff] %v5250_v61 }
 0x14c   :  { %v756_v20 = vpop.f32.mrf.mxu0  ;;  %v946_v5 = vpop.f32.mrf.mxu1 }
 0x14d   :  { %v757_v3 = vadd.f32 %v756_v20, %v5156_v35  ;;  %v5253_v2 = vadd.f32 %v946_v5, %v741_v54 }
 0x14e   :  { %v5255_v55 = vpop.f32.mrf.mxu0  ;;  %v5257_v27 = vpop.f32.mrf.mxu1 }
 0x14f   :  { %7654 = vst [vmem:[#allocation32_spill] sm:$0xff] %v5253_v2  ;;  %7655 = vst [vmem:[#allocation33_spill] sm:$0xff] %v5255_v55 }
 0x150   :  { %7656 = vst [vmem:[#allocation34_spill] sm:$0xff] %v5257_v27  ;;  %v764_v38 = vpop.f32.mrf.mxu0  ;;  %v955_v17 = vpop.f32.mrf.mxu1 }
 0x151   :  { %v765_v45 = vadd.f32 %v764_v38, %v5162_v26  ;;  %v5260_v42 = vadd.f32 %v955_v17, %v749_v37 }
 0x152   :  { %v5262_v18 = vpop.f32.mrf.mxu0  ;;  %v5264_v56 = vpop.f32.mrf.mxu1 }
 0x153   :  { %7657 = vst [vmem:[#allocation35_spill] sm:$0xff] %v5260_v42  ;;  %7658 = vst [vmem:[#allocation36_spill] sm:$0xff] %v5262_v18 }
 0x154   :  { %7659 = vst [vmem:[#allocation37_spill] sm:$0xff] %v5264_v56  ;;  %v772_v39 = vpop.f32.mrf.mxu0  ;;  %v964_v61 = vpop.f32.mrf.mxu1 }
 0x155   :  { %v773_v35 = vadd.f32 %v772_v39, %v5168_v25  ;;  %v5267_v5 = vadd.f32 %v964_v61, %v757_v3 }
 0x156   :  { %v5269_v20 = vpop.f32.mrf.mxu0  ;;  %v5271_v54 = vpop.f32.mrf.mxu1 }
 0x157   :  { %7660 = vst [vmem:[#allocation38_spill] sm:$0xff] %v5267_v5  ;;  %7661 = vst [vmem:[#allocation39_spill] sm:$0xff] %v5269_v20 }
 0x158   :  { %7662 = vst [vmem:[#allocation40_spill] sm:$0xff] %v5271_v54  ;;  %v5273_v2 = vpop.f32.mrf.mxu0  ;;  %v973_v27 = vpop.f32.mrf.mxu1 }
 0x159   :  { %7663 = vst [vmem:[#allocation41_spill] sm:$0xff] %v5273_v2  ;;  %v5275_v26 = vadd.f32 %v973_v27, %v765_v45 }
 0x15a   :  { %v5277_v38 = vpop.f32.mrf.mxu0  ;;  %v5279_v17 = vpop.f32.mrf.mxu1 }
 0x15b   :  { %7664 = vst [vmem:[#allocation42_spill] sm:$0xff] %v5275_v26  ;;  %7665 = vst [vmem:[#allocation43_spill] sm:$0xff] %v5277_v38 }
 0x15c   :  { %7666 = vst [vmem:[#allocation44_spill] sm:$0xff] %v5279_v17  ;;  %v982_v37 = vpop.f32.mrf.mxu1  ;;  %v1069_v42 = vpop.f32.mrf.mxu0 }
 0x15d   :  { %v5281_v56 = vadd.f32 %v982_v37, %v773_v35  ;;  %v1070_v25 = vadd.f32 %v1069_v42, %v5183_v28 }
 0x15e   :  { %v5284_v39 = vpop.f32.mrf.mxu1  ;;  %v5286_v61 = vpop.f32.mrf.mxu0 }
 0x15f   :  { %7667 = vst [vmem:[#allocation45_spill] sm:$0xff] %v5281_v56  ;;  %7668 = vst [vmem:[#allocation46_spill] sm:$0xff] %v5284_v39 }
 0x160   :  { %7669 = vst [vmem:[#allocation47_spill] sm:$0xff] %v5286_v61  ;;  %v5288_v3 = vpop.f32.mrf.mxu1  ;;  %v1076_v5 = vpop.f32.mrf.mxu0 }
 0x161   :  { %7670 = vst [vmem:[#allocation48_spill] sm:$0xff] %v5288_v3  ;;  %v1077_v27 = vadd.f32 %v1076_v5, %v5190_v40 }
 0x162   :  { %v5291_v45 = vpop.f32.mrf.mxu1  ;;  %v1078_v38 = vpop.f32.mrf.mxu0 }
 0x163   :  { %7671 = vst [vmem:[#allocation49_spill] sm:$0xff] %v5291_v45 }
 0x164   :  { %v1083_v26 = vpop.f32.mrf.mxu0  ;;  %v1248_v2 = vpop.f32.mrf.mxu1 }
 0x165   :  { %v1084_v20 = vadd.f32 %v1083_v26, %v5197_v7  ;;  %v5294_v35 = vadd.f32 %v1248_v2, %v1070_v25 }
 0x166   :  { %v5296_v37 = vpop.f32.mrf.mxu0  ;;  %v5298_v28 = vpop.f32.mrf.mxu1 }
 0x167   :  { %7672 = vst [vmem:[#allocation50_spill] sm:$0xff] %v5298_v28  ;;  %4397 = vtanh.f32 %v5294_v35 }
 0x168   :  { %v1090_v42 = vpop.f32.mrf.mxu0  ;;  %v1255_v61 = vpop.f32.mrf.mxu1 }
 0x169   :  { %v1091_v3 = vadd.f32 %v1090_v42, %v5204_v14  ;;  %v5301_v56 = vadd.f32 %v1255_v61, %v1077_v27 }
 0x16a   :  { %v5303_v40 = vpop.f32.mrf.mxu0  ;;  %v1257_v5 = vpop.f32.mrf.mxu1 }
 0x16b   :  { %4399 = vtanh.f32 %v5301_v56 }
 0x16c   :  { %v1097_v45 = vpop.f32.mrf.mxu0  ;;  %v1262_v39 = vpop.f32.mrf.mxu1 }
 0x16d   :  { %v1098_v17 = vadd.f32 %v1097_v45, %v5211_v19  ;;  %v5306_v7 = vadd.f32 %v1262_v39, %v1084_v20 }
 0x16e   :  { %v5308_v2 = vpop.f32.mrf.mxu0  ;;  %v1264_v26 = vpop.f32.mrf.mxu1 }
 0x170   :  { %v5310_v25 = vpop.f32.mrf.mxu0  ;;  %v1269_v28 = vpop.f32.mrf.mxu1 }
 0x171   :  { %v5312_v54 = vadd.f32 %v1269_v28, %v1091_v3 }
 0x172   :  { %v5314_v14 = vpop.f32.mrf.mxu0  ;;  %v5316_v61 = vpop.f32.mrf.mxu1 }
 0x173   :  { %7673 = vst [vmem:[#allocation51_spill] sm:$0xff] %v5312_v54 }
 0x174   :  { %v5318_v27 = vpop.f32.mrf.mxu0  ;;  %v1276_v42 = vpop.f32.mrf.mxu1 }
 0x175   :  { %7674 = vst [vmem:[#allocation52_spill] sm:$0xff] %v5318_v27  ;;  %v5320_v18 = vadd.f32 %v1276_v42, %v1098_v17 }
 0x176   :  { %v5322_v19 = vpop.f32.mrf.mxu0  ;;  %v5324_v20 = vpop.f32.mrf.mxu1 }
 0x177   :  { %7675 = vst [vmem:[#allocation53_spill] sm:$0xff] %v5320_v18  ;;  %7676 = vst [vmem:[#allocation54_spill] sm:$0xff] %v5322_v19 }
 0x178   :  { %v5326_v39 = vpop.f32.mrf.mxu0  ;;  %v5328_v45 = vpop.f32.mrf.mxu1 }
 0x179   :  { %7677 = vst [vmem:[#allocation55_spill] sm:$0xff] %v5326_v39  ;;  %v488_v39 = vadd.f32 %v5094_v52, %v5082_v11  ;;  %v502_v11 = vadd.f32 %v5106_v30, %v5092_v50  ;;  %v537_v50 = vadd.f32 %v5136_v51, %v5122_v32 }
 0x17a   :  { %v5330_v55 = vpop.f32.mrf.mxu0  ;;  %v5332_v3 = vpop.f32.mrf.mxu1 }
 0x17b   :  { %7678 = vst [vmem:[#allocation56_spill] sm:$0xff] %v5330_v55  ;;  %7679 = vst [vmem:[#allocation57_spill] sm:$0xff] %v5332_v3  ;;  %v687_v30 = vadd.f32 %v5192_v49, %v502_v11  ;;  %v7691_v11 = vld [vmem:[#allocation25_spill] sm:$0xff] }
 0x17c   :  { %v5334_v28 = vpop.f32.mrf.mxu0  ;;  %v5336_v54 = vpop.f32.mrf.mxu1 }
 0x17d   :  { %7680 = vst [vmem:[#allocation58_spill] sm:$0xff] %v5334_v28  ;;  %7681 = vst [vmem:[#allocation59_spill] sm:$0xff] %v5336_v54  ;;  %v495_v28 = vadd.f32 %v5100_v1, %v5086_v33  ;;  %v671_v54 = vadd.f32 %v5180_v16, %v488_v39  ;;  %v509_v33 = vadd.f32 %v5112_v47, %v5098_v0 }
 0x17e   :  { %v5338_v27 = vpop.f32.mrf.mxu0  ;;  %v5340_v17 = vpop.f32.mrf.mxu1  ;;  %v516_v16 = vadd.f32 %v5118_v4, %v5104_v29  ;;  %v523_v1 = vadd.f32 %v5124_v41, %v5110_v43  ;;  %v5385_v29 = vadd.f32 %v5142_v36, %v5128_v58  ;;  %v551_v43 = vadd.f32 %v5148_v21, %v5134_v44  ;;  %v7685_v21 = vld [vmem:[#allocation12_spill] sm:$0xff] }
 0x17f   :  { %7682 = vst [vmem:[#allocation60_spill] sm:$0xff] %v5338_v27  ;;  %v679_v52 = vadd.f32 %v5185_v24, %v495_v28  ;;  %v565_v4 = vadd.f32 %v5160_v48, %v5146_v10  ;;  %v886_v51 = vadd.f32 %v5208_v23, %v687_v30  ;;  %v572_v44 = vadd.f32 %v5166_v53, %v5152_v57  ;;  %v7686_v24 = vld [vmem:[#allocation14_spill] sm:$0xff]  ;;  %v7688_v48 = vld [vmem:[#allocation20_spill] sm:$0xff]  ;;  %v7690_v53 = vld [vmem:[#allocation23_spill] sm:$0xff] }
 0x180   :  { %v5342_v42 = vpop.f32.mrf.mxu0  ;;  %v5344_v18 = vpop.f32.mrf.mxu1  ;;  %v711_v49 = vadd.f32 %v7688_v48, %v523_v1  ;;  %v7693_v1 = vld [vmem:[#allocation29_spill] sm:$0xff]  ;;  %v7694_v30 = vld [vmem:[#allocation51_spill] sm:$0xff] }
 0x181   :  { %7683 = vst [vmem:[#allocation61_spill] sm:$0xff] %v5342_v42  ;;  %v5361_v42 = vadd.f32 %v5088_v34, %v5078_v6  ;;  %v530_v6 = vadd.f32 %v5130_v8, %v5116_v63  ;;  %v877_v0 = vadd.f32 %v5201_v62, %v679_v52  ;;  %v558_v63 = vadd.f32 %v5154_v59, %v5140_v46  ;;  %v7687_v59 = vld [vmem:[#allocation19_spill] sm:$0xff] }
 0x182   :  { %v5348_v19 = vpop.f32.mrf.mxu0  ;;  %v5350_v55 = vpop.f32.mrf.mxu1  ;;  %v695_v8 = vadd.f32 %v5199_v60, %v509_v33  ;;  %v5404_v46 = vadd.f32 %v7686_v24, %v7685_v21  ;;  %v703_v10 = vadd.f32 %v7687_v59, %v516_v16  ;;  %v7689_v60 = vld [vmem:[#allocation21_spill] sm:$0xff]  ;;  %v1093_v23 = vadd.f32 %v5303_v40, %v886_v51  ;;  %v7698_v51 = vld [vmem:[#allocation54_spill] sm:$0xff]  ;;  %v7703_v24 = vld [vmem:[#allocation55_spill] sm:$0xff] }
 0x183   :  { %7684 = vst [vmem:[#allocation62_spill] sm:$0xff] %v5348_v19  ;;  %v868_v19 = vadd.f32 %v5194_v12, %v671_v54  ;;  %v1086_v58 = vadd.f32 %v5296_v37, %v877_v0  ;;  %v719_v57 = vadd.f32 %v5220_v31, %v530_v6  ;;  %v913_v52 = vadd.f32 %v7691_v11, %v711_v49 }
 0x184   :  { %v5355_v3 = vpop.f32.mrf.mxu0  ;;  %v5357_v27 = vpop.f32.mrf.mxu1  ;;  %v895_v54 = vadd.f32 %v7689_v60, %v695_v8  ;;  %v904_v37 = vadd.f32 %v7690_v53, %v703_v10  ;;  %v1272_v40 = vadd.f32 %v5316_v61, %v1093_v23  ;;  %v743_v31 = vadd.f32 %v5241_v15, %v551_v43  ;;  %v7696_v15 = vld [vmem:[#allocation52_spill] sm:$0xff]  ;;  %v7697_v43 = vld [vmem:[#allocation33_spill] sm:$0xff]  ;;  %v7704_v10 = vld [vmem:[#allocation59_spill] sm:$0xff] }
 0x185   :  { %v1079_v47 = vadd.f32 %v1078_v38, %v868_v19  ;;  %v1265_v38 = vadd.f32 %v1264_v26, %v1086_v58  ;;  %v922_v26 = vadd.f32 %v5236_v13, %v719_v57  ;;  %v751_v61 = vadd.f32 %v5248_v9, %v558_v63  ;;  %v7695_v13 = vld [vmem:[#allocation24_spill] sm:$0xff]  ;;  %v7701_v9 = vld [vmem:[#allocation53_spill] sm:$0xff]  ;;  %v7702_v63 = vld [vmem:[#allocation26_spill] sm:$0xff] }
 0x186   :  { %v5375_v34 = vpop.f32.mrf.mxu0  ;;  %v5377_v39 = vpop.f32.mrf.mxu1  ;;  %v1100_v35 = vadd.f32 %v5308_v2, %v895_v54  ;;  %v1112_v0 = vadd.f32 %v7696_v15, %v7695_v13  ;;  %v759_v8 = vadd.f32 %v7697_v43, %v565_v4  ;;  %v1114_v58 = vadd.f32 %v7698_v51, %v913_v52  ;;  %v7705_v60 = vld [vmem:[#allocation36_spill] sm:$0xff]  ;;  %v7707_v57 = vld [vmem:[#allocation37_spill] sm:$0xff] }
 0x187   :  { %v1258_v36 = vadd.f32 %v1257_v5, %v1079_v47  ;;  %v727_v5 = vadd.f32 %v5227_v22, %v537_v50  ;;  %v7692_v22 = vld [vmem:[#allocation22_spill] sm:$0xff]  ;;  %v1107_v50 = vadd.f32 %v5314_v14, %v904_v37  ;;  %v7699_v14 = vld [vmem:[#allocation57_spill] sm:$0xff]  ;;  %v1119_v59 = vadd.f32 %v7703_v24, %v7702_v63  ;;  %v7706_v4 = vld [vmem:[#allocation56_spill] sm:$0xff] }
 0x188   :  { %v5393_v41 = vpop.f32.mrf.mxu0  ;;  %v5395_v32 = vpop.f32.mrf.mxu1  ;;  %v1105_v56 = vadd.f32 %v5310_v25, %v7692_v22  ;;  %v1279_v2 = vadd.f32 %v5324_v20, %v1100_v35  ;;  %v7700_v20 = vld [vmem:[#allocation34_spill] sm:$0xff]  ;;  %v1291_v48 = vadd.f32 %v7704_v10, %v1112_v0  ;;  %v767_v54 = vadd.f32 %v7705_v60, %v572_v44  ;;  %v7708_v37 = vld [vmem:[#allocation60_spill] sm:$0xff]  ;;  %v7713_v13 = vld [vmem:[#allocation13_spill] sm:$0xff] }
 0x189   :  { %4401 = vtanh.f32 %v1258_v36  ;;  %v931_v6 = vadd.f32 %v7693_v1, %v727_v5  ;;  %v1286_v36 = vadd.f32 %v7699_v14, %v1107_v50  ;;  %v949_v21 = vadd.f32 %v7700_v20, %v743_v31  ;;  %v7715_v0 = vld [vmem:[#allocation27_spill] sm:$0xff]  ;;  %v7718_v14 = vld [vmem:[#allocation16_spill] sm:$0xff]  ;;  %v7722_v10 = vld [vmem:[#allocation46_spill] sm:$0xff] }
 0x18a   :  { %v1148_v12 = vpop.f32.mrf.mxu0  ;;  %v5408_v62 = vpop.f32.mrf.mxu1  ;;  %4403 = vtanh.f32 %v5306_v7  ;;  %v1284_v7 = vadd.f32 %v5328_v45, %v1105_v56  ;;  %v1121_v23 = vadd.f32 %v7706_v4, %v922_v26  ;;  %v958_v53 = vadd.f32 %v7707_v57, %v751_v61  ;;  %v7710_v26 = vld [vmem:[#allocation15_spill] sm:$0xff] }
 0x18b   :  { %4405 = vtanh.f32 %v1265_v38  ;;  %v1293_v38 = vadd.f32 %v5340_v17, %v1114_v58  ;;  %v1128_v5 = vadd.f32 %v7708_v37, %v931_v6  ;;  %v1298_v11 = vadd.f32 %v5344_v18, %v1119_v59  ;;  %v7711_v18 = vld [vmem:[#allocation44_spill] sm:$0xff] }
 0x18c   :  { %v5417_v19 = vpop.f32.mrf.mxu0  ;;  %v5419_v28 = vpop.f32.mrf.mxu1  ;;  %4407 = vtanh.f32 %v7694_v30  ;;  %v1300_v22 = vadd.f32 %v5350_v55, %v1121_v23  ;;  %v1142_v44 = vadd.f32 %v5375_v34, %v949_v21  ;;  %v5458_v56 = vadd.f32 %v7710_v26, %v5361_v42  ;;  %v1390_v55 = vld [vmem:[%s7447_s2] sm:$0xff]  ;;  %v7714_v42 = vld [vmem:[#allocation17_spill] sm:$0xff]  ;;  %v7720_v21 = vld [vmem:[#allocation42_spill] sm:$0xff] }
 0x18d   :  { %4409 = vtanh.f32 %v1272_v40  ;;  %v7709_v40 = vld [vmem:[#allocation40_spill] sm:$0xff]  ;;  %v1307_v17 = vadd.f32 %v5377_v39, %v1128_v5  ;;  %v1149_v1 = vadd.f32 %v1148_v12, %v958_v53  ;;  %v5465_v34 = vpop.eup %4397  ;;  %v586_v15 = vadd.f32 %v7714_v42, %v7713_v13  ;;  %v7725_v23 = vld [vmem:[#allocation38_spill] sm:$0xff] }
 0x18e   :  { %v1155_v33 = vpop.f32.mrf.mxu0  ;;  %v1320_v16 = vpop.f32.mrf.mxu1  ;;  %4411 = vtanh.f32 %v7701_v9  ;;  %v967_v31 = vadd.f32 %v7709_v40, %v759_v8  ;;  %7712 = vst [vmem:[#allocation12_spill] sm:$0xff] %v5465_v34  ;;  %v735_v39 = vadd.f32 %v7715_v0, %v5385_v29  ;;  %v5480_v24 = vand.u32 4294901760, %v1390_v55  ;;  %v7726_v37 = vld [vmem:[#allocation48_spill] sm:$0xff] }
 0x18f   :  { %4413 = vtanh.f32 %v1279_v2  ;;  %v976_v2 = vadd.f32 %v7711_v18, %v767_v54  ;;  %v1321_v30 = vadd.f32 %v1320_v16, %v1142_v44  ;;  %v5471_v43 = vpop.eup %4399  ;;  %v7724_v54 = vld [vmem:[#allocation43_spill] sm:$0xff]  ;;  %v7729_v18 = vld [vmem:[#allocation49_spill] sm:$0xff]  ;;  %v7730_v13 = vld [vmem:[#allocation32_spill] sm:$0xff] }
 0x190   :  { %v1160_v47 = vpop.f32.mrf.mxu0  ;;  %v5437_v25 = vpop.f32.mrf.mxu1  ;;  %4415 = vtanh.f32 %v1284_v7  ;;  %v1156_v61 = vadd.f32 %v1155_v33, %v967_v31  ;;  %7716 = vst [vmem:[#allocation14_spill] sm:$0xff] %v5471_v43  ;;  %v7717_v33 = vld [vmem:[#allocation39_spill] sm:$0xff]  ;;  %7721 = vst [vmem:[#allocation19_spill] sm:$0xff] %v5480_v24  ;;  %v783_v4 = vadd.f32 %v7724_v54, %v586_v15  ;;  %v1140_v42 = vadd.f32 %v5355_v3, %v7730_v13 }
 0x191   :  { %4417 = vtanh.f32 %v1286_v36  ;;  %v775_v16 = vadd.f32 %v7717_v33, %v5404_v46  ;;  %v7719_v36 = vld [vmem:[#allocation41_spill] sm:$0xff]  ;;  %v1161_v9 = vadd.f32 %v1160_v47, %v7720_v21  ;;  %v7728_v44 = vld [vmem:[#allocation35_spill] sm:$0xff] }
 0x192   :  { %v1162_v45 = vpop.f32.mrf.mxu0  ;;  %v1327_v49 = vpop.f32.mrf.mxu1  ;;  %4419 = vtanh.f32 %v1291_v48  ;;  %v781_v20 = vadd.f32 %v7719_v36, %v7718_v14  ;;  %v7723_v46 = vld [vmem:[#allocation45_spill] sm:$0xff]  ;;  %v1147_v26 = vadd.f32 %v5393_v41, %v7728_v44  ;;  %v1319_v3 = vadd.f32 %v5419_v28, %v1140_v42 }
 0x193   :  { %4421 = vtanh.f32 %v1293_v38  ;;  %v1328_v12 = vadd.f32 %v1327_v49, %v1149_v1  ;;  %v1163_v8 = vadd.f32 %v1162_v45, %v976_v2  ;;  %v985_v48 = vadd.f32 %v7722_v10, %v775_v16  ;;  %v7737_v10 = vld [vmem:[#allocation58_spill] sm:$0xff] }
 0x194   :  { %v1167_v52 = vpop.f32.mrf.mxu0  ;;  %v1332_v35 = vpop.f32.mrf.mxu1  ;;  %4423 = vtanh.f32 %v1298_v11  ;;  %v1154_v38 = vadd.f32 %v5417_v19, %v7725_v23  ;;  %v992_v5 = vadd.f32 %v7726_v37, %v781_v20  ;;  %v994_v2 = vadd.f32 %v7729_v18, %v783_v4 }
 0x195   :  { %4425 = vtanh.f32 %v1300_v22  ;;  %v1168_v45 = vadd.f32 %v1167_v52, %v7723_v46  ;;  %v7727_v52 = vld [vmem:[#allocation31_spill] sm:$0xff]  ;;  %v1326_v15 = vadd.f32 %v5437_v25, %v1147_v26  ;;  %v5571_v18 = vand.u32 4294901760, %v5471_v43 }
 0x196   :  { %v1169_v6 = vpop.f32.mrf.mxu0  ;;  %v1334_v50 = vpop.f32.mrf.mxu1  ;;  %4427 = vtanh.f32 %v1307_v17  ;;  %v940_v22 = vadd.f32 %v7727_v52, %v735_v39  ;;  %v1333_v17 = vadd.f32 %v1332_v35, %v1154_v38  ;;  %v5508_v35 = vsub.f32 %v1390_v55, %v5480_v24  ;;  %v7732_v39 = vld [vmem:[#allocation62_spill] sm:$0xff] }
 0x197   :  { %v1335_v51 = vadd.f32 %v1334_v50, %v1156_v61  ;;  %v5475_v58 = vpop.eup %4401  ;;  %4429 = vtanh.f32 %v1321_v30  ;;  %v1170_v11 = vadd.f32 %v1169_v6, %v985_v48  ;;  %v7735_v55 = vld [vmem:[#allocation18_spill] sm:$0xff]  ;;  %7747 = vst [vmem:[#allocation52_spill] sm:$0xff] %v5571_v18 }
 0x198   :  { %v1339_v7 = vpop.f32.mrf.mxu1  ;;  %v1174_v29 = vpop.f32.mrf.mxu0  ;;  %4431 = vtanh.f32 %v1328_v12  ;;  %7731 = vst [vmem:[#allocation20_spill] sm:$0xff] %v5508_v35  ;;  %v1135_v12 = vadd.f32 %v7732_v39, %v940_v22  ;;  %v859_v20 = vadd.f32 %v7735_v55, %v5458_v56  ;;  %v7469_v28 = vand.u32 4294901760, %v5508_v35  ;;  %v1391_v56 = vld [vmem:[%s7447_s2 + $0x8] sm:$0xff]  ;;  %v7739_v38 = vld [vmem:[#allocation50_spill] sm:$0xff] }
 0x199   :  { %v5482_v59 = vpop.eup %4403  ;;  %v1340_v47 = vadd.f32 %v1339_v7, %v1161_v9  ;;  %4433 = vtanh.f32 %v1335_v51  ;;  %v1175_v61 = vadd.f32 %v1174_v29, %v992_v5  ;;  %v7734_v51 = vld [vmem:[#allocation61_spill] sm:$0xff]  ;;  %v5548_v37 = vand.u32 4294901760, %v1391_v56 }
 0x19a   :  { %v1341_v63 = vpop.f32.mrf.mxu1  ;;  %v5486_v60 = vpop.eup %4405  ;;  %v1314_v21 = vadd.f32 %v5408_v62, %v1135_v12 }
 0x19b   :  { %v1342_v49 = vadd.f32 %v1341_v63, %v1163_v8  ;;  %v5491_v53 = vpop.eup %4407  ;;  %v1176_v1 = vpop.f32.mrf.mxu0  ;;  %v7733_v8 = vld [vmem:[#allocation30_spill] sm:$0xff]  ;;  %v7736_v63 = vld [vmem:[#allocation28_spill] sm:$0xff]  ;;  %7741 = vst [vmem:[#allocation23_spill] sm:$0xff] %v5548_v37  ;;  %v5559_v44 = vsub.f32 %v1391_v56, %v5548_v37 }
 0x19c   :  { %v1346_v57 = vpop.f32.mrf.mxu1  ;;  %v5494_v31 = vpop.eup %4409  ;;  %v1177_v7 = vadd.f32 %v1176_v1, %v994_v2  ;;  %v1133_v14 = vadd.f32 %v7734_v51, %v7733_v8  ;;  %v1126_v48 = vadd.f32 %v7737_v10, %v7736_v63  ;;  %v5565_v1 = vand.u32 4294901760, %v5482_v59  ;;  %v1419_v8 = vld [vmem:[%s7448_s3 + $0x68] sm:$0xff]  ;;  %v1421_v51 = vld [vmem:[%s7448_s3 + $0x78] sm:$0xff] }
 0x19d   :  { %v1347_v40 = vadd.f32 %v1346_v57, %v1168_v45  ;;  %4435 = vtanh.f32 %v1342_v49  ;;  %v5499_v50 = vpop.eup %4411  ;;  %v7738_v49 = vld [vmem:[#allocation47_spill] sm:$0xff]  ;;  %v5546_v57 = vsub.f32 %v5508_v35, %v7469_v28  ;;  %7743 = vst [vmem:[#allocation22_spill] sm:$0xff] %v5559_v44  ;;  %v5574_v2 = vand.u32 4294901760, %v5465_v34  ;;  %v1418_v28 = vld [vmem:[%s7448_s3 + $0x60] sm:$0xff] }
 0x19e   :  { %v1348_v19 = vpop.f32.mrf.mxu1  ;;  %v5502_v30 = vpop.eup %4413  ;;  %v1312_v46 = vadd.f32 %v5395_v32, %v1133_v14  ;;  %v1072_v54 = vadd.f32 %v7738_v49, %v859_v20  ;;  %v1305_v4 = vadd.f32 %v5357_v27, %v1126_v48  ;;  %v5555_v27 = vld [vmem:[%s7447_s2 + $0x10] sm:$0xff]  ;;  %7745 = vst [vmem:[#allocation51_spill] sm:$0xff] %v5565_v1  ;;  %v5579_v13 = vand.u32 4294901760, %v5494_v31 }
 0x19f   :  { %4437 = vtanh.f32 %v1347_v40  ;;  %v1349_v6 = vadd.f32 %v1348_v19, %v1170_v11  ;;  %v5510_v0 = vpop.eup %4415  ;;  %7740 = vst [vmem:[#allocation21_spill] sm:$0xff] %v5546_v57  ;;  %7742 = vst [vmem:[#allocation25_spill] sm:$0xff] %v5555_v27  ;;  %v5562_v26 = vand.u32 4294901760, %v5555_v27  ;;  %v5568_v19 = vand.u32 4294901760, %v5475_v58 }
 0x1a0   :  { %4439 = vtanh.f32 %v1340_v47  ;;  %v1353_v41 = vpop.f32.mrf.mxu1  ;;  %v5513_v16 = vpop.eup %4417  ;;  %v1251_v47 = vadd.f32 %v7739_v38, %v1072_v54  ;;  %7748 = vst [vmem:[#allocation33_spill] sm:$0xff] %v5574_v2  ;;  %7750 = vst [vmem:[#allocation57_spill] sm:$0xff] %v5579_v13  ;;  %v5582_v42 = vand.u32 4294901760, %v5491_v53  ;;  %v5609_v55 = vand.u32 4294901760, %v5510_v0 }
 0x1a1   :  { %4441 = vtanh.f32 %v1349_v6  ;;  %v1354_v33 = vadd.f32 %v1353_v41, %v1175_v61  ;;  %v5518_v36 = vpop.eup %4419  ;;  %7744 = vst [vmem:[#allocation29_spill] sm:$0xff] %v5562_v26  ;;  %7746 = vst [vmem:[#allocation24_spill] sm:$0xff] %v5568_v19  ;;  %v4587_v48 = vmov 0  }
 0x1a2   :  { %4443 = vtanh.f32 %v1333_v17  ;;  %v1355_v25 = vpop.f32.mrf.mxu1  ;;  %v5523_v29 = vpop.eup %4421  ;;  %7751 = vst [vmem:[#allocation34_spill] sm:$0xff] %v5582_v42  ;;  %7759 = vst [vmem:[#allocation60_spill] sm:$0xff] %v5609_v55  ;;  %v5619_v10 = vand.u32 4294901760, %v5518_v36  ;;  %4394 = vset.pattern.permute.xlu1 %v4587_v48  ;;  %4393 = vset.pattern.permute.xlu0 %v4587_v48 }
 0x1a3   :  { %4445 = vtanh.f32 %v1354_v33  ;;  %v1356_v9 = vadd.f32 %v1355_v25, %v1177_v7  ;;  %v5529_v45 = vpop.eup %4423  ;;  %v5592_v7 = vand.u32 4294901760, %v5502_v30  ;;  %v5595_v33 = vand.u32 4294901760, %v5499_v50  ;;  %1489 = vperm.xlu1 %4394, %v1419_v8   ;;  %1499 = vperm.xlu0 %4393, %v1421_v51  }
 0x1a4   :  { %4447 = vtanh.f32 %v1326_v15  ;;  %v5534_v62 = vpop.eup %4425  ;;  %v5585_v15 = vand.u32 4294901760, %v5486_v60  ;;  %v5606_v25 = vand.u32 4294901760, %v5513_v16  ;;  %7762 = vst [vmem:[#allocation44_spill] sm:$0xff] %v5619_v10  ;;  %v5627_v54 = vand.u32 4294901760, %v5529_v45 }
 0x1a5   :  { %4449 = vtanh.f32 %v1356_v9  ;;  %v5538_v23 = vpop.eup %4427  ;;  %7755 = vst [vmem:[#allocation59_spill] sm:$0xff] %v5592_v7  ;;  %7756 = vst [vmem:[#allocation36_spill] sm:$0xff] %v5595_v33  ;;  %v5655_v37 = vand.u32 4294901760, %v5534_v62 }
 0x1a6   :  { %4451 = vtanh.f32 %v1319_v3  ;;  %v5540_v32 = vpop.eup %4429  ;;  %7752 = vst [vmem:[#allocation53_spill] sm:$0xff] %v5585_v15  ;;  %7758 = vst [vmem:[#allocation37_spill] sm:$0xff] %v5606_v25  ;;  %v5674_v26 = vand.u32 4294901760, %v5538_v23 }
 0x1a7   :  { %4453 = vtanh.f32 %v1314_v21  ;;  %v5550_v5 = vpop.eup %4431  ;;  %v5649_v8 = vand.u32 4294901760, %v5540_v32  ;;  %1484 = vperm.xlu1 %4394, %v1418_v28  }
 0x1a8   :  { %4455 = vtanh.f32 %v1312_v46  ;;  %v4434_v11 = vpop.eup %4433  ;;  %7768 = vst [vmem:[#allocation41_spill] sm:$0xff] %v5674_v26 }
 0x1a9   :  { %4457 = vtanh.f32 %v1305_v4  ;;  %v5613_v9 = vand.u32 4294901760, %v4434_v11  ;;  %v5630_v4 = vand.u32 4294901760, %v5523_v29 }
 0x1aa   :  { %v4436_v40 = vpop.eup %4435  ;;  %4459 = vtanh.f32 %v1251_v47 }
 0x1ab   :  { %v5589_v12 = vand.u32 4294901760, %v4436_v40  ;;  %7763 = vst [vmem:[#allocation13_spill] sm:$0xff] %v5630_v4 }
 0x1ac   :  { %v4438_v52 = vpop.eup %4437 }
 0x1ad   :  { %v4440_v17 = vpop.eup %4439  ;;  %v5576_v6 = vand.u32 4294901760, %v4438_v52  ;;  %7754 = vst [vmem:[#allocation55_spill] sm:$0xff] %v5589_v12 }
 0x1ae   :  { %v4442_v61 = vpop.eup %4441  ;;  %v5603_v3 = vand.u32 4294901760, %v4440_v17 }
 0x1af   :  { %7749 = vst [vmem:[#allocation54_spill] sm:$0xff] %v5576_v6  ;;  %v4444_v41 = vpop.eup %4443  ;;  %v5587_v39 = vand.u32 4294901760, %v4442_v61  ;;  %v5624_v49 = vsub.f32 %v4438_v52, %v5576_v6  ;;  %v5641_v52 = vsub.f32 %v4436_v40, %v5589_v12  ;;  %v1420_v40 = vld [vmem:[%s7448_s3 + $0x70] sm:$0xff] }
 0x1b0   :  { %v4446_v14 = vpop.eup %4445  ;;  %7757 = vst [vmem:[#allocation56_spill] sm:$0xff] %v5603_v3  ;;  %v5621_v56 = vand.u32 4294901760, %v4444_v41  ;;  %v5652_v51 = vsub.f32 %v4440_v17, %v5603_v3  ;;  %v5667_v17 = vsub.f32 %v4434_v11, %v5613_v9  ;;  %1494 = vperm.xlu0 %4393, %v1420_v40  }
 0x1b1   :  { %7753 = vst [vmem:[#allocation26_spill] sm:$0xff] %v5587_v39  ;;  %v4448_v20 = vpop.eup %4447  ;;  %v5611_v21 = vand.u32 4294901760, %v4446_v14  ;;  %v5616_v63 = vsub.f32 %v4442_v61, %v5587_v39  ;;  %v5635_v61 = vand.u32 4294901760, %v5550_v5  ;;  %v7772_v43 = vand.u32 4294901760, %v5624_v49 }
 0x1b2   :  { %v4450_v46 = vpop.eup %4449  ;;  %v5646_v35 = vand.u32 4294901760, %v4448_v20  ;;  %v5677_v44 = vsub.f32 %v4444_v41, %v5621_v56  ;;  %v1416_v41 = vld [vmem:[%s7448_s3 + $0x50] sm:$0xff] }
 0x1b3   :  { %7760 = vst [vmem:[#allocation40_spill] sm:$0xff] %v5611_v21  ;;  %7761 = vst [vmem:[#allocation15_spill] sm:$0xff] %v5616_v63  ;;  %v4452_v38 = vpop.eup %4451  ;;  %v5632_v47 = vand.u32 4294901760, %v4450_v46  ;;  %v5638_v48 = vsub.f32 %v4446_v14, %v5611_v21  ;;  %1474 = vperm.xlu1 %4394, %v1416_v41  }
 0x1b4   :  { %v4454_v22 = vpop.eup %4453  ;;  %v5670_v2 = vand.u32 4294901760, %v4452_v38  ;;  %v5699_v57 = vsub.f32 %v4448_v20, %v5646_v35  ;;  %v5716_v20 = vsub.f32 %v5540_v32, %v5649_v8  ;;  %v7773_v32 = vand.u32 4294901760, %v5641_v52 }
 0x1b5   :  { %7764 = vst [vmem:[#allocation17_spill] sm:$0xff] %v5632_v47  ;;  %7765 = vst [vmem:[#allocation27_spill] sm:$0xff] %v5638_v48  ;;  %v4456_v14 = vpop.eup %4455  ;;  %1503 = vmatprep.subr.mxu0 %v5632_v47  ;;  %v5662_v24 = vsub.f32 %v4450_v46, %v5632_v47  ;;  %v5681_v11 = vand.u32 4294901760, %v4454_v22  ;;  %v7769_v28 = vand.u32 4294901760, %v5638_v48 }
 0x1b6   :  { %1505 = vmatpush1.msra.mxu0 %v5611_v21  ;;  %7767 = vst [vmem:[#allocation16_spill] sm:$0xff] %v5670_v2  ;;  %v4458_v46 = vpop.eup %4457  ;;  %v5686_v21 = vsub.f32 %v5550_v5, %v5635_v61  ;;  %v5695_v34 = vand.u32 4294901760, %v4456_v14  ;;  %v1417_v5 = vld [vmem:[%s7448_s3 + $0x58] sm:$0xff] }
 0x1b7   :  { %7766 = vst [vmem:[#allocation39_spill] sm:$0xff] %v5662_v24  ;;  %1507 = vmatprep.subr.mxu0 %v5587_v39  ;;  %v1784_v27 = vsub.f32 %v5638_v48, %v7769_v28  ;;  %v5704_v40 = vpop.eup %4459  ;;  %v7771_v28 = vand.u32 4294901760, %v5616_v63  ;;  %v5722_v18 = vand.u32 4294901760, %v4458_v46  ;;  %v1802_v39 = vsub.f32 %v5641_v52, %v7773_v32  ;;  %1479 = vperm.xlu0 %4393, %v1417_v5  }
 0x1b8   :  { %1509 = vmatpush1.msra.mxu0 %v5576_v6  ;;  %v7770_v6 = vand.u32 4294901760, %v5662_v24 }
 0x1b9   :  { %1511 = vmatprep.subr.mxu0 %v5589_v12  ;;  %v1790_v48 = vsub.f32 %v5616_v63, %v7771_v28  ;;  %v1796_v12 = vsub.f32 %v5624_v49, %v7772_v43  ;;  %v5734_v63 = vsub.f32 %v4454_v22, %v5681_v11  ;;  %v1785_v43 = vand.u32 4294901760, %v1784_v27 }
 0x1ba   :  { %v1778_v47 = vsub.f32 %v5662_v24, %v7770_v6  ;;  %1513 = vmatpush1.msra.mxu0 %v5603_v3  ;;  %v5726_v24 = vsub.f32 %v4452_v38, %v5670_v2  ;;  %v7774_v38 = vand.u32 4294901760, %v5652_v51  ;;  %v7775_v22 = vand.u32 4294901760, %v5667_v17 }
 0x1bb   :  { %1515 = vmatprep.subr.mxu0 %v5613_v9  ;;  %v1791_v32 = vand.u32 4294901760, %v1790_v48  ;;  %v5751_v27 = vsub.f32 %v5538_v23, %v5674_v26  ;;  %v7777_v23 = vand.u32 4294901760, %v5686_v21 }
 0x1bc   :  { %v1779_v28 = vand.u32 4294901760, %v1778_v47  ;;  %1517 = vmatpush1.msra.mxu0 %v5621_v56  ;;  %v1808_v41 = vsub.f32 %v5652_v51, %v7774_v38  ;;  %v5742_v47 = vsub.f32 %v4456_v14, %v5695_v34  ;;  %v1814_v5 = vsub.f32 %v5667_v17, %v7775_v22 }
 0x1bd   :  { %1519 = vmatprep.subr.mxu0 %v5635_v61  ;;  %v1797_v38 = vand.u32 4294901760, %v1796_v12  ;;  %v7776_v14 = vand.u32 4294901760, %v5677_v44  ;;  %v1803_v22 = vand.u32 4294901760, %v1802_v39  ;;  %v1826_v3 = vsub.f32 %v5686_v21, %v7777_v23 }
 0x1be   :  { %1780 = vmatprep.subr.mxu1 %v1779_v28  ;;  %1521 = vmatpush1.msra.mxu0 %v5646_v35  ;;  %v5759_v28 = vsub.f32 %v4458_v46, %v5722_v18  ;;  %v5768_v12 = vsub.f32 %v5534_v62, %v5655_v37  ;;  %v7778_v46 = vand.u32 4294901760, %v5699_v57  ;;  %v1815_v23 = vand.u32 4294901760, %v1814_v5 }
 0x1bf   :  { %1786 = vmatpush1.msra.mxu1 %v1785_v43  ;;  %v1820_v6 = vsub.f32 %v5677_v44, %v7776_v14  ;;  %1523 = vmatprep.subr.mxu0 %v5649_v8  ;;  %v1809_v14 = vand.u32 4294901760, %v1808_v41  ;;  %v7779_v62 = vand.u32 4294901760, %v5716_v20 }
 0x1c0   :  { %1792 = vmatprep.subr.mxu1 %v1791_v32  ;;  %1525 = vmatpush1.msra.mxu0 %v5670_v2  ;;  %v1832_v48 = vsub.f32 %v5699_v57, %v7778_v46  ;;  %v5777_v32 = vsub.f32 %v5529_v45, %v5627_v54  ;;  %v7780_v45 = vand.u32 4294901760, %v5726_v24 }
 0x1c1   :  { %1798 = vmatpush1.msra.mxu1 %v1797_v38  ;;  %1527 = vmatprep.subr.mxu0 %v5681_v11  ;;  %v1838_v43 = vsub.f32 %v5716_v20, %v7779_v62  ;;  %v5786_v38 = vsub.f32 %v5523_v29, %v5630_v4  ;;  %v1821_v46 = vand.u32 4294901760, %v1820_v6  ;;  %v1827_v62 = vand.u32 4294901760, %v1826_v3 }
 0x1c2   :  { %1804 = vmatprep.subr.mxu1 %v1803_v22  ;;  %1529 = vmatpush1.msra.mxu0 %v5695_v34  ;;  %v1844_v39 = vsub.f32 %v5726_v24, %v7780_v45  ;;  %v5795_v22 = vsub.f32 %v5518_v36, %v5619_v10  ;;  %v7781_v29 = vand.u32 4294901760, %v5734_v63  ;;  %v1833_v45 = vand.u32 4294901760, %v1832_v48 }
 0x1c3   :  { %1810 = vmatpush1.msra.mxu1 %v1809_v14  ;;  %1531 = vmatprep.subr.mxu0 %v5674_v26  ;;  %v5804_v14 = vsub.f32 %v5513_v16, %v5606_v25  ;;  %v7782_v36 = vand.u32 4294901760, %v5742_v47  ;;  %v7783_v16 = vand.u32 4294901760, %v5751_v27 }
 0x1c4   :  { %1816 = vmatprep.subr.mxu1 %v1815_v23  ;;  %v1850_v41 = vsub.f32 %v5734_v63, %v7781_v29  ;;  %1533 = vmatpush1.msra.mxu0 %v5722_v18  ;;  %v5813_v23 = vsub.f32 %v5510_v0, %v5609_v55  ;;  %v1839_v29 = vand.u32 4294901760, %v1838_v43  ;;  %v7785_v0 = vand.u32 4294901760, %v5759_v28 }
 0x1c5   :  { %1822 = vmatpush1.msra.mxu1 %v1821_v46  ;;  %v1856_v5 = vsub.f32 %v5742_v47, %v7782_v36  ;;  %1535 = vmatprep.subr.mxu0 %v5655_v37  ;;  %v1862_v6 = vsub.f32 %v5751_v27, %v7783_v16  ;;  %v5822_v46 = vsub.f32 %v5502_v30, %v5592_v7  ;;  %v1845_v36 = vand.u32 4294901760, %v1844_v39 }
 0x1c6   :  { %1828 = vmatprep.subr.mxu1 %v1827_v62  ;;  %1537 = vmatpush1.msra.mxu0 %v5627_v54  ;;  %v1868_v3 = vsub.f32 %v5759_v28, %v7785_v0  ;;  %v5831_v62 = vsub.f32 %v5499_v50, %v5595_v33  ;;  %v1851_v16 = vand.u32 4294901760, %v1850_v41  ;;  %v7786_v30 = vand.u32 4294901760, %v5768_v12 }
 0x1c7   :  { %7784 = vst [vmem:[#allocation42_spill] sm:$0xff] %v5822_v46  ;;  %1834 = vmatpush1.msra.mxu1 %v1833_v45  ;;  %1539 = vmatprep.subr.mxu0 %v5630_v4  ;;  %v5840_v45 = vsub.f32 %v5494_v31, %v5579_v13  ;;  %v1857_v0 = vand.u32 4294901760, %v1856_v5  ;;  %v7787_v50 = vand.u32 4294901760, %v5777_v32  ;;  %v7789_v31 = vand.u32 4294901760, %v5786_v38 }
 0x1c8   :  { %1840 = vmatprep.subr.mxu1 %v1839_v29  ;;  %v1874_v48 = vsub.f32 %v5768_v12, %v7786_v30  ;;  %1541 = vmatpush1.msra.mxu0 %v5619_v10  ;;  %v5849_v29 = vsub.f32 %v5491_v53, %v5582_v42  ;;  %v1863_v30 = vand.u32 4294901760, %v1862_v6  ;;  %v7791_v53 = vand.u32 4294901760, %v5795_v22  ;;  %v7809_v10 = vld [vmem:[#allocation12_spill] sm:$0xff] }
 0x1c9   :  { %1846 = vmatpush1.msra.mxu1 %v1845_v36  ;;  %v1880_v43 = vsub.f32 %v5777_v32, %v7787_v50  ;;  %1543 = vmatprep.subr.mxu0 %v5606_v25  ;;  %v1886_v39 = vsub.f32 %v5786_v38, %v7789_v31  ;;  %v5858_v36 = vsub.f32 %v5486_v60, %v5585_v15  ;;  %v1869_v50 = vand.u32 4294901760, %v1868_v3 }
 0x1ca   :  { %7788 = vst [vmem:[#allocation46_spill] sm:$0xff] %v5849_v29  ;;  %1852 = vmatprep.subr.mxu1 %v1851_v16  ;;  %1545 = vmatpush1.msra.mxu0 %v5609_v55  ;;  %v1892_v41 = vsub.f32 %v5795_v22, %v7791_v53  ;;  %v5865_v6 = vand.u32 4294901760, %v5704_v40  ;;  %v1875_v31 = vand.u32 4294901760, %v1874_v48  ;;  %v7793_v60 = vand.u32 4294901760, %v5804_v14 }
 0x1cb   :  { %7790 = vst [vmem:[#allocation45_spill] sm:$0xff] %v5858_v36  ;;  %1858 = vmatpush1.msra.mxu1 %v1857_v0  ;;  %1547 = vmatprep.subr.mxu0 %v5592_v7  ;;  %v5875_v3 = vsub.f32 %v5482_v59, %v5565_v1  ;;  %v1881_v53 = vand.u32 4294901760, %v1880_v43  ;;  %v7795_v16 = vand.u32 4294901760, %v5813_v23  ;;  %v7796_v59 = vand.u32 4294901760, %v5822_v46  ;;  %v7804_v43 = vld [vmem:[#allocation29_spill] sm:$0xff] }
 0x1cc   :  { %7792 = vst [vmem:[#allocation43_spill] sm:$0xff] %v5865_v6  ;;  %1864 = vmatprep.subr.mxu1 %v1863_v30  ;;  %v1898_v5 = vsub.f32 %v5804_v14, %v7793_v60  ;;  %1549 = vmatpush1.msra.mxu0 %v5595_v33  ;;  %v5884_v30 = vsub.f32 %v5475_v58, %v5568_v19  ;;  %v1887_v60 = vand.u32 4294901760, %v1886_v39  ;;  %v7798_v33 = vld [vmem:[#allocation14_spill] sm:$0xff]  ;;  %v7800_v58 = vand.u32 4294901760, %v5831_v62  ;;  %v7805_v39 = vld [vmem:[#allocation25_spill] sm:$0xff] }
 0x1cd   :  { %7794 = vst [vmem:[#allocation38_spill] sm:$0xff] %v5875_v3  ;;  %1870 = vmatpush1.msra.mxu1 %v1869_v50  ;;  %v1904_v7 = vsub.f32 %v5813_v23, %v7795_v16  ;;  %1551 = vmatprep.subr.mxu0 %v5579_v13  ;;  %v1910_v0 = vsub.f32 %v5822_v46, %v7796_v59  ;;  %v7797_v50 = vld [vmem:[#allocation52_spill] sm:$0xff]  ;;  %v1893_v16 = vand.u32 4294901760, %v1892_v41  ;;  %v1393_v59 = vld [vmem:[%s7447_s2 + $0x18] sm:$0xff]  ;;  %v7803_v41 = vand.u32 4294901760, %v5840_v45 }
 0x1ce   :  { %1876 = vmatprep.subr.mxu1 %v1875_v31  ;;  %v5893_v55 = vsub.f32 %v7798_v33, %v7797_v50  ;;  %1553 = vmatpush1.msra.mxu0 %v5582_v42  ;;  %v1916_v48 = vsub.f32 %v5831_v62, %v7800_v58  ;;  %v7801_v31 = vld [vmem:[#allocation22_spill] sm:$0xff]  ;;  %v5902_v13 = vsub.f32 %v5704_v40, %v5865_v6  ;;  %v1899_v33 = vand.u32 4294901760, %v1898_v5 }
 0x1cf   :  { %1882 = vmatpush1.msra.mxu1 %v1881_v53  ;;  %1555 = vmatprep.subr.mxu0 %v5585_v15  ;;  %v1922_v53 = vsub.f32 %v5840_v45, %v7803_v41  ;;  %v5914_v42 = vsub.f32 %v7805_v39, %v7804_v43  ;;  %v1905_v40 = vand.u32 4294901760, %v1904_v7  ;;  %v7807_v25 = vand.u32 4294901760, %v5849_v29 }
 0x1d0   :  { %7799 = vst [vmem:[#allocation48_spill] sm:$0xff] %v5893_v55  ;;  %7802 = vst [vmem:[#allocation31_spill] sm:$0xff] %v5902_v13  ;;  %1888 = vmatprep.subr.mxu1 %v1887_v60  ;;  %1557 = vmatpush1.msra.mxu0 %v5565_v1  ;;  %v7808_v60 = vld [vmem:[#allocation33_spill] sm:$0xff]  ;;  %v1911_v41 = vand.u32 4294901760, %v1910_v0  ;;  %v7811_v39 = vand.u32 4294901760, %v5858_v36  ;;  %v7813_v5 = vand.u32 4294901760, %v7801_v31 }
 0x1d1   :  { %7806 = vst [vmem:[#allocation35_spill] sm:$0xff] %v5914_v42  ;;  %1894 = vmatpush1.msra.mxu1 %v1893_v16  ;;  %v1928_v15 = vsub.f32 %v5849_v29, %v7807_v25  ;;  %v5923_v4 = vsub.f32 %v7809_v10, %v7808_v60  ;;  %1559 = vmatprep.subr.mxu0 %v5568_v19  ;;  %v5930_v16 = vand.u32 4294901760, %v1393_v59  ;;  %v1917_v25 = vand.u32 4294901760, %v1916_v48 }
 0x1d2   :  { %1900 = vmatprep.subr.mxu1 %v1899_v33  ;;  %v1934_v58 = vsub.f32 %v5858_v36, %v7811_v39  ;;  %1561 = vmatpush1.msra.mxu0 %v7797_v50  ;;  %v1613_v10 = vsub.f32 %v7801_v31, %v7813_v5  ;;  %v1923_v0 = vand.u32 4294901760, %v1922_v53  ;;  %v7814_v33 = vand.u32 4294901760, %v5875_v3  ;;  %v1394_v53 = vld [vmem:[%s7447_s2 + $0x20] sm:$0xff]  ;;  %v7822_v50 = vld [vmem:[#allocation27_spill] sm:$0xff] }
 0x1d3   :  { %7810 = vst [vmem:[#allocation49_spill] sm:$0xff] %v5923_v4  ;;  %7812 = vst [vmem:[#allocation32_spill] sm:$0xff] %v5930_v16  ;;  %1906 = vmatpush1.msra.mxu1 %v1905_v40  ;;  %1563 = vmatprep.subr.mxu0 %v5865_v6  ;;  %v1929_v48 = vand.u32 4294901760, %v1928_v15  ;;  %v7815_v40 = vand.u32 4294901760, %v5884_v30  ;;  %v7818_v7 = vand.u32 4294901760, %v5893_v55  ;;  %v5956_v15 = vsub.f32 %v1393_v59, %v5930_v16  ;;  %v7825_v59 = vld [vmem:[#allocation15_spill] sm:$0xff] }
 0x1d4   :  { %1912 = vmatprep.subr.mxu1 %v1911_v41  ;;  %v1940_v39 = vsub.f32 %v5875_v3, %v7814_v33  ;;  %1565 = vmatpush1.msra.mxu0 %v7808_v60  ;;  %v7816_v41 = vld [vmem:[#allocation21_spill] sm:$0xff]  ;;  %v1935_v33 = vand.u32 4294901760, %v1934_v58  ;;  %v7820_v60 = vld [vmem:[#allocation39_spill] sm:$0xff]  ;;  %v7821_v19 = vand.u32 4294901760, %v5902_v13  ;;  %v7823_v58 = vand.u32 4294901760, %v5914_v42 }
 0x1d5   :  { %1918 = vmatpush1.msra.mxu1 %v1917_v25  ;;  %v1946_v5 = vsub.f32 %v5884_v30, %v7815_v40  ;;  %v7817_v31 = vand.u32 4294901760, %v7816_v41  ;;  %v1952_v25 = vsub.f32 %v5893_v55, %v7818_v7  ;;  %7819 = vst [vmem:[#allocation62_spill] sm:$0xff] %v5956_v15  ;;  %2114 = vmatprep.subr.mxu0 %v7820_v60  ;;  %v1614_v40 = vand.u32 4294901760, %v1613_v10 }
 0x1d6   :  { %1924 = vmatprep.subr.mxu1 %v1923_v0  ;;  %v1958_v6 = vsub.f32 %v5902_v13, %v7821_v19  ;;  %v1624_v0 = vsub.f32 %v5914_v42, %v7823_v58  ;;  %v5966_v7 = vand.u32 4294901760, %v1394_v53  ;;  %v7826_v41 = vmov 0.0   ;;  %v1395_v58 = vld [vmem:[%s7447_s2 + $0x28] sm:$0xff] }
 0x1d7   :  { %1604 = vmatmul.mubr.f32.vlgmr.msra.gmra.mxu0 %v7817_v31  ;;  %1930 = vmatpush1.msra.mxu1 %v1929_v48  ;;  %v1941_v31 = vand.u32 4294901760, %v1940_v39  ;;  %v1947_v48 = vand.u32 4294901760, %v1946_v5  ;;  %v7827_v10 = vand.u32 4294901760, %v5923_v4  ;;  %v1953_v19 = vand.u32 4294901760, %v1952_v25 }
 0x1d8   :  { %2117 = vmatpush1.msra.mxu0 %v7822_v50  ;;  %1936 = vmatprep.subr.mxu1 %v1935_v33  ;;  %7824 = vst [vmem:[#allocation30_spill] sm:$0xff] %v5966_v7  ;;  %v7531_v39 = vand.u32 4294901760, %v5956_v15  ;;  %v1959_v33 = vand.u32 4294901760, %v1958_v6  ;;  %v1625_v5 = vand.u32 4294901760, %v1624_v0  ;;  %v5980_v42 = vsub.f32 %v1394_v53, %v5966_v7  ;;  %v7830_v53 = vld [vmem:[#allocation19_spill] sm:$0xff]  ;;  %v1396_v0 = vld [vmem:[%s7447_s2 + $0x30] sm:$0xff] }
 0x1d9   :  { %2120 = vmatprep.subr.mxu0 %v7825_v59  ;;  %1609 = vmatprep.mubr.f32.mxu0 %v7826_v41  ;;  %v1964_v1 = vsub.f32 %v5923_v4, %v7827_v10 }
 0x1da   :  { %1942 = vmatpush1.msra.mxu1 %v1941_v31  ;;  %2123 = vmatpush1.msra.mxu0 %v5624_v49  ;;  %7828 = vst [vmem:[#allocation61_spill] sm:$0xff] %v5980_v42  ;;  %v1635_v6 = vsub.f32 %v5956_v15, %v7531_v39  ;;  %v7534_v31 = vand.u32 4294901760, %v5980_v42  ;;  %v1397_v15 = vld [vmem:[%s7447_s2 + $0x38] sm:$0xff] }
 0x1db   :  { %1615 = vmatmul.mubr.f32.gmra.mxu0 %v1614_v40  ;;  %1948 = vmatprep.subr.mxu1 %v1947_v48  ;;  %v1965_v25 = vand.u32 4294901760, %v1964_v1  ;;  %v5988_v40 = vand.u32 4294901760, %v1395_v58  ;;  %v7831_v1 = vld [vmem:[#allocation17_spill] sm:$0xff]  ;;  %v7832_v48 = vld [vmem:[#allocation40_spill] sm:$0xff] }
 0x1dc   :  { %2126 = vmatprep.subr.mxu0 %v5641_v52  ;;  %1954 = vmatpush1.msra.mxu1 %v1953_v19  ;;  %v1636_v10 = vand.u32 4294901760, %v1635_v6  ;;  %v7836_v6 = vld [vmem:[#allocation54_spill] sm:$0xff] }
 0x1dd   :  { %2129 = vmatpush1.msra.mxu0 %v5652_v51  ;;  %1960 = vmatprep.subr.mxu1 %v1959_v33  ;;  %7829 = vst [vmem:[#allocation18_spill] sm:$0xff] %v5988_v40  ;;  %v6001_v19 = vsub.f32 %v1395_v58, %v5988_v40  ;;  %v7834_v33 = vld [vmem:[#allocation26_spill] sm:$0xff]  ;;  %v7837_v58 = vld [vmem:[#allocation23_spill] sm:$0xff] }
 0x1de   :  { %2132 = vmatprep.subr.mxu0 %v5667_v17  ;;  %1620 = vmatprep.mubr.f32.mxu0 %v7826_v41 }
 0x1df   :  { %1966 = vmatpush1.msra.mxu1 %v1965_v25  ;;  %2135 = vmatpush1.msra.mxu0 %v5677_v44  ;;  %7833 = vst [vmem:[#allocation28_spill] sm:$0xff] %v6001_v19  ;;  %v6010_v25 = vand.u32 4294901760, %v1396_v0  ;;  %v7537_v39 = vand.u32 4294901760, %v6001_v19 }
 0x1e0   :  { %1626 = vmatmul.mubr.f32.gmra.mxu0 %v1625_v5  ;;  %2001 = vmatmul.mubr.f32.vlgmr.msra.gmra.mxu1 %v7830_v53  ;;  %v1646_v5 = vsub.f32 %v5980_v42, %v7534_v31  ;;  %v7838_v53 = vld [vmem:[#allocation55_spill] sm:$0xff]  ;;  %v7839_v31 = vld [vmem:[#allocation56_spill] sm:$0xff] }
 0x1e1   :  { %2138 = vmatprep.subr.mxu0 %v5686_v21  ;;  %2370 = vmatprep.subr.mxu1 %v7831_v1  ;;  %7835 = vst [vmem:[#allocation58_spill] sm:$0xff] %v6010_v25 }
 0x1e2   :  { %2141 = vmatpush1.msra.mxu0 %v5699_v57  ;;  %2372 = vmatpush1.msra.mxu1 %v7832_v48  ;;  %v1647_v42 = vand.u32 4294901760, %v1646_v5  ;;  %v1398_v5 = vld [vmem:[%s7447_s2 + $0x40] sm:$0xff] }
 0x1e3   :  { %2144 = vmatprep.subr.mxu0 %v5716_v20  ;;  %2374 = vmatprep.subr.mxu1 %v7834_v33 }
 0x1e4   :  { %1631 = vmatprep.mubr.f32.mxu0 %v7826_v41  ;;  %2006 = vmatprep.mubr.f32.mxu1 %v7826_v41 }
 0x1e5   :  { %2147 = vmatpush1.msra.mxu0 %v5726_v24  ;;  %2376 = vmatpush1.msra.mxu1 %v7836_v6  ;;  %v6024_v6 = vsub.f32 %v1396_v0, %v6010_v25 }
 0x1e6   :  { %1637 = vmatmul.mubr.f32.gmra.mxu0 %v1636_v10  ;;  %2008 = vmatmul.mubr.f32.gmra.mxu1 %v7837_v58  ;;  %v1657_v10 = vsub.f32 %v6001_v19, %v7537_v39  ;;  %v6033_v58 = vand.u32 4294901760, %v1397_v15 }
 0x1e7   :  { %2150 = vmatprep.subr.mxu0 %v5734_v63  ;;  %2378 = vmatprep.subr.mxu1 %v7838_v53  ;;  %7840 = vst [vmem:[#allocation47_spill] sm:$0xff] %v6024_v6  ;;  %v7541_v0 = vand.u32 4294901760, %v6024_v6 }
 0x1e8   :  { %2153 = vmatpush1.msra.mxu0 %v5742_v47  ;;  %2380 = vmatpush1.msra.mxu1 %v7839_v31  ;;  %7841 = vst [vmem:[#allocation50_spill] sm:$0xff] %v6033_v58  ;;  %v1658_v39 = vand.u32 4294901760, %v1657_v10  ;;  %v6047_v19 = vsub.f32 %v1397_v15, %v6033_v58  ;;  %v1399_v15 = vld [vmem:[%s7447_s2 + $0x48] sm:$0xff] }
 0x1e9   :  { %2156 = vmatprep.subr.mxu0 %v5751_v27  ;;  %2382 = vmatprep.subr.mxu1 %v5613_v9 }
 0x1ea   :  { %1642 = vmatprep.mubr.f32.mxu0 %v7826_v41  ;;  %2013 = vmatprep.mubr.f32.mxu1 %v7826_v41  ;;  %7842 = vst [vmem:[#allocation14_spill] sm:$0xff] %v6047_v19  ;;  %v7549_v10 = vand.u32 4294901760, %v6047_v19 }
 0x1eb   :  { %2159 = vmatpush1.msra.mxu0 %v5759_v28  ;;  %2384 = vmatpush1.msra.mxu1 %v5621_v56 }
 0x1ec   :  { %1648 = vmatmul.mubr.f32.gmra.mxu0 %v1647_v42  ;;  %2015 = vmatmul.mubr.f32.gmra.mxu1 %v7804_v43  ;;  %v1668_v42 = vsub.f32 %v6024_v6, %v7541_v0  ;;  %v6056_v43 = vand.u32 4294901760, %v1398_v5 }
 0x1ed   :  { %2162 = vmatprep.subr.mxu0 %v5768_v12  ;;  %2386 = vmatprep.subr.mxu1 %v5635_v61 }
 0x1ee   :  { %2165 = vmatpush1.msra.mxu0 %v5777_v32  ;;  %2388 = vmatpush1.msra.mxu1 %v5646_v35  ;;  %v1669_v0 = vand.u32 4294901760, %v1668_v42  ;;  %v6070_v6 = vsub.f32 %v1398_v5, %v6056_v43  ;;  %v1679_v42 = vsub.f32 %v6047_v19, %v7549_v10  ;;  %v7845_v10 = vld [vmem:[#allocation13_spill] sm:$0xff] }
 0x1ef   :  { %2168 = vmatprep.subr.mxu0 %v5786_v38  ;;  %2390 = vmatprep.subr.mxu1 %v5649_v8 }
 0x1f0   :  { %1653 = vmatprep.mubr.f32.mxu0 %v7826_v41  ;;  %2020 = vmatprep.mubr.f32.mxu1 %v7826_v41  ;;  %7843 = vst [vmem:[#allocation25_spill] sm:$0xff] %v6070_v6  ;;  %v7556_v5 = vand.u32 4294901760, %v6070_v6 }
 0x1f1   :  { %2171 = vmatpush1.msra.mxu0 %v5795_v22  ;;  %2392 = vmatpush1.msra.mxu1 %v5670_v2  ;;  %v6072_v2 = vand.u32 4294901760, %v1399_v15 }
 0x1f2   :  { %1659 = vmatmul.mubr.f32.gmra.mxu0 %v1658_v39  ;;  %2022 = vmatmul.mubr.f32.gmra.mxu1 %v5930_v16  ;;  %v1400_v39 = vld [vmem:[%s7447_s2 + $0x50] sm:$0xff] }
 0x1f3   :  { %2174 = vmatprep.subr.mxu0 %v5804_v14  ;;  %2394 = vmatprep.subr.mxu1 %v5681_v11  ;;  %v6089_v16 = vsub.f32 %v1399_v15, %v6072_v2 }
 0x1f4   :  { %2177 = vmatpush1.msra.mxu0 %v5813_v23  ;;  %2396 = vmatpush1.msra.mxu1 %v5695_v34 }
 0x1f5   :  { %2180 = vmatprep.subr.mxu0 %v5822_v46  ;;  %2398 = vmatprep.subr.mxu1 %v5674_v26  ;;  %7844 = vst [vmem:[#allocation12_spill] sm:$0xff] %v6089_v16  ;;  %v6091_v26 = vand.u32 4294901760, %v1400_v39  ;;  %v1401_v46 = vld [vmem:[%s7447_s2 + $0x58] sm:$0xff] }
 0x1f6   :  { %1664 = vmatprep.mubr.f32.mxu0 %v7826_v41  ;;  %2027 = vmatprep.mubr.f32.mxu1 %v7826_v41  ;;  %v6102_v15 = vand.u32 4294901760, %v1401_v46 }
 0x1f7   :  { %2183 = vmatpush1.msra.mxu0 %v5831_v62  ;;  %2400 = vmatpush1.msra.mxu1 %v5722_v18 }
 0x1f8   :  { %1670 = vmatmul.mubr.f32.gmra.mxu0 %v1669_v0  ;;  %2029 = vmatmul.mubr.f32.gmra.mxu1 %v5966_v7  ;;  %v1680_v0 = vand.u32 4294901760, %v1679_v42  ;;  %v1690_v7 = vsub.f32 %v6070_v6, %v7556_v5  ;;  %v7847_v42 = vld [vmem:[#allocation44_spill] sm:$0xff]  ;;  %v6122_v5 = vsub.f32 %v1401_v46, %v6102_v15  ;;  %v7851_v6 = vand.u32 4294901760, %v6089_v16  ;;  %v1403_v46 = vld [vmem:[%s7447_s2 + $0x68] sm:$0xff] }
 0x1f9   :  { %2186 = vmatprep.subr.mxu0 %v5840_v45  ;;  %2402 = vmatprep.subr.mxu1 %v5655_v37 }
 0x1fa   :  { %2189 = vmatpush1.msra.mxu0 %v5849_v29  ;;  %2404 = vmatpush1.msra.mxu1 %v5627_v54  ;;  %v6111_v29 = vsub.f32 %v1400_v39, %v6091_v26  ;;  %7849 = vst [vmem:[#allocation39_spill] sm:$0xff] %v6122_v5  ;;  %v7850_v39 = vld [vmem:[#allocation60_spill] sm:$0xff]  ;;  %v1691_v19 = vand.u32 4294901760, %v1690_v7 }
 0x1fb   :  { %2192 = vmatprep.subr.mxu0 %v5858_v36  ;;  %2406 = vmatprep.subr.mxu1 %v7845_v10  ;;  %v1402_v10 = vld [vmem:[%s7447_s2 + $0x60] sm:$0xff]  ;;  %v7848_v36 = vld [vmem:[#allocation37_spill] sm:$0xff] }
 0x1fc   :  { %1675 = vmatprep.mubr.f32.mxu0 %v7826_v41  ;;  %2034 = vmatprep.mubr.f32.mxu1 %v7826_v41  ;;  %7846 = vst [vmem:[#allocation21_spill] sm:$0xff] %v6111_v29  ;;  %v7853_v7 = vld [vmem:[#allocation36_spill] sm:$0xff] }
 0x1fd   :  { %2195 = vmatpush1.msra.mxu0 %v5875_v3  ;;  %2408 = vmatpush1.msra.mxu1 %v7847_v42  ;;  %v1701_v42 = vsub.f32 %v6089_v16, %v7851_v6  ;;  %v6130_v3 = vand.u32 4294901760, %v1402_v10  ;;  %v7854_v16 = vand.u32 4294901760, %v6111_v29  ;;  %v7858_v6 = vld [vmem:[#allocation34_spill] sm:$0xff] }
 0x1fe   :  { %1681 = vmatmul.mubr.f32.gmra.mxu0 %v1680_v0  ;;  %2036 = vmatmul.mubr.f32.gmra.mxu1 %v5988_v40  ;;  %v7852_v40 = vld [vmem:[#allocation59_spill] sm:$0xff] }
 0x1ff   :  { %2198 = vmatprep.subr.mxu0 %v5884_v30  ;;  %2410 = vmatprep.subr.mxu1 %v7848_v36  ;;  %v1702_v0 = vand.u32 4294901760, %v1701_v42  ;;  %v7859_v42 = vld [vmem:[#allocation53_spill] sm:$0xff] }
 0x200   :  { %2201 = vmatpush1.msra.mxu0 %v5893_v55  ;;  %2412 = vmatpush1.msra.mxu1 %v7850_v39  ;;  %v6149_v39 = vand.u32 4294901760, %v1403_v46  ;;  %v7856_v55 = vld [vmem:[#allocation57_spill] sm:$0xff] }
 0x201   :  { %2204 = vmatprep.subr.mxu0 %v5902_v13  ;;  %2414 = vmatprep.subr.mxu1 %v7852_v40  ;;  %v1712_v40 = vsub.f32 %v6111_v29, %v7854_v16  ;;  %v6147_v13 = vsub.f32 %v1402_v10, %v6130_v3  ;;  %v7860_v16 = vand.u32 4294901760, %v6122_v5 }
 0x202   :  { %1686 = vmatprep.mubr.f32.mxu0 %v7826_v41  ;;  %2041 = vmatprep.mubr.f32.mxu1 %v7826_v41  ;;  %v6167_v29 = vsub.f32 %v1403_v46, %v6149_v39  ;;  %v7865_v46 = vld [vmem:[#allocation33_spill] sm:$0xff] }
 0x203   :  { %2207 = vmatpush1.msra.mxu0 %v5923_v4  ;;  %2416 = vmatpush1.msra.mxu1 %v7853_v7  ;;  %7855 = vst [vmem:[#allocation27_spill] sm:$0xff] %v6147_v13  ;;  %v7857_v4 = vand.u32 4294901760, %v7820_v60  ;;  %v1723_v10 = vsub.f32 %v6122_v5, %v7860_v16  ;;  %v7575_v60 = vand.u32 4294901760, %v6147_v13  ;;  %v7863_v16 = vld [vmem:[#allocation52_spill] sm:$0xff] }
 0x204   :  { %1692 = vmatmul.mubr.f32.gmra.mxu0 %v1691_v19  ;;  %2043 = vmatmul.mubr.f32.gmra.mxu1 %v6010_v25  ;;  %v1404_v19 = vld [vmem:[%s7447_s2 + $0x70] sm:$0xff]  ;;  %v7861_v25 = vld [vmem:[#allocation51_spill] sm:$0xff]  ;;  %v7578_v5 = vand.u32 4294901760, %v6167_v29 }
 0x205   :  { %2418 = vmatprep.subr.mxu1 %v7856_v55  ;;  %2613 = vmatprep.subr.mxu0 %v7857_v4  ;;  %v1713_v4 = vand.u32 4294901760, %v1712_v40  ;;  %v1405_v55 = vld [vmem:[%s7447_s2 + $0x78] sm:$0xff] }
 0x206   :  { %2420 = vmatpush1.msra.mxu1 %v7858_v6  ;;  %1697 = vmatprep.mubr.f32.mxu0 %v7826_v41  ;;  %v6169_v6 = vand.u32 4294901760, %v1404_v19  ;;  %v7864_v40 = vld [vmem:[#allocation43_spill] sm:$0xff] }
 0x207   :  { %2422 = vmatprep.subr.mxu1 %v7859_v42  ;;  %2048 = vmatprep.mubr.f32.mxu1 %v7826_v41  ;;  %v7862_v42 = vld [vmem:[#allocation24_spill] sm:$0xff] }
 0x208   :  { %2424 = vmatpush1.msra.mxu1 %v7861_v25  ;;  %1703 = vmatmul.mubr.f32.gmra.mxu0 %v1702_v0  ;;  %v1724_v0 = vand.u32 4294901760, %v1723_v10  ;;  %v1415_v10 = vld [vmem:[%s7448_s3 + $0x48] sm:$0xff] }
 0x209   :  { %2050 = vmatmul.mubr.f32.gmra.mxu1 %v6033_v58  ;;  %2426 = vmatprep.subr.mxu1 %v7862_v42  ;;  %v1734_v58 = vsub.f32 %v6147_v13, %v7575_v60  ;;  %v6186_v42 = vsub.f32 %v1404_v19, %v6169_v6 }
 0x20a   :  { %2428 = vmatpush1.msra.mxu1 %v7863_v16  ;;  %1708 = vmatprep.mubr.f32.mxu0 %v7826_v41  ;;  %v1414_v16 = vld [vmem:[%s7448_s3 + $0x40] sm:$0xff] }
 0x20b   :  { %2430 = vmatprep.subr.mxu1 %v7864_v40  ;;  %2055 = vmatprep.mubr.f32.mxu1 %v7826_v41  ;;  %v6191_v40 = vand.u32 4294901760, %v1405_v55  ;;  %v1735_v19 = vand.u32 4294901760, %v1734_v58  ;;  %v1755_v60 = vand.u32 4294901760, %v6186_v42 }
 0x20c   :  { %2432 = vmatpush1.msra.mxu1 %v7865_v46  ;;  %1714 = vmatmul.mubr.f32.gmra.mxu0 %v1713_v4  ;;  %v1745_v4 = vsub.f32 %v6167_v29, %v7578_v5  ;;  %v1411_v5 = vld [vmem:[%s7448_s3 + $0x28] sm:$0xff] }
 0x20d   :  { %2057 = vmatmul.mubr.f32.gmra.mxu1 %v6056_v43  ;;  %2884 = vmatprep.subr.mxu1 %v7831_v1  ;;  %v6205_v13 = vsub.f32 %v1405_v55, %v6191_v40  ;;  %v1412_v1 = vld [vmem:[%s7448_s3 + $0x30] sm:$0xff]  ;;  %v1756_v55 = vsub.f32 %v6186_v42, %v1755_v60 }
 0x20e   :  { %1719 = vmatprep.mubr.f32.mxu0 %v7826_v41  ;;  %2062 = vmatprep.mubr.f32.mxu1 %v7826_v41  ;;  %v1746_v58 = vand.u32 4294901760, %v1745_v4 }
 0x20f   :  { %1464 = vperm.xlu1 %4394, %v1414_v16   ;;  %1469 = vperm.xlu0 %4393, %v1415_v10   ;;  %v1413_v16 = vld [vmem:[%s7448_s3 + $0x38] sm:$0xff]  ;;  %v1410_v10 = vld [vmem:[%s7448_s3 + $0x20] sm:$0xff] }
 0x210   :  { %1725 = vmatmul.mubr.f32.gmra.mxu0 %v1724_v0  ;;  %v1766_v0 = vand.u32 4294901760, %v6205_v13 }
 0x211   :  { %2064 = vmatmul.mubr.f32.gmra.mxu1 %v6072_v2  ;;  %1730 = vmatprep.mubr.f32.mxu0 %v7826_v41 }
 0x212   :  { %2069 = vmatprep.mubr.f32.mxu1 %v7826_v41  ;;  %v1767_v4 = vsub.f32 %v6205_v13, %v1766_v0 }
 0x213   :  { %1454 = vperm.xlu1 %4394, %v1412_v1   ;;  %1459 = vperm.xlu0 %4393, %v1413_v16   ;;  %v1408_v1 = vld [vmem:[%s7448_s3 + $0x10] sm:$0xff]  ;;  %v1409_v16 = vld [vmem:[%s7448_s3 + $0x18] sm:$0xff] }
 0x214   :  { %1736 = vmatmul.mubr.f32.gmra.mxu0 %v1735_v19  ;;  %v1757_v19 = vand.u32 4294901760, %v1756_v55  ;;  %v1407_v55 = vld [vmem:[%s7448_s3 + $0x8] sm:$0xff] }
 0x215   :  { %2071 = vmatmul.mubr.f32.gmra.mxu1 %v6091_v26  ;;  %1741 = vmatprep.mubr.f32.mxu0 %v7826_v41 }
 0x216   :  { %2076 = vmatprep.mubr.f32.mxu1 %v7826_v41 }
 0x217   :  { %1444 = vperm.xlu1 %4394, %v1410_v10   ;;  %1449 = vperm.xlu0 %4393, %v1411_v5   ;;  %v1768_v5 = vand.u32 4294901760, %v1767_v4  ;;  %v7866_v10 = vld [vmem:[#allocation20_spill] sm:$0xff]  ;;  %v7868_v4 = vand.u32 4294901760, %v7825_v59  ;;  %v7873_v59 = vand.u32 4294901760, %v5667_v17  ;;  %v7879_v17 = vand.u32 4294901760, %v5716_v20 }
 0x218   :  { %1747 = vmatmul.mubr.f32.gmra.mxu0 %v1746_v58  ;;  %v1406_v58 = vld [vmem:[%s7448_s3] sm:$0xff] }
 0x219   :  { %2078 = vmatmul.mubr.f32.gmra.mxu1 %v6102_v15  ;;  %1752 = vmatprep.mubr.f32.mxu0 %v7826_v41 }
 0x21a   :  { %2083 = vmatprep.mubr.f32.mxu1 %v7826_v41 }
 0x21b   :  { %1434 = vperm.xlu1 %4394, %v1408_v1   ;;  %1439 = vperm.xlu0 %4393, %v1409_v16   ;;  %v7869_v1 = vand.u32 4294901760, %v5624_v49  ;;  %v7870_v16 = vand.u32 4294901760, %v5641_v52  ;;  %v7874_v49 = vand.u32 4294901760, %v5677_v44  ;;  %v7875_v52 = vand.u32 4294901760, %v5686_v21  ;;  %v7881_v21 = vld [vmem:[#allocation54_spill] sm:$0xff] }
 0x21c   :  { %1758 = vmatmul.mubr.f32.gmra.mxu0 %v1757_v19  ;;  %v7867_v19 = vand.u32 4294901760, %v7822_v50  ;;  %v7872_v50 = vand.u32 4294901760, %v5652_v51  ;;  %v7878_v51 = vand.u32 4294901760, %v5699_v57  ;;  %v7880_v44 = vand.u32 4294901760, %v5726_v24  ;;  %v7883_v57 = vld [vmem:[#allocation62_spill] sm:$0xff] }
 0x21d   :  { %2085 = vmatmul.mubr.f32.gmra.mxu1 %v6130_v3  ;;  %1763 = vmatprep.mubr.f32.mxu0 %v7826_v41  ;;  %v7886_v24 = vand.u32 4294901760, %v5751_v27 }
 0x21e   :  { %2090 = vmatprep.mubr.f32.mxu1 %v7826_v41 }
 0x21f   :  { %1424 = vperm.xlu1 %4394, %v1406_v58   ;;  %1429 = vperm.xlu0 %4393, %v1407_v55   ;;  %v7876_v58 = vld [vmem:[#allocation35_spill] sm:$0xff]  ;;  %v7877_v55 = vand.u32 4294901760, %v7866_v10 }
 0x220   :  { %1769 = vmatmul.mubr.f32.gmra.mxu0 %v1768_v5  ;;  %v7871_v5 = vld [vmem:[#allocation22_spill] sm:$0xff]  ;;  %v7890_v27 = vand.u32 4294901760, %v7876_v58 }
 0x221   :  { %2092 = vmatmul.mubr.f32.gmra.mxu1 %v6149_v39  ;;  %2240 = vmatprep.mubr.f32.mxu0 %v7826_v41  ;;  %v7884_v20 = vand.u32 4294901760, %v7871_v5 }
 0x222   :  { %2097 = vmatprep.mubr.f32.mxu1 %v7826_v41 }
 0x224   :  { %2243 = vmatmul.mubr.f32.vlgmr.msra.gmra.mxu0 %v7866_v10  ;;  %v7882_v10 = vand.u32 4294901760, %v5734_v63  ;;  %v7887_v63 = vand.u32 4294901760, %v5759_v28  ;;  %v7893_v28 = vand.u32 4294901760, %v5795_v22 }
 0x225   :  { %2099 = vmatmul.mubr.f32.gmra.mxu1 %v6169_v6  ;;  %2617 = vmatpush1.msra.mxu0 %v7867_v19 }
 0x226   :  { %2621 = vmatprep.subr.mxu0 %v7868_v4  ;;  %2104 = vmatprep.mubr.f32.mxu1 %v7826_v41  ;;  %v7910_v4 = vld [vmem:[#allocation13_spill] sm:$0xff] }
 0x227   :  { %2625 = vmatpush1.msra.mxu0 %v7869_v1  ;;  %2248 = vmatprep.mubr.f32.mxu0 %v7826_v41  ;;  %v7911_v1 = vld [vmem:[#allocation38_spill] sm:$0xff] }
 0x228   :  { %2629 = vmatprep.subr.mxu0 %v7870_v16  ;;  %2251 = vmatmul.mubr.f32.gmra.mxu0 %v7871_v5  ;;  %v7913_v16 = vld [vmem:[#allocation44_spill] sm:$0xff] }
 0x229   :  { %2106 = vmatmul.mubr.f32.gmra.mxu1 %v6191_v40  ;;  %2633 = vmatpush1.msra.mxu0 %v7872_v50  ;;  %v7917_v50 = vld [vmem:[#allocation48_spill] sm:$0xff] }
 0x22a   :  { %2637 = vmatprep.subr.mxu0 %v7873_v59  ;;  %2256 = vmatprep.mubr.f32.mxu0 %v7826_v41  ;;  %v7918_v59 = vand.u32 4294901760, %v7917_v50 }
 0x22b   :  { %2641 = vmatpush1.msra.mxu0 %v7874_v49  ;;  %2465 = vmatprep.mubr.f32.mxu1 %v7826_v41  ;;  %v7919_v49 = vld [vmem:[#allocation60_spill] sm:$0xff] }
 0x22c   :  { %2645 = vmatprep.subr.mxu0 %v7875_v52  ;;  %2259 = vmatmul.mubr.f32.gmra.mxu0 %v7876_v58  ;;  %v7920_v52 = vld [vmem:[#allocation31_spill] sm:$0xff] }
 0x22d   :  { %2469 = vmatmul.mubr.f32.vlgmr.msra.gmra.mxu1 %v7877_v55  ;;  %2649 = vmatpush1.msra.mxu0 %v7878_v51  ;;  %v7921_v58 = vand.u32 4294901760, %v7920_v52  ;;  %v7922_v55 = vld [vmem:[#allocation59_spill] sm:$0xff]  ;;  %v7923_v51 = vld [vmem:[#allocation49_spill] sm:$0xff] }
 0x22e   :  { %2886 = vmatpush1.msra.mxu1 %v7832_v48  ;;  %2653 = vmatprep.subr.mxu0 %v7879_v17  ;;  %v7885_v48 = vand.u32 4294901760, %v5742_v47  ;;  %v7889_v47 = vld [vmem:[#allocation61_spill] sm:$0xff] }
 0x22f   :  { %2888 = vmatprep.subr.mxu1 %v7834_v33  ;;  %2657 = vmatpush1.msra.mxu0 %v7880_v44  ;;  %v7906_v33 = vld [vmem:[#allocation46_spill] sm:$0xff]  ;;  %v7926_v17 = vld [vmem:[#allocation25_spill] sm:$0xff] }
 0x230   :  { %2890 = vmatpush1.msra.mxu1 %v7881_v21  ;;  %2264 = vmatprep.mubr.f32.mxu0 %v7826_v41  ;;  %v7907_v19 = vand.u32 4294901760, %v7906_v33  ;;  %v7928_v21 = vld [vmem:[#allocation34_spill] sm:$0xff] }
 0x231   :  { %2474 = vmatprep.mubr.f32.mxu1 %v7826_v41  ;;  %2661 = vmatprep.subr.mxu0 %v7882_v10  ;;  %v7929_v10 = vld [vmem:[#allocation53_spill] sm:$0xff] }
 0x232   :  { %2892 = vmatprep.subr.mxu1 %v7838_v53  ;;  %2267 = vmatmul.mubr.f32.gmra.mxu0 %v7883_v57  ;;  %v7888_v53 = vand.u32 4294901760, %v5768_v12  ;;  %v7894_v12 = vld [vmem:[#allocation16_spill] sm:$0xff] }
 0x233   :  { %2478 = vmatmul.mubr.f32.gmra.mxu1 %v7884_v20  ;;  %2665 = vmatpush1.msra.mxu0 %v7885_v48  ;;  %v7933_v48 = vld [vmem:[#allocation52_spill] sm:$0xff] }
 0x234   :  { %2894 = vmatpush1.msra.mxu1 %v7839_v31  ;;  %2669 = vmatprep.subr.mxu0 %v7886_v24  ;;  %v7901_v31 = vld [vmem:[#allocation41_spill] sm:$0xff]  ;;  %v7934_v24 = vld [vmem:[#allocation43_spill] sm:$0xff] }
 0x235   :  { %2896 = vmatprep.subr.mxu1 %v5613_v9  ;;  %2673 = vmatpush1.msra.mxu0 %v7887_v63  ;;  %v7891_v9 = vand.u32 4294901760, %v5777_v32  ;;  %v7897_v32 = vand.u32 4294901760, %v7883_v57  ;;  %v7931_v57 = vld [vmem:[#allocation12_spill] sm:$0xff]  ;;  %v7935_v63 = vld [vmem:[#allocation21_spill] sm:$0xff] }
 0x236   :  { %2898 = vmatpush1.msra.mxu1 %v5621_v56  ;;  %2272 = vmatprep.mubr.f32.mxu0 %v7826_v41  ;;  %v7892_v56 = vand.u32 4294901760, %v5786_v38  ;;  %v7899_v38 = vld [vmem:[#allocation42_spill] sm:$0xff] }
 0x237   :  { %2483 = vmatprep.mubr.f32.mxu1 %v7826_v41  ;;  %2677 = vmatprep.subr.mxu0 %v7888_v53  ;;  %v7900_v22 = vand.u32 4294901760, %v7899_v38  ;;  %v7937_v53 = vld [vmem:[#allocation39_spill] sm:$0xff]  ;;  %v7949_v38 = vld [vmem:[#allocation18_spill] sm:$0xff] }
 0x238   :  { %2900 = vmatprep.subr.mxu1 %v5635_v61  ;;  %2275 = vmatmul.mubr.f32.gmra.mxu0 %v7889_v47  ;;  %v7895_v61 = vand.u32 4294901760, %v5804_v14  ;;  %v7902_v14 = vand.u32 4294901760, %v5831_v62 }
 0x239   :  { %2487 = vmatmul.mubr.f32.gmra.mxu1 %v7890_v27  ;;  %2681 = vmatpush1.msra.mxu0 %v7891_v9  ;;  %v7939_v27 = vld [vmem:[#allocation27_spill] sm:$0xff]  ;;  %v7941_v9 = vand.u32 4294901760, %v7937_v53 }
 0x23a   :  { %2902 = vmatpush1.msra.mxu1 %v5646_v35  ;;  %2685 = vmatprep.subr.mxu0 %v7892_v56  ;;  %v7896_v35 = vld [vmem:[#allocation28_spill] sm:$0xff] }
 0x23b   :  { %2904 = vmatprep.subr.mxu1 %v5649_v8  ;;  %2689 = vmatpush1.msra.mxu0 %v7893_v28  ;;  %v7898_v8 = vand.u32 4294901760, %v5813_v23  ;;  %v7905_v23 = vand.u32 4294901760, %v7889_v47  ;;  %v7916_v5 = vand.u32 4294901760, %v7896_v35  ;;  %v7938_v47 = vand.u32 4294901760, %v7931_v57  ;;  %v3125_v56 = vld [vmem:[%s7450_s5] sm:$0xff] }
 0x23c   :  { %2906 = vmatpush1.msra.mxu1 %v7894_v12  ;;  %2280 = vmatprep.mubr.f32.mxu0 %v7826_v41  ;;  %v7942_v28 = vand.u32 4294901760, %v7939_v27  ;;  %v7943_v12 = vand.u32 4294901760, %v6167_v29 }
 0x23d   :  { %2492 = vmatprep.mubr.f32.mxu1 %v7826_v41  ;;  %2693 = vmatprep.subr.mxu0 %v7895_v61  ;;  %v7944_v61 = vld [vmem:[#allocation19_spill] sm:$0xff] }
 0x23e   :  { %2908 = vmatprep.subr.mxu1 %v5681_v11  ;;  %2283 = vmatmul.mubr.f32.gmra.mxu0 %v7896_v35  ;;  %v7903_v11 = vand.u32 4294901760, %v5840_v45  ;;  %v7912_v45 = vand.u32 4294901760, %v7911_v1  ;;  %v7945_v35 = vld [vmem:[#allocation23_spill] sm:$0xff] }
 0x23f   :  { %2496 = vmatmul.mubr.f32.gmra.mxu1 %v7897_v32  ;;  %2697 = vmatpush1.msra.mxu0 %v7898_v8  ;;  %v6438_v32 = vpop.permute.xlu1 %1489  ;;  %v6440_v8 = vpop.permute.xlu0 %1499 }
 0x240   :  { %2910 = vmatpush1.msra.mxu1 %v5695_v34  ;;  %2701 = vmatprep.subr.mxu0 %v7900_v22  ;;  %v7904_v34 = vld [vmem:[#allocation47_spill] sm:$0xff] }
 0x241   :  { %2912 = vmatprep.subr.mxu1 %v7901_v31  ;;  %2705 = vmatpush1.msra.mxu0 %v7902_v14  ;;  %v7927_v44 = vand.u32 4294901760, %v7904_v34  ;;  %v7950_v14 = vld [vmem:[#allocation58_spill] sm:$0xff] }
 0x242   :  { %2914 = vmatpush1.msra.mxu1 %v5722_v18  ;;  %2288 = vmatprep.mubr.f32.mxu0 %v7826_v41  ;;  %v7908_v18 = vld [vmem:[#allocation45_spill] sm:$0xff] }
 0x243   :  { %2501 = vmatprep.mubr.f32.mxu1 %v7826_v41  ;;  %2709 = vmatprep.subr.mxu0 %v7903_v11  ;;  %v7909_v62 = vand.u32 4294901760, %v7908_v18 }
 0x244   :  { %2916 = vmatprep.subr.mxu1 %v5655_v37  ;;  %2291 = vmatmul.mubr.f32.gmra.mxu0 %v7904_v34  ;;  %v7914_v37 = vand.u32 4294901760, %v5884_v30  ;;  %v7924_v30 = vand.u32 4294901760, %v7923_v51 }
 0x245   :  { %2505 = vmatmul.mubr.f32.gmra.mxu1 %v7905_v23  ;;  %2713 = vmatpush1.msra.mxu0 %v7907_v19  ;;  %v7951_v23 = vld [vmem:[#allocation50_spill] sm:$0xff] }
 0x246   :  { %2918 = vmatpush1.msra.mxu1 %v5627_v54  ;;  %2717 = vmatprep.subr.mxu0 %v7909_v62  ;;  %v7915_v54 = vld [vmem:[#allocation14_spill] sm:$0xff] }
 0x247   :  { %2920 = vmatprep.subr.mxu1 %v7910_v4  ;;  %2721 = vmatpush1.msra.mxu0 %v7912_v45  ;;  %v7932_v20 = vand.u32 4294901760, %v7915_v54 }
 0x248   :  { %2922 = vmatpush1.msra.mxu1 %v7913_v16  ;;  %2296 = vmatprep.mubr.f32.mxu0 %v7826_v41 }
 0x249   :  { %2510 = vmatprep.mubr.f32.mxu1 %v7826_v41  ;;  %2725 = vmatprep.subr.mxu0 %v7914_v37 }
 0x24a   :  { %2924 = vmatprep.subr.mxu1 %v7848_v36  ;;  %2299 = vmatmul.mubr.f32.gmra.mxu0 %v7915_v54  ;;  %v7925_v36 = vld [vmem:[#allocation57_spill] sm:$0xff] }
 0x24b   :  { %2514 = vmatmul.mubr.f32.gmra.mxu1 %v7916_v5  ;;  %2729 = vmatpush1.msra.mxu0 %v7918_v59 }
 0x24c   :  { %2926 = vmatpush1.msra.mxu1 %v7919_v49  ;;  %2733 = vmatprep.subr.mxu0 %v7921_v58 }
 0x24d   :  { %2928 = vmatprep.subr.mxu1 %v7922_v55  ;;  %2737 = vmatpush1.msra.mxu0 %v7924_v30 }
 0x24e   :  { %2930 = vmatpush1.msra.mxu1 %v7853_v7  ;;  %2304 = vmatprep.mubr.f32.mxu0 %v7826_v41  ;;  %v7930_v7 = vld [vmem:[#allocation24_spill] sm:$0xff] }
 0x24f   :  { %2519 = vmatprep.mubr.f32.mxu1 %v7826_v41  ;;  %2932 = vmatprep.subr.mxu1 %v7925_v36 }
 0x250   :  { %2307 = vmatmul.mubr.f32.gmra.mxu0 %v7926_v17  ;;  %2523 = vmatmul.mubr.f32.gmra.mxu1 %v7927_v44 }
 0x251   :  { %2934 = vmatpush1.msra.mxu1 %v7928_v21  ;;  %2312 = vmatprep.mubr.f32.mxu0 %v7826_v41 }
 0x252   :  { %2936 = vmatprep.subr.mxu1 %v7929_v10  ;;  %2528 = vmatprep.mubr.f32.mxu1 %v7826_v41 }
 0x253   :  { %2938 = vmatpush1.msra.mxu1 %v7861_v25  ;;  %v7936_v25 = vand.u32 4294901760, %v7926_v17  ;;  %3128 = vperm.xlu0 %4393, %v3125_v56  }
 0x254   :  { %2940 = vmatprep.subr.mxu1 %v7930_v7  ;;  %2315 = vmatmul.mubr.f32.gmra.mxu0 %v7931_v57 }
 0x255   :  { %2532 = vmatmul.mubr.f32.gmra.mxu1 %v7932_v20  ;;  %2320 = vmatprep.mubr.f32.mxu0 %v7826_v41 }
 0x256   :  { %2942 = vmatpush1.msra.mxu1 %v7933_v48  ;;  %2537 = vmatprep.mubr.f32.mxu1 %v7826_v41 }
 0x257   :  { %2944 = vmatprep.subr.mxu1 %v7934_v24 }
 0x258   :  { %2946 = vmatpush1.msra.mxu1 %v7865_v46  ;;  %2323 = vmatmul.mubr.f32.gmra.mxu0 %v7935_v63  ;;  %v7940_v46 = vand.u32 4294901760, %v7935_v63 }
 0x259   :  { %2541 = vmatmul.mubr.f32.gmra.mxu1 %v7936_v25  ;;  %2328 = vmatprep.mubr.f32.mxu0 %v7826_v41 }
 0x25a   :  { %2546 = vmatprep.mubr.f32.mxu1 %v7826_v41 }
 0x25c   :  { %2331 = vmatmul.mubr.f32.gmra.mxu0 %v7937_v53 }
 0x25d   :  { %2550 = vmatmul.mubr.f32.gmra.mxu1 %v7938_v47  ;;  %2336 = vmatprep.mubr.f32.mxu0 %v7826_v41 }
 0x25e   :  { %2555 = vmatprep.mubr.f32.mxu1 %v7826_v41 }
 0x260   :  { %2339 = vmatmul.mubr.f32.gmra.mxu0 %v7939_v27 }
 0x261   :  { %2559 = vmatmul.mubr.f32.gmra.mxu1 %v7940_v46  ;;  %2344 = vmatprep.mubr.f32.mxu0 %v7826_v41 }
 0x262   :  { %2564 = vmatprep.mubr.f32.mxu1 %v7826_v41 }
 0x264   :  { %2347 = vmatmul.mubr.f32.gmra.mxu0 %v6167_v29  ;;  %v7946_v29 = vld [vmem:[#allocation29_spill] sm:$0xff] }
 0x265   :  { %2568 = vmatmul.mubr.f32.gmra.mxu1 %v7941_v9  ;;  %2352 = vmatprep.mubr.f32.mxu0 %v7826_v41 }
 0x266   :  { %2573 = vmatprep.mubr.f32.mxu1 %v7826_v41 }
 0x268   :  { %2355 = vmatmul.mubr.f32.gmra.mxu0 %v6186_v42  ;;  %v7947_v42 = vld [vmem:[#allocation32_spill] sm:$0xff] }
 0x269   :  { %2577 = vmatmul.mubr.f32.gmra.mxu1 %v7942_v28  ;;  %2360 = vmatprep.mubr.f32.mxu0 %v7826_v41 }
 0x26a   :  { %2582 = vmatprep.mubr.f32.mxu1 %v7826_v41 }
 0x26c   :  { %2363 = vmatmul.mubr.f32.gmra.mxu0 %v6205_v13  ;;  %v6449_v13 = vpop.permute.xlu1 %1484 }
 0x26d   :  { %2586 = vmatmul.mubr.f32.gmra.mxu1 %v7943_v12  ;;  %2770 = vmatprep.mubr.f32.mxu0 %v7826_v41 }
 0x26e   :  { %2591 = vmatprep.mubr.f32.mxu1 %v7826_v41 }
 0x270   :  { %2772 = vmatmul.mubr.f32.vlgmr.msra.gmra.mxu0 %v7944_v61  ;;  %v6458_v22 = vpop.permute.xlu1 %1474 }
 0x271   :  { %2595 = vmatmul.mubr.f32.gmra.mxu1 %v1755_v60  ;;  %2777 = vmatprep.mubr.f32.mxu0 %v7826_v41  ;;  %v6451_v60 = vpop.permute.xlu0 %1494 }
 0x272   :  { %2600 = vmatprep.mubr.f32.mxu1 %v7826_v41 }
 0x274   :  { %2779 = vmatmul.mubr.f32.gmra.mxu0 %v7945_v35 }
 0x275   :  { %2604 = vmatmul.mubr.f32.gmra.mxu1 %v1766_v0  ;;  %2784 = vmatprep.mubr.f32.mxu0 %v7826_v41  ;;  %v7948_v0 = vld [vmem:[#allocation30_spill] sm:$0xff]  ;;  %v6460_v31 = vpop.permute.xlu0 %1479 }
 0x276   :  { %2979 = vmatprep.mubr.f32.mxu1 %v7826_v41 }
 0x278   :  { %2786 = vmatmul.mubr.f32.gmra.mxu0 %v7946_v29 }
 0x279   :  { %2981 = vmatmul.mubr.f32.vlgmr.msra.gmra.mxu1 %v7944_v61  ;;  %2791 = vmatprep.mubr.f32.mxu0 %v7826_v41 }
 0x27a   :  { %2986 = vmatprep.mubr.f32.mxu1 %v7826_v41 }
 0x27c   :  { %2793 = vmatmul.mubr.f32.gmra.mxu0 %v7947_v42 }
 0x27d   :  { %2988 = vmatmul.mubr.f32.gmra.mxu1 %v7945_v35  ;;  %2798 = vmatprep.mubr.f32.mxu0 %v7826_v41 }
 0x27e   :  { %2993 = vmatprep.mubr.f32.mxu1 %v7826_v41 }
 0x280   :  { %2800 = vmatmul.mubr.f32.gmra.mxu0 %v7948_v0 }
 0x281   :  { %2995 = vmatmul.mubr.f32.gmra.mxu1 %v7946_v29  ;;  %2805 = vmatprep.mubr.f32.mxu0 %v7826_v41 }
 0x282   :  { %3000 = vmatprep.mubr.f32.mxu1 %v7826_v41 }
 0x284   :  { %2807 = vmatmul.mubr.f32.gmra.mxu0 %v7949_v38 }
 0x285   :  { %3002 = vmatmul.mubr.f32.gmra.mxu1 %v7947_v42  ;;  %2812 = vmatprep.mubr.f32.mxu0 %v7826_v41 }
 0x286   :  { %3007 = vmatprep.mubr.f32.mxu1 %v7826_v41 }
 0x288   :  { %2814 = vmatmul.mubr.f32.gmra.mxu0 %v7950_v14 }
 0x289   :  { %3009 = vmatmul.mubr.f32.gmra.mxu1 %v7948_v0  ;;  %2819 = vmatprep.mubr.f32.mxu0 %v7826_v41 }
 0x28a   :  { %3014 = vmatprep.mubr.f32.mxu1 %v7826_v41  ;;  %v6469_v11 = vpop.permute.xlu1 %1464  ;;  %v6471_v34 = vpop.permute.xlu0 %1469 }
 0x28c   :  { %2821 = vmatmul.mubr.f32.gmra.mxu0 %v7951_v23 }
 0x28d   :  { %3016 = vmatmul.mubr.f32.gmra.mxu1 %v7949_v38  ;;  %2826 = vmatprep.mubr.f32.mxu0 %v7826_v41 }
 0x28e   :  { %3021 = vmatprep.mubr.f32.mxu1 %v7826_v41  ;;  %v6477_v33 = vpop.permute.xlu1 %1454  ;;  %v6479_v19 = vpop.permute.xlu0 %1459 }
 0x290   :  { %2828 = vmatmul.mubr.f32.gmra.mxu0 %v6056_v43 }
 0x291   :  { %3023 = vmatmul.mubr.f32.gmra.mxu1 %v7950_v14  ;;  %2833 = vmatprep.mubr.f32.mxu0 %v7826_v41 }
 0x292   :  { %3028 = vmatprep.mubr.f32.mxu1 %v7826_v41  ;;  %v6485_v18 = vpop.permute.xlu1 %1444  ;;  %v6487_v62 = vpop.permute.xlu0 %1449 }
 0x294   :  { %2835 = vmatmul.mubr.f32.gmra.mxu0 %v6072_v2 }
 0x295   :  { %3030 = vmatmul.mubr.f32.gmra.mxu1 %v7951_v23  ;;  %2840 = vmatprep.mubr.f32.mxu0 %v7826_v41 }
 0x296   :  { %3035 = vmatprep.mubr.f32.mxu1 %v7826_v41  ;;  %v1435_v1 = vpop.permute.xlu1 %1434  ;;  %v1440_v16 = vpop.permute.xlu0 %1439 }
 0x297   :  { %v1605_v4 = vpop.f32.mrf.mxu0 }
 0x298   :  { %2842 = vmatmul.mubr.f32.gmra.mxu0 %v6091_v26 }
 0x299   :  { %v1607_v45 = vpop.f32.mrf.mxu0  ;;  %3037 = vmatmul.mubr.f32.gmra.mxu1 %v6056_v43  ;;  %2847 = vmatprep.mubr.f32.mxu0 %v7826_v41 }
 0x29a   :  { %3042 = vmatprep.mubr.f32.mxu1 %v7826_v41  ;;  %v1425_v37 = vpop.permute.xlu1 %1424  ;;  %v1430_v59 = vpop.permute.xlu0 %1429 }
 0x29b   :  { %v1616_v54 = vpop.f32.mrf.mxu0  ;;  %v1606_v50 = vadd.f32 %v1605_v4, %v1425_v37  ;;  %v1608_v52 = vadd.f32 %v1607_v45, %v1425_v37 }
 0x29c   :  { %2849 = vmatmul.mubr.f32.gmra.mxu0 %v6102_v15  ;;  %v1617_v30 = vadd.f32 %v1616_v54, %v1430_v59 }
 0x29d   :  { %3044 = vmatmul.mubr.f32.gmra.mxu1 %v6072_v2  ;;  %2854 = vmatprep.mubr.f32.mxu0 %v7826_v41  ;;  %v1618_v5 = vpop.f32.mrf.mxu0 }
 0x29e   :  { %3049 = vmatprep.mubr.f32.mxu1 %v7826_v41  ;;  %v1619_v17 = vadd.f32 %v1618_v5, %v1430_v59 }
 0x2a0   :  { %2856 = vmatmul.mubr.f32.gmra.mxu0 %v6130_v3  ;;  %v1627_v43 = vpop.f32.mrf.mxu0  ;;  %v2002_v49 = vpop.f32.mrf.mxu1 }
 0x2a1   :  { %3051 = vmatmul.mubr.f32.gmra.mxu1 %v6091_v26  ;;  %2861 = vmatprep.mubr.f32.mxu0 %v7826_v41  ;;  %v6504_v58 = vadd.f32 %v2002_v49, %v1606_v50  ;;  %v1628_v7 = vadd.f32 %v1627_v43, %v1435_v1 }
 0x2a2   :  { %3056 = vmatprep.mubr.f32.mxu1 %v7826_v41  ;;  %v1629_v2 = vpop.f32.mrf.mxu0  ;;  %v2004_v55 = vpop.f32.mrf.mxu1 }
 0x2a3   :  { %v6507_v51 = vadd.f32 %v2004_v55, %v1608_v52  ;;  %v1630_v48 = vadd.f32 %v1629_v2, %v1435_v1 }
 0x2a4   :  { %2863 = vmatmul.mubr.f32.gmra.mxu0 %v6149_v39 }
 0x2a5   :  { %3058 = vmatmul.mubr.f32.gmra.mxu1 %v6102_v15  ;;  %2868 = vmatprep.mubr.f32.mxu0 %v7826_v41 }
 0x2a6   :  { %3063 = vmatprep.mubr.f32.mxu1 %v7826_v41  ;;  %v1638_v26 = vpop.f32.mrf.mxu0  ;;  %v2009_v36 = vpop.f32.mrf.mxu1 }
 0x2a7   :  { %v6513_v44 = vadd.f32 %v2009_v36, %v1617_v30  ;;  %v1639_v25 = vadd.f32 %v1638_v26, %v1440_v16 }
 0x2a8   :  { %2870 = vmatmul.mubr.f32.gmra.mxu0 %v6169_v6  ;;  %v1640_v21 = vpop.f32.mrf.mxu0  ;;  %v2011_v10 = vpop.f32.mrf.mxu1 }
 0x2a9   :  { %3065 = vmatmul.mubr.f32.gmra.mxu1 %v6130_v3  ;;  %2875 = vmatprep.mubr.f32.mxu0 %v7826_v41  ;;  %v6518_v57 = vadd.f32 %v2011_v10, %v1619_v17  ;;  %v1641_v46 = vadd.f32 %v1640_v21, %v1440_v16 }
 0x2aa   :  { %3070 = vmatprep.mubr.f32.mxu1 %v7826_v41 }
 0x2ac   :  { %2877 = vmatmul.mubr.f32.gmra.mxu0 %v6191_v40  ;;  %v1649_v15 = vpop.f32.mrf.mxu0  ;;  %v2016_v20 = vpop.f32.mrf.mxu1 }
 0x2ad   :  { %3072 = vmatmul.mubr.f32.gmra.mxu1 %v6149_v39  ;;  %v6523_v24 = vadd.f32 %v2016_v20, %v1628_v7  ;;  %3227 = vmatprep.mubr.f32.mxu0 %v7826_v41  ;;  %v1650_v28 = vadd.f32 %v1649_v15, %v6485_v18 }
 0x2ae   :  { %3077 = vmatprep.mubr.f32.mxu1 %v7826_v41  ;;  %v1651_v3 = vpop.f32.mrf.mxu0  ;;  %v2018_v63 = vpop.f32.mrf.mxu1 }
 0x2af   :  { %v6527_v53 = vadd.f32 %v2018_v63, %v1630_v48 }
 0x2b1   :  { %3079 = vmatmul.mubr.f32.gmra.mxu1 %v6169_v6  ;;  %v1652_v6 = vadd.f32 %v1651_v3, %v6485_v18 }
 0x2b2   :  { %3084 = vmatprep.mubr.f32.mxu1 %v7826_v41  ;;  %v1660_v47 = vpop.f32.mrf.mxu0  ;;  %v2023_v27 = vpop.f32.mrf.mxu1 }
 0x2b3   :  { %v6531_v39 = vadd.f32 %v2023_v27, %v1639_v25  ;;  %v1661_v38 = vadd.f32 %v1660_v47, %v6487_v62 }
 0x2b4   :  { %v1662_v9 = vpop.f32.mrf.mxu0  ;;  %v2025_v56 = vpop.f32.mrf.mxu1 }
 0x2b5   :  { %3086 = vmatmul.mubr.f32.gmra.mxu1 %v6191_v40  ;;  %v6535_v12 = vadd.f32 %v2025_v56, %v1641_v46  ;;  %v1663_v4 = vadd.f32 %v1662_v9, %v6487_v62 }
 0x2b6   :  { %3463 = vmatprep.mubr.f32.mxu1 %v7826_v41 }
 0x2b8   :  { %v1671_v61 = vpop.f32.mrf.mxu0  ;;  %v2030_v35 = vpop.f32.mrf.mxu1 }
 0x2b9   :  { %v6539_v29 = vadd.f32 %v2030_v35, %v1650_v28  ;;  %v1672_v37 = vadd.f32 %v1671_v61, %v6477_v33 }
 0x2ba   :  { %v1673_v42 = vpop.f32.mrf.mxu0  ;;  %v2032_v0 = vpop.f32.mrf.mxu1 }
 0x2bb   :  { %v6542_v14 = vadd.f32 %v2032_v0, %v1652_v6  ;;  %v1674_v50 = vadd.f32 %v1673_v42, %v6477_v33 }
 0x2be   :  { %v1682_v23 = vpop.f32.mrf.mxu0  ;;  %v2037_v40 = vpop.f32.mrf.mxu1 }
 0x2bf   :  { %v6545_v1 = vadd.f32 %v2037_v40, %v1661_v38  ;;  %v1683_v43 = vadd.f32 %v1682_v23, %v6479_v19 }
 0x2c0   :  { %v1684_v45 = vpop.f32.mrf.mxu0  ;;  %v2039_v16 = vpop.f32.mrf.mxu1 }
 0x2c1   :  { %v6548_v54 = vadd.f32 %v2039_v16, %v1663_v4  ;;  %v1685_v30 = vadd.f32 %v1684_v45, %v6479_v19 }
 0x2c4   :  { %v1693_v18 = vpop.f32.mrf.mxu0  ;;  %v2044_v5 = vpop.f32.mrf.mxu1 }
 0x2c5   :  { %v6551_v59 = vadd.f32 %v2044_v5, %v1672_v37  ;;  %v1694_v26 = vadd.f32 %v1693_v18, %v6469_v11 }
 0x2c6   :  { %v1695_v49 = vpop.f32.mrf.mxu0  ;;  %v2046_v52 = vpop.f32.mrf.mxu1 }
 0x2c7   :  { %v6554_v2 = vadd.f32 %v2046_v52, %v1674_v50  ;;  %v1696_v15 = vadd.f32 %v1695_v49, %v6469_v11 }
 0x2c8   :  { %v1704_v62 = vpop.f32.mrf.mxu0 }
 0x2c9   :  { %v2051_v55 = vpop.f32.mrf.mxu1  ;;  %v1705_v20 = vadd.f32 %v1704_v62, %v6471_v34 }
 0x2ca   :  { %v6558_v36 = vadd.f32 %v2051_v55, %v1683_v43  ;;  %v1706_v17 = vpop.f32.mrf.mxu0 }
 0x2cb   :  { %v2053_v21 = vpop.f32.mrf.mxu1  ;;  %v1707_v27 = vadd.f32 %v1706_v17, %v6471_v34 }
 0x2cc   :  { %v6560_v10 = vadd.f32 %v2053_v21, %v1685_v30  ;;  %v1715_v33 = vpop.f32.mrf.mxu0 }
 0x2cd   :  { %v2058_v7 = vpop.f32.mrf.mxu1  ;;  %v1716_v46 = vadd.f32 %v1715_v33, %v6458_v22 }
 0x2ce   :  { %v6564_v48 = vadd.f32 %v2058_v7, %v1694_v26  ;;  %v1717_v3 = vpop.f32.mrf.mxu0 }
 0x2cf   :  { %v2060_v63 = vpop.f32.mrf.mxu1  ;;  %v1718_v6 = vadd.f32 %v1717_v3, %v6458_v22 }
 0x2d0   :  { %v6566_v25 = vadd.f32 %v2060_v63, %v1696_v15  ;;  %v1726_v19 = vpop.f32.mrf.mxu0 }
 0x2d1   :  { %v2065_v47 = vpop.f32.mrf.mxu1  ;;  %v1727_v42 = vadd.f32 %v1726_v19, %v6460_v31 }
 0x2d2   :  { %v6570_v9 = vadd.f32 %v2065_v47, %v1705_v20  ;;  %v1728_v56 = vpop.f32.mrf.mxu0 }
 0x2d3   :  { %v2067_v28 = vpop.f32.mrf.mxu1  ;;  %v1729_v45 = vadd.f32 %v1728_v56, %v6460_v31 }
 0x2d4   :  { %v6572_v61 = vadd.f32 %v2067_v28, %v1707_v27  ;;  %v1737_v11 = vpop.f32.mrf.mxu0 }
 0x2d5   :  { %v2072_v35 = vpop.f32.mrf.mxu1  ;;  %v1738_v16 = vadd.f32 %v1737_v11, %v6449_v13 }
 0x2d6   :  { %v6576_v0 = vadd.f32 %v2072_v35, %v1716_v46  ;;  %v1739_v38 = vpop.f32.mrf.mxu0 }
 0x2d7   :  { %v2074_v23 = vpop.f32.mrf.mxu1  ;;  %v1740_v49 = vadd.f32 %v1739_v38, %v6449_v13 }
 0x2d8   :  { %v6578_v40 = vadd.f32 %v2074_v23, %v1718_v6  ;;  %v1748_v34 = vpop.f32.mrf.mxu0 }
 0x2d9   :  { %v2079_v4 = vpop.f32.mrf.mxu1  ;;  %v1749_v52 = vadd.f32 %v1748_v34, %v6438_v32 }
 0x2da   :  { %v6582_v37 = vadd.f32 %v2079_v4, %v1727_v42  ;;  %v1750_v18 = vpop.f32.mrf.mxu0 }
 0x2db   :  { %v2081_v5 = vpop.f32.mrf.mxu1  ;;  %v1751_v21 = vadd.f32 %v1750_v18, %v6438_v32 }
 0x2dc   :  { %v6584_v50 = vadd.f32 %v2081_v5, %v1729_v45  ;;  %v1759_v22 = vpop.f32.mrf.mxu0 }
 0x2dd   :  { %v2086_v43 = vpop.f32.mrf.mxu1  ;;  %v1760_v33 = vadd.f32 %v1759_v22, %v6451_v60 }
 0x2de   :  { %v6588_v62 = vadd.f32 %v2086_v43, %v1738_v16  ;;  %v1761_v55 = vpop.f32.mrf.mxu0 }
 0x2df   :  { %v2088_v30 = vpop.f32.mrf.mxu1  ;;  %v1762_v47 = vadd.f32 %v1761_v55, %v6451_v60 }
 0x2e0   :  { %v6590_v26 = vadd.f32 %v2088_v30, %v1740_v49  ;;  %v1770_v31 = vpop.f32.mrf.mxu0 }
 0x2e1   :  { %v2093_v17 = vpop.f32.mrf.mxu1  ;;  %v1771_v27 = vadd.f32 %v1770_v31, %v6440_v8 }
 0x2e2   :  { %v6594_v7 = vadd.f32 %v2093_v17, %v1749_v52  ;;  %v1772_v15 = vpop.f32.mrf.mxu0 }
 0x2e3   :  { %v2095_v20 = vpop.f32.mrf.mxu1  ;;  %v1773_v38 = vadd.f32 %v1772_v15, %v6440_v8 }
 0x2e4   :  { %v6596_v3 = vadd.f32 %v2095_v20, %v1751_v21  ;;  %v2244_v13 = vpop.f32.mrf.mxu0 }
 0x2e5   :  { %v2100_v63 = vpop.f32.mrf.mxu1  ;;  %v2245_v19 = vadd.f32 %v2244_v13, %v6504_v58 }
 0x2e6   :  { %v6601_v46 = vadd.f32 %v2100_v63, %v1760_v33  ;;  %v2246_v56 = vpop.f32.mrf.mxu0 }
 0x2e7   :  { %v2102_v32 = vpop.f32.mrf.mxu1  ;;  %v2247_v28 = vadd.f32 %v2246_v56, %v6507_v51 }
 0x2e8   :  { %v6604_v11 = vadd.f32 %v2102_v32, %v1762_v47  ;;  %v2252_v35 = vpop.f32.mrf.mxu0 }
 0x2e9   :  { %v2107_v6 = vpop.f32.mrf.mxu1  ;;  %v2253_v42 = vadd.f32 %v2252_v35, %v6513_v44 }
 0x2ea   :  { %v6608_v23 = vadd.f32 %v2107_v6, %v1771_v27  ;;  %v2254_v58 = vpop.f32.mrf.mxu0 }
 0x2eb   :  { %v2109_v60 = vpop.f32.mrf.mxu1  ;;  %v2255_v34 = vadd.f32 %v2254_v58, %v6518_v57 }
 0x2ec   :  { %v6611_v4 = vadd.f32 %v2109_v60, %v1773_v38  ;;  %v2260_v45 = vpop.f32.mrf.mxu0 }
 0x2ed   :  { %v2261_v16 = vadd.f32 %v2260_v45, %v6523_v24  ;;  %v2470_v51 = vpop.f32.mrf.mxu1 }
 0x2ee   :  { %v6614_v18 = vadd.f32 %v2470_v51, %v2245_v19  ;;  %v2262_v5 = vpop.f32.mrf.mxu0 }
 0x2ef   :  { %v2263_v22 = vadd.f32 %v2262_v5, %v6527_v53  ;;  %v2472_v44 = vpop.f32.mrf.mxu1 }
 0x2f0   :  { %v6617_v43 = vadd.f32 %v2472_v44, %v2247_v28 }
 0x2f2   :  { %v2268_v8 = vpop.f32.mrf.mxu0 }
 0x2f3   :  { %v2269_v49 = vadd.f32 %v2268_v8, %v6531_v39  ;;  %v2479_v52 = vpop.f32.mrf.mxu1 }
 0x2f4   :  { %v6620_v55 = vadd.f32 %v2479_v52, %v2253_v42  ;;  %v2270_v57 = vpop.f32.mrf.mxu0 }
 0x2f5   :  { %v2271_v30 = vadd.f32 %v2270_v57, %v6535_v12  ;;  %v2481_v31 = vpop.f32.mrf.mxu1 }
 0x2f6   :  { %v6623_v24 = vadd.f32 %v2481_v31, %v2255_v34 }
 0x2f8   :  { %v2276_v17 = vpop.f32.mrf.mxu0 }
 0x2f9   :  { %v2277_v21 = vadd.f32 %v2276_v17, %v6539_v29  ;;  %v2488_v33 = vpop.f32.mrf.mxu1 }
 0x2fa   :  { %v6626_v53 = vadd.f32 %v2488_v33, %v2261_v16  ;;  %v2278_v15 = vpop.f32.mrf.mxu0 }
 0x2fb   :  { %v2279_v20 = vadd.f32 %v2278_v15, %v6542_v14  ;;  %v2490_v13 = vpop.f32.mrf.mxu1 }
 0x2fc   :  { %v6629_v39 = vadd.f32 %v2490_v13, %v2263_v22 }
 0x2fe   :  { %v2284_v63 = vpop.f32.mrf.mxu0 }
 0x2ff   :  { %v2285_v19 = vadd.f32 %v2284_v63, %v6545_v1  ;;  %v2497_v47 = vpop.f32.mrf.mxu1 }
 0x300   :  { %v6632_v12 = vadd.f32 %v2497_v47, %v2269_v49  ;;  %v2286_v27 = vpop.f32.mrf.mxu0 }
 0x301   :  { %v2287_v56 = vadd.f32 %v2286_v27, %v6548_v54  ;;  %v2499_v32 = vpop.f32.mrf.mxu1 }
 0x302   :  { %v6635_v29 = vadd.f32 %v2499_v32, %v2271_v30 }
 0x304   :  { %v2292_v28 = vpop.f32.mrf.mxu0 }
 0x305   :  { %v2293_v35 = vadd.f32 %v2292_v28, %v6551_v59  ;;  %v2506_v6 = vpop.f32.mrf.mxu1 }
 0x306   :  { %v6638_v14 = vadd.f32 %v2506_v6, %v2277_v21  ;;  %v2294_v42 = vpop.f32.mrf.mxu0 }
 0x307   :  { %v2295_v38 = vadd.f32 %v2294_v42, %v6554_v2  ;;  %v2508_v58 = vpop.f32.mrf.mxu1 }
 0x308   :  { %v6641_v1 = vadd.f32 %v2508_v58, %v2279_v20 }
 0x30a   :  { %v2300_v60 = vpop.f32.mrf.mxu0 }
 0x30b   :  { %v2301_v34 = vadd.f32 %v2300_v60, %v6558_v36  ;;  %v2515_v45 = vpop.f32.mrf.mxu1 }
 0x30c   :  { %v6644_v54 = vadd.f32 %v2515_v45, %v2285_v19  ;;  %v2302_v16 = vpop.f32.mrf.mxu0 }
 0x30d   :  { %v2303_v51 = vadd.f32 %v2302_v16, %v6560_v10  ;;  %v2517_v5 = vpop.f32.mrf.mxu1 }
 0x30e   :  { %v6647_v59 = vadd.f32 %v2517_v5, %v2287_v56 }
 0x310   :  { %v2308_v22 = vpop.f32.mrf.mxu0  ;;  %v2524_v44 = vpop.f32.mrf.mxu1 }
 0x311   :  { %v2309_v8 = vadd.f32 %v2308_v22, %v6564_v48  ;;  %v6650_v2 = vadd.f32 %v2524_v44, %v2293_v35 }
 0x312   :  { %v2310_v49 = vpop.f32.mrf.mxu0  ;;  %v2526_v52 = vpop.f32.mrf.mxu1 }
 0x313   :  { %v2311_v57 = vadd.f32 %v2310_v49, %v6566_v25  ;;  %v6653_v36 = vadd.f32 %v2526_v52, %v2295_v38 }
 0x314   :  { %v2316_v30 = vpop.f32.mrf.mxu0 }
 0x315   :  { %v2317_v31 = vadd.f32 %v2316_v30, %v6570_v9  ;;  %v2533_v17 = vpop.f32.mrf.mxu1 }
 0x316   :  { %v6656_v10 = vadd.f32 %v2533_v17, %v2301_v34  ;;  %v2318_v21 = vpop.f32.mrf.mxu0 }
 0x317   :  { %v2319_v33 = vadd.f32 %v2318_v21, %v6572_v61  ;;  %v2535_v15 = vpop.f32.mrf.mxu1 }
 0x318   :  { %v6659_v20 = vadd.f32 %v2535_v15, %v2303_v51  ;;  %v2324_v48 = vpop.f32.mrf.mxu0 }
 0x319   :  { %v2325_v13 = vadd.f32 %v2324_v48, %v6576_v0  ;;  %v2542_v63 = vpop.f32.mrf.mxu1 }
 0x31a   :  { %v6662_v19 = vadd.f32 %v2542_v63, %v2309_v8  ;;  %v2326_v25 = vpop.f32.mrf.mxu0 }
 0x31b   :  { %v2327_v47 = vadd.f32 %v2326_v25, %v6578_v40  ;;  %v2544_v27 = vpop.f32.mrf.mxu1 }
 0x31c   :  { %7952 = vst [vmem:[#allocation15_spill] sm:$0xff] %v6662_v19  ;;  %v6665_v9 = vadd.f32 %v2544_v27, %v2311_v57  ;;  %v2332_v56 = vpop.f32.mrf.mxu0 }
 0x31d   :  { %v2333_v32 = vadd.f32 %v2332_v56, %v6582_v37  ;;  %v2551_v28 = vpop.f32.mrf.mxu1 }
 0x31e   :  { %v6668_v61 = vadd.f32 %v2551_v28, %v2317_v31  ;;  %v2334_v35 = vpop.f32.mrf.mxu0 }
 0x31f   :  { %v2335_v6 = vadd.f32 %v2334_v35, %v6584_v50  ;;  %v2553_v42 = vpop.f32.mrf.mxu1 }
 0x320   :  { %v6671_v0 = vadd.f32 %v2553_v42, %v2319_v33  ;;  %v2340_v38 = vpop.f32.mrf.mxu0 }
 0x321   :  { %v2341_v58 = vadd.f32 %v2340_v38, %v6588_v62  ;;  %v2560_v60 = vpop.f32.mrf.mxu1 }
 0x322   :  { %v6674_v40 = vadd.f32 %v2560_v60, %v2325_v13  ;;  %v2342_v34 = vpop.f32.mrf.mxu0 }
 0x323   :  { %v2343_v45 = vadd.f32 %v2342_v34, %v6590_v26  ;;  %v2562_v16 = vpop.f32.mrf.mxu1 }
 0x324   :  { %v6677_v37 = vadd.f32 %v2562_v16, %v2327_v47  ;;  %v2348_v51 = vpop.f32.mrf.mxu0 }
 0x325   :  { %v2349_v5 = vadd.f32 %v2348_v51, %v6594_v7  ;;  %v2569_v22 = vpop.f32.mrf.mxu1 }
 0x326   :  { %v6680_v50 = vadd.f32 %v2569_v22, %v2333_v32  ;;  %v2350_v44 = vpop.f32.mrf.mxu0 }
 0x327   :  { %v2351_v8 = vadd.f32 %v2350_v44, %v6596_v3  ;;  %v2571_v49 = vpop.f32.mrf.mxu1 }
 0x328   :  { %v6683_v62 = vadd.f32 %v2571_v49, %v2335_v6  ;;  %v2356_v52 = vpop.f32.mrf.mxu0 }
 0x329   :  { %v2357_v57 = vadd.f32 %v2356_v52, %v6601_v46  ;;  %v2578_v30 = vpop.f32.mrf.mxu1 }
 0x32a   :  { %v6686_v26 = vadd.f32 %v2578_v30, %v2341_v58  ;;  %v2358_v31 = vpop.f32.mrf.mxu0 }
 0x32b   :  { %v2359_v17 = vadd.f32 %v2358_v31, %v6604_v11  ;;  %v2580_v21 = vpop.f32.mrf.mxu1 }
 0x32c   :  { %v6689_v7 = vadd.f32 %v2580_v21, %v2343_v45  ;;  %v6691_v33 = vpop.f32.mrf.mxu0 }
 0x32d   :  { %v2587_v15 = vpop.f32.mrf.mxu1 }
 0x32e   :  { %v6693_v48 = vadd.f32 %v2587_v15, %v2349_v5  ;;  %v6695_v3 = vpop.f32.mrf.mxu0 }
 0x32f   :  { %v2589_v13 = vpop.f32.mrf.mxu1 }
 0x330   :  { %v6697_v63 = vadd.f32 %v2589_v13, %v2351_v8  ;;  %v2773_v46 = vpop.f32.mrf.mxu0 }
 0x331   :  { %v2596_v25 = vpop.f32.mrf.mxu1  ;;  %v2774_v47 = vadd.f32 %v2773_v46, %v6614_v18 }
 0x332   :  { %v6700_v27 = vadd.f32 %v2596_v25, %v2357_v57  ;;  %v2775_v11 = vpop.f32.mrf.mxu0 }
 0x333   :  { %v2598_v56 = vpop.f32.mrf.mxu1  ;;  %v2776_v32 = vadd.f32 %v2775_v11, %v6617_v43 }
 0x334   :  { %v6703_v28 = vadd.f32 %v2598_v56, %v2359_v17  ;;  %v2780_v35 = vpop.f32.mrf.mxu0 }
 0x335   :  { %v6705_v6 = vpop.f32.mrf.mxu1  ;;  %v2781_v42 = vadd.f32 %v2780_v35, %v6620_v55 }
 0x336   :  { %v2782_v38 = vpop.f32.mrf.mxu0 }
 0x337   :  { %v6708_v58 = vpop.f32.mrf.mxu1  ;;  %v2783_v60 = vadd.f32 %v2782_v38, %v6623_v24 }
 0x338   :  { %v2787_v34 = vpop.f32.mrf.mxu0 }
 0x339   :  { %v2788_v18 = vadd.f32 %v2787_v34, %v6626_v53  ;;  %v2982_v45 = vpop.f32.mrf.mxu1 }
 0x33a   :  { %v2983_v16 = vadd.f32 %v2982_v45, %v2774_v47  ;;  %v2789_v51 = vpop.f32.mrf.mxu0 }
 0x33b   :  { %v2790_v43 = vadd.f32 %v2789_v51, %v6629_v39  ;;  %v2984_v5 = vpop.f32.mrf.mxu1 }
 0x33c   :  { %v2985_v22 = vadd.f32 %v2984_v5, %v2776_v32  ;;  %v2794_v44 = vpop.f32.mrf.mxu0  ;;  %4461 = vtanh.f32 %v2983_v16 }
 0x33d   :  { %v2795_v8 = vadd.f32 %v2794_v44, %v6632_v12  ;;  %v2989_v49 = vpop.f32.mrf.mxu1 }
 0x33e   :  { %v2990_v55 = vadd.f32 %v2989_v49, %v2781_v42  ;;  %v2796_v52 = vpop.f32.mrf.mxu0  ;;  %4463 = vtanh.f32 %v2985_v22 }
 0x33f   :  { %v2797_v57 = vadd.f32 %v2796_v52, %v6635_v29  ;;  %v2991_v30 = vpop.f32.mrf.mxu1 }
 0x340   :  { %v2992_v24 = vadd.f32 %v2991_v30, %v2783_v60  ;;  %v2801_v31 = vpop.f32.mrf.mxu0  ;;  %4465 = vtanh.f32 %v2990_v55 }
 0x341   :  { %v2802_v53 = vadd.f32 %v2801_v31, %v6638_v14  ;;  %v2996_v17 = vpop.f32.mrf.mxu1 }
 0x342   :  { %v2997_v21 = vadd.f32 %v2996_v17, %v2788_v18  ;;  %v2803_v15 = vpop.f32.mrf.mxu0  ;;  %4467 = vtanh.f32 %v2992_v24 }
 0x343   :  { %v2804_v39 = vadd.f32 %v2803_v15, %v6641_v1  ;;  %v2998_v13 = vpop.f32.mrf.mxu1 }
 0x344   :  { %v2999_v46 = vadd.f32 %v2998_v13, %v2790_v43  ;;  %v2808_v25 = vpop.f32.mrf.mxu0  ;;  %4469 = vtanh.f32 %v2997_v21 }
 0x345   :  { %v3003_v47 = vpop.f32.mrf.mxu1  ;;  %v2809_v41 = vadd.f32 %v2808_v25, %v6644_v54 }
 0x346   :  { %v3004_v12 = vadd.f32 %v3003_v47, %v2795_v8  ;;  %v2810_v11 = vpop.f32.mrf.mxu0  ;;  %4471 = vtanh.f32 %v2999_v46 }
 0x347   :  { %v3005_v56 = vpop.f32.mrf.mxu1 }
 0x348   :  { %v3006_v32 = vadd.f32 %v3005_v56, %v2797_v57  ;;  %v2815_v35 = vpop.f32.mrf.mxu0  ;;  %4473 = vtanh.f32 %v3004_v12 }
 0x349   :  { %v3010_v29 = vpop.f32.mrf.mxu1  ;;  %v2816_v16 = vadd.f32 %v2815_v35, %v6650_v2 }
 0x34a   :  { %v3011_v42 = vadd.f32 %v3010_v29, %v2802_v53  ;;  %v2817_v38 = vpop.f32.mrf.mxu0  ;;  %4475 = vtanh.f32 %v3006_v32 }
 0x34b   :  { %v3012_v60 = vpop.f32.mrf.mxu1  ;;  %v2818_v55 = vadd.f32 %v2817_v38, %v6653_v36 }
 0x34c   :  { %v3013_v34 = vadd.f32 %v3012_v60, %v2804_v39  ;;  %v2822_v14 = vpop.f32.mrf.mxu0  ;;  %4477 = vtanh.f32 %v3011_v42 }
 0x34d   :  { %v3017_v45 = vpop.f32.mrf.mxu1  ;;  %v2823_v21 = vadd.f32 %v2822_v14, %v6656_v10 }
 0x34e   :  { %v2824_v18 = vpop.f32.mrf.mxu0  ;;  %v3018_v19 = vadd.f32 %v3017_v45, %v2809_v41  ;;  %4479 = vtanh.f32 %v3013_v34  ;;  %v6748_v34 = vpop.eup %4461 }
 0x34f   :  { %v3019_v51 = vpop.f32.mrf.mxu1  ;;  %7957 = vst [vmem:[#allocation56_spill] sm:$0xff] %v6748_v34  ;;  %v6751_v14 = vpop.eup %4463 }
 0x350   :  { %v6717_v5 = vpop.f32.mrf.mxu0  ;;  %4481 = vtanh.f32 %v3018_v19  ;;  %7958 = vst [vmem:[#allocation37_spill] sm:$0xff] %v6751_v14 }
 0x351   :  { %7953 = vst [vmem:[#allocation17_spill] sm:$0xff] %v6717_v5  ;;  %v3024_v1 = vpop.f32.mrf.mxu1  ;;  %v2811_v5 = vadd.f32 %v2810_v11, %v6647_v59  ;;  %v2825_v59 = vadd.f32 %v2824_v18, %v6659_v20  ;;  %v6753_v18 = vpop.eup %4465 }
 0x352   :  { %v2831_v43 = vpop.f32.mrf.mxu0  ;;  %v3025_v54 = vadd.f32 %v3024_v1, %v2816_v16 }
 0x353   :  { %v3026_v44 = vpop.f32.mrf.mxu1  ;;  %v2832_v41 = vadd.f32 %v2831_v43, %v6665_v9 }
 0x354   :  { %v6719_v49 = vpop.f32.mrf.mxu0  ;;  %v3027_v46 = vadd.f32 %v3026_v44, %v2818_v55  ;;  %v2365_v44 = vadd.f32 %v6691_v33, %v6608_v23 }
 0x355   :  { %v3031_v8 = vpop.f32.mrf.mxu1 }
 0x356   :  { %v6721_v52 = vpop.f32.mrf.mxu0  ;;  %v3032_v2 = vadd.f32 %v3031_v8, %v2823_v21 }
 0x357   :  { %v3033_v57 = vpop.f32.mrf.mxu1 }
 0x358   :  { %v6723_v30 = vpop.f32.mrf.mxu0  ;;  %v3034_v32 = vadd.f32 %v3033_v57, %v2825_v59 }
 0x359   :  { %v6725_v31 = vpop.f32.mrf.mxu1 }
 0x35a   :  { %7954 = vst [vmem:[#allocation40_spill] sm:$0xff] %v6725_v31  ;;  %v2845_v53 = vpop.f32.mrf.mxu0 }
 0x35b   :  { %v3040_v17 = vpop.f32.mrf.mxu1  ;;  %v2846_v36 = vadd.f32 %v2845_v53, %v6677_v37 }
 0x35c   :  { %v6727_v15 = vpop.f32.mrf.mxu0  ;;  %v3041_v35 = vadd.f32 %v3040_v17, %v2832_v41 }
 0x35d   :  { %v6729_v39 = vpop.f32.mrf.mxu1 }
 0x35e   :  { %7955 = vst [vmem:[#allocation26_spill] sm:$0xff] %v6729_v39  ;;  %v2852_v13 = vpop.f32.mrf.mxu0 }
 0x35f   :  { %v6731_v47 = vpop.f32.mrf.mxu1  ;;  %v2853_v10 = vadd.f32 %v2852_v13, %v6683_v62  ;;  %v6756_v62 = vpop.eup %4467  ;;  %v2606_v13 = vadd.f32 %v6705_v6, %v2365_v44 }
 0x360   :  { %7956 = vst [vmem:[#allocation55_spill] sm:$0xff] %v6731_v47  ;;  %v6733_v56 = vpop.f32.mrf.mxu0  ;;  %v3020_v47 = vadd.f32 %v3019_v51, %v2811_v5  ;;  %v6827_v44 = vand.u32 4294901760, %v6756_v62 }
 0x361   :  { %v6735_v29 = vpop.f32.mrf.mxu1  ;;  %v2858_v53 = vadd.f32 %v6733_v56, %v6686_v26 }
 0x362   :  { %v2859_v60 = vpop.f32.mrf.mxu0  ;;  %4483 = vtanh.f32 %v3020_v47 }
 0x363   :  { %v3054_v31 = vpop.f32.mrf.mxu1  ;;  %4485 = vtanh.f32 %v3025_v54  ;;  %v2860_v20 = vadd.f32 %v2859_v60, %v6689_v7  ;;  %v6759_v7 = vpop.eup %4469 }
 0x364   :  { %v2864_v39 = vpop.f32.mrf.mxu0  ;;  %4487 = vtanh.f32 %v3027_v46  ;;  %v3055_v19 = vadd.f32 %v3054_v31, %v2846_v36  ;;  %v6764_v31 = vpop.eup %4471 }
 0x365   :  { %v6740_v22 = vpop.f32.mrf.mxu1  ;;  %4489 = vtanh.f32 %v3032_v2  ;;  %v2865_v5 = vadd.f32 %v2864_v39, %v6693_v48  ;;  %v6770_v39 = vpop.eup %4473 }
 0x366   :  { %v2866_v24 = vpop.f32.mrf.mxu0  ;;  %4491 = vtanh.f32 %v3034_v32  ;;  %v6777_v47 = vpop.eup %4475 }
 0x367   :  { %v3061_v25 = vpop.f32.mrf.mxu1  ;;  %v2867_v37 = vadd.f32 %v2866_v24, %v6697_v63  ;;  %4493 = vtanh.f32 %v3041_v35  ;;  %v2367_v63 = vadd.f32 %v6695_v3, %v6611_v4  ;;  %v2851_v4 = vadd.f32 %v6727_v15, %v6680_v50  ;;  %v6781_v60 = vpop.eup %4477  ;;  %v7960_v41 = vld [vmem:[#allocation55_spill] sm:$0xff]  ;;  %v7963_v35 = vld [vmem:[#allocation26_spill] sm:$0xff] }
 0x368   :  { %v2871_v12 = vpop.f32.mrf.mxu0  ;;  %v3062_v9 = vadd.f32 %v3061_v25, %v2853_v10  ;;  %4495 = vtanh.f32 %v3055_v19  ;;  %v6784_v55 = vpop.eup %4479  ;;  %v2844_v24 = vadd.f32 %v6723_v30, %v6674_v40  ;;  %v2839_v25 = vadd.f32 %v6721_v52, %v6671_v0  ;;  %v7961_v0 = vld [vmem:[#allocation15_spill] sm:$0xff]  ;;  %v7962_v52 = vld [vmem:[#allocation17_spill] sm:$0xff] }
 0x369   :  { %v3066_v11 = vpop.f32.mrf.mxu1  ;;  %v2872_v8 = vadd.f32 %v2871_v12, %v6700_v27  ;;  %v3124_v27 = vld [vmem:[%s7449_s4] sm:$0xff]  ;;  %v2608_v6 = vadd.f32 %v6708_v58, %v2367_v63  ;;  %v3060_v21 = vadd.f32 %v6740_v22, %v2851_v4  ;;  %v6791_v54 = vpop.eup %4481  ;;  %v2837_v12 = vadd.f32 %v6719_v49, %v6668_v61 }
 0x36a   :  { %v2873_v42 = vpop.f32.mrf.mxu0  ;;  %4497 = vtanh.f32 %v3062_v9  ;;  %v3067_v26 = vadd.f32 %v3066_v11, %v2858_v53  ;;  %v6789_v15 = vand.u32 4294901760, %v3124_v27  ;;  %v3053_v40 = vadd.f32 %v6735_v29, %v2844_v24 }
 0x36b   :  { %v3068_v38 = vpop.f32.mrf.mxu1  ;;  %v2874_v23 = vadd.f32 %v2873_v42, %v6703_v28  ;;  %v3048_v2 = vadd.f32 %v7960_v41, %v2839_v25  ;;  %v2830_v36 = vadd.f32 %v7962_v52, %v7961_v0  ;;  %v3046_v10 = vadd.f32 %v7963_v35, %v2837_v12  ;;  %v7965_v42 = vld [vmem:[#allocation40_spill] sm:$0xff] }
 0x36c   :  { %v3069_v51 = vadd.f32 %v3068_v38, %v2860_v20  ;;  %v2878_v1 = vpop.f32.mrf.mxu0  ;;  %7959 = vst [vmem:[#allocation36_spill] sm:$0xff] %v6789_v15  ;;  %v6809_v61 = vsub.f32 %v3124_v27, %v6789_v15  ;;  %v6836_v63 = vand.u32 4294901760, %v6748_v34  ;;  %v6868_v24 = vand.u32 4294901760, %v6784_v55 }
 0x36d   :  { %v3073_v45 = vpop.f32.mrf.mxu1  ;;  %v2879_v28 = vadd.f32 %v2878_v1, %v2606_v13  ;;  %v3039_v38 = vadd.f32 %v7965_v42, %v2830_v36  ;;  %v6844_v13 = vand.u32 4294901760, %v6764_v31 }
 0x36e   :  { %v3074_v48 = vadd.f32 %v3073_v45, %v2865_v5  ;;  %4499 = vtanh.f32 %v3069_v51  ;;  %v2880_v3 = vpop.f32.mrf.mxu0  ;;  %7964 = vst [vmem:[#allocation51_spill] sm:$0xff] %v6809_v61  ;;  %v7580_v9 = vand.u32 4294901760, %v6809_v61  ;;  %7968 = vst [vmem:[#allocation22_spill] sm:$0xff] %v6836_v63 }
 0x36f   :  { %v3075_v43 = vpop.f32.mrf.mxu1  ;;  %v2881_v58 = vadd.f32 %v2880_v3, %v2608_v6  ;;  %v6795_v46 = vpop.eup %4483  ;;  %7970 = vst [vmem:[#allocation54_spill] sm:$0xff] %v6844_v13  ;;  %v6857_v3 = vand.u32 4294901760, %v6777_v47  ;;  %7979 = vst [vmem:[#allocation45_spill] sm:$0xff] %v6868_v24 }
 0x370   :  { %v3076_v57 = vadd.f32 %v3075_v43, %v2867_v37  ;;  %v6800_v22 = vpop.eup %4485  ;;  %v6824_v1 = vsub.f32 %v6809_v61, %v7580_v9 }
 0x371   :  { %v3080_v17 = vpop.f32.mrf.mxu1  ;;  %v6803_v32 = vpop.eup %4487  ;;  %7975 = vst [vmem:[#allocation42_spill] sm:$0xff] %v6857_v3 }
 0x372   :  { %v3081_v33 = vadd.f32 %v3080_v17, %v2872_v8  ;;  %4501 = vtanh.f32 %v3076_v57  ;;  %v6811_v49 = vpop.eup %4489  ;;  %7966 = vst [vmem:[#allocation33_spill] sm:$0xff] %v6824_v1  ;;  %v6830_v8 = vand.u32 4294901760, %v6753_v18  ;;  %v6833_v57 = vand.u32 4294901760, %v6751_v14 }
 0x373   :  { %v3082_v56 = vpop.f32.mrf.mxu1  ;;  %v6813_v29 = vpop.eup %4491  ;;  %v6841_v17 = vand.u32 4294901760, %v6770_v39  ;;  %v6886_v41 = vand.u32 4294901760, %v6811_v49 }
 0x374   :  { %4503 = vtanh.f32 %v3081_v33  ;;  %v3083_v16 = vadd.f32 %v3082_v56, %v2874_v23  ;;  %v6816_v20 = vpop.eup %4493  ;;  %7967 = vst [vmem:[#allocation20_spill] sm:$0xff] %v6833_v57  ;;  %v6847_v23 = vand.u32 4294901760, %v6759_v7 }
 0x375   :  { %4505 = vtanh.f32 %v3074_v48  ;;  %v3087_v50 = vpop.f32.mrf.mxu1  ;;  %v6818_v19 = vpop.eup %4495  ;;  %v6926_v34 = vand.u32 4294901760, %v6816_v20 }
 0x376   :  { %4507 = vtanh.f32 %v3083_v16  ;;  %v3088_v59 = vadd.f32 %v3087_v50, %v2879_v28  ;;  %7971 = vst [vmem:[#allocation62_spill] sm:$0xff] %v6847_v23  ;;  %v6862_v28 = vand.u32 4294901760, %v6795_v46  ;;  %v6865_v16 = vand.u32 4294901760, %v6791_v54 }
 0x377   :  { %4509 = vtanh.f32 %v3067_v26  ;;  %v3089_v30 = vpop.f32.mrf.mxu1  ;;  %v4498_v45 = vpop.eup %4497  ;;  %v6854_v26 = vand.u32 4294901760, %v6781_v60 }
 0x378   :  { %4511 = vtanh.f32 %v3088_v59  ;;  %v3090_v11 = vadd.f32 %v3089_v30, %v2881_v58  ;;  %7977 = vst [vmem:[#allocation47_spill] sm:$0xff] %v6862_v28  ;;  %7978 = vst [vmem:[#allocation46_spill] sm:$0xff] %v6865_v16  ;;  %v6878_v59 = vand.u32 4294901760, %v6800_v22  ;;  %v6893_v52 = vand.u32 4294901760, %v4498_v45 }
 0x379   :  { %4513 = vtanh.f32 %v3060_v21  ;;  %7974 = vst [vmem:[#allocation28_spill] sm:$0xff] %v6854_v26 }
 0x37a   :  { %4515 = vtanh.f32 %v3090_v11 }
 0x37b   :  { %4517 = vtanh.f32 %v3053_v40  ;;  %v4500_v37 = vpop.eup %4499 }
 0x37c   :  { %4519 = vtanh.f32 %v3048_v2  ;;  %v6872_v25 = vand.u32 4294901760, %v4500_v37  ;;  %v6889_v2 = vand.u32 4294901760, %v6803_v32 }
 0x37d   :  { %4521 = vtanh.f32 %v3046_v10 }
 0x37e   :  { %4523 = vtanh.f32 %v3039_v38  ;;  %v6904_v38 = vand.u32 4294901760, %v6818_v19  ;;  %v6919_v15 = vsub.f32 %v4500_v37, %v6872_v25 }
 0x37f   :  { %v4502_v51 = vpop.eup %4501 }
 0x380   :  { %v6851_v4 = vand.u32 4294901760, %v4502_v51 }
 0x381   :  { %v4504_v5 = vpop.eup %4503 }
 0x382   :  { %v4506_v43 = vpop.eup %4505  ;;  %v6838_v48 = vand.u32 4294901760, %v4504_v5  ;;  %7973 = vst [vmem:[#allocation16_spill] sm:$0xff] %v6851_v4  ;;  %v6899_v35 = vsub.f32 %v4502_v51, %v6851_v4 }
 0x383   :  { %v4508_v53 = vpop.eup %4507  ;;  %v6859_v6 = vand.u32 4294901760, %v4506_v43 }
 0x384   :  { %7969 = vst [vmem:[#allocation35_spill] sm:$0xff] %v6838_v48  ;;  %v4510_v33 = vpop.eup %4509  ;;  %v6849_v27 = vand.u32 4294901760, %v4508_v53  ;;  %v6883_v30 = vsub.f32 %v4504_v5, %v6838_v48  ;;  %v7989_v57 = vand.u32 4294901760, %v6899_v35 }
 0x385   :  { %v4512_v56 = vpop.eup %4511  ;;  %7976 = vst [vmem:[#allocation41_spill] sm:$0xff] %v6859_v6  ;;  %v6880_v40 = vand.u32 4294901760, %v4510_v33  ;;  %v6907_v5 = vsub.f32 %v4506_v43, %v6859_v6 }
 0x386   :  { %7972 = vst [vmem:[#allocation61_spill] sm:$0xff] %v6849_v27  ;;  %v4514_v21 = vpop.eup %4513  ;;  %v6870_v50 = vand.u32 4294901760, %v4512_v56  ;;  %v6875_v58 = vsub.f32 %v4508_v53, %v6849_v27  ;;  %7983 = vst [vmem:[#allocation14_spill] sm:$0xff] %v6883_v30  ;;  %v6910_v53 = vand.u32 4294901760, %v6813_v29 }
 0x387   :  { %v4516_v12 = vpop.eup %4515  ;;  %7982 = vst [vmem:[#allocation44_spill] sm:$0xff] %v6880_v40  ;;  %v6901_v42 = vand.u32 4294901760, %v4514_v21  ;;  %v6929_v63 = vsub.f32 %v4510_v33, %v6880_v40 }
 0x388   :  { %7980 = vst [vmem:[#allocation13_spill] sm:$0xff] %v6870_v50  ;;  %7981 = vst [vmem:[#allocation38_spill] sm:$0xff] %v6875_v58  ;;  %v4518_v11 = vpop.eup %4517  ;;  %v6891_v0 = vand.u32 4294901760, %v4516_v12  ;;  %v6896_v36 = vsub.f32 %v4512_v56, %v6870_v50  ;;  %v7987_v37 = vand.u32 4294901760, %v6875_v58 }
 0x389   :  { %v4520_v10 = vpop.eup %4519  ;;  %v6922_v43 = vand.u32 4294901760, %v4518_v11 }
 0x38a   :  { %7984 = vst [vmem:[#allocation48_spill] sm:$0xff] %v6891_v0  ;;  %7985 = vst [vmem:[#allocation60_spill] sm:$0xff] %v6896_v36  ;;  %v4522_v9 = vpop.eup %4521  ;;  %3132 = vmatprep.subr.mxu0 %v6891_v0  ;;  %v6914_v56 = vsub.f32 %v4516_v12, %v6891_v0  ;;  %v6933_v51 = vand.u32 4294901760, %v4520_v10  ;;  %v7986_v1 = vand.u32 4294901760, %v6896_v36 }
 0x38b   :  { %3134 = vmatpush1.msra.mxu0 %v6870_v50  ;;  %v4524_v12 = vpop.eup %4523  ;;  %v6937_v50 = vsub.f32 %v4498_v45, %v6893_v52  ;;  %v6943_v33 = vand.u32 4294901760, %v4522_v9 }
 0x38c   :  { %3136 = vmatprep.subr.mxu0 %v6849_v27  ;;  %v7599_v61 = vand.u32 4294901760, %v6914_v56  ;;  %v3248_v0 = vsub.f32 %v6896_v36, %v7986_v1  ;;  %v6947_v27 = vsub.f32 %v4514_v21, %v6901_v42  ;;  %v6959_v1 = vsub.f32 %v6818_v19, %v6904_v38 }
 0x38d   :  { %3138 = vmatpush1.msra.mxu0 %v6838_v48  ;;  %v3254_v48 = vsub.f32 %v6875_v58, %v7987_v37  ;;  %v7988_v21 = vand.u32 4294901760, %v6883_v30  ;;  %v6969_v36 = vsub.f32 %v4518_v11, %v6922_v43  ;;  %v3266_v19 = vsub.f32 %v6899_v35, %v7989_v57 }
 0x38e   :  { %3140 = vmatprep.subr.mxu0 %v6851_v4  ;;  %v3242_v45 = vsub.f32 %v6914_v56, %v7599_v61  ;;  %v6965_v4 = vand.u32 4294901760, %v4524_v12  ;;  %v6977_v58 = vsub.f32 %v4520_v10, %v6933_v51  ;;  %v7990_v61 = vand.u32 4294901760, %v6907_v5 }
 0x38f   :  { %3142 = vmatpush1.msra.mxu0 %v6859_v6  ;;  %v3260_v14 = vsub.f32 %v6883_v30, %v7988_v21  ;;  %v3249_v21 = vand.u32 4294901760, %v3248_v0  ;;  %v3255_v57 = vand.u32 4294901760, %v3254_v48  ;;  %v7991_v6 = vand.u32 4294901760, %v6919_v15 }
 0x390   :  { %3144 = vmatprep.subr.mxu0 %v6872_v25  ;;  %v3243_v37 = vand.u32 4294901760, %v3242_v45  ;;  %v3272_v11 = vsub.f32 %v6907_v5, %v7990_v61  ;;  %v6985_v45 = vsub.f32 %v4522_v9, %v6943_v33  ;;  %v6994_v0 = vsub.f32 %v6816_v20, %v6926_v34 }
 0x391   :  { %3146 = vmatpush1.msra.mxu0 %v6880_v40  ;;  %v3278_v10 = vsub.f32 %v6919_v15, %v7991_v6  ;;  %v3261_v61 = vand.u32 4294901760, %v3260_v14  ;;  %v7992_v9 = vand.u32 4294901760, %v6929_v63  ;;  %v3267_v6 = vand.u32 4294901760, %v3266_v19 }
 0x392   :  { %3148 = vmatprep.subr.mxu0 %v6893_v52  ;;  %3244 = vmatprep.subr.mxu1 %v3243_v37  ;;  %v7002_v37 = vsub.f32 %v4524_v12, %v6965_v4  ;;  %v7993_v20 = vand.u32 4294901760, %v6937_v50  ;;  %v7011_v14 = vsub.f32 %v6813_v29, %v6910_v53  ;;  %v7994_v12 = vand.u32 4294901760, %v6947_v27 }
 0x393   :  { %3150 = vmatpush1.msra.mxu0 %v6901_v42  ;;  %3250 = vmatpush1.msra.mxu1 %v3249_v21  ;;  %v3284_v30 = vsub.f32 %v6929_v63, %v7992_v9  ;;  %v3273_v9 = vand.u32 4294901760, %v3272_v11  ;;  %v7995_v29 = vand.u32 4294901760, %v6959_v1 }
 0x394   :  { %3152 = vmatprep.subr.mxu0 %v6904_v38  ;;  %3256 = vmatprep.subr.mxu1 %v3255_v57  ;;  %v3290_v40 = vsub.f32 %v6937_v50, %v7993_v20  ;;  %v3296_v48 = vsub.f32 %v6947_v27, %v7994_v12  ;;  %v7020_v57 = vsub.f32 %v6811_v49, %v6886_v41  ;;  %v3279_v20 = vand.u32 4294901760, %v3278_v10 }
 0x395   :  { %3154 = vmatpush1.msra.mxu0 %v6922_v43  ;;  %3262 = vmatpush1.msra.mxu1 %v3261_v61  ;;  %v3302_v21 = vsub.f32 %v6959_v1, %v7995_v29  ;;  %v7029_v61 = vsub.f32 %v6803_v32, %v6889_v2  ;;  %v3285_v12 = vand.u32 4294901760, %v3284_v30  ;;  %v7996_v49 = vand.u32 4294901760, %v6969_v36 }
 0x396   :  { %3156 = vmatprep.subr.mxu0 %v6933_v51  ;;  %3268 = vmatprep.subr.mxu1 %v3267_v6  ;;  %v7038_v6 = vsub.f32 %v6800_v22, %v6878_v59  ;;  %v3291_v29 = vand.u32 4294901760, %v3290_v40  ;;  %v7997_v32 = vand.u32 4294901760, %v6977_v58  ;;  %v7998_v22 = vand.u32 4294901760, %v6985_v45 }
 0x397   :  { %3158 = vmatpush1.msra.mxu0 %v6943_v33  ;;  %3274 = vmatpush1.msra.mxu1 %v3273_v9  ;;  %v3308_v19 = vsub.f32 %v6969_v36, %v7996_v49  ;;  %v7047_v9 = vsub.f32 %v6795_v46, %v6862_v28  ;;  %v3297_v49 = vand.u32 4294901760, %v3296_v48  ;;  %v7999_v46 = vand.u32 4294901760, %v6994_v0 }
 0x398   :  { %3160 = vmatprep.subr.mxu0 %v6926_v34  ;;  %3280 = vmatprep.subr.mxu1 %v3279_v20  ;;  %v3314_v11 = vsub.f32 %v6977_v58, %v7997_v32  ;;  %v3320_v10 = vsub.f32 %v6985_v45, %v7998_v22  ;;  %v7056_v20 = vsub.f32 %v6791_v54, %v6865_v16  ;;  %v3303_v32 = vand.u32 4294901760, %v3302_v21 }
 0x399   :  { %3162 = vmatpush1.msra.mxu0 %v6965_v4  ;;  %3286 = vmatpush1.msra.mxu1 %v3285_v12  ;;  %v3326_v30 = vsub.f32 %v6994_v0, %v7999_v46  ;;  %v7065_v12 = vsub.f32 %v6784_v55, %v6868_v24  ;;  %v3309_v22 = vand.u32 4294901760, %v3308_v19  ;;  %v8000_v54 = vand.u32 4294901760, %v7002_v37 }
 0x39a   :  { %3164 = vmatprep.subr.mxu0 %v6910_v53  ;;  %3292 = vmatprep.subr.mxu1 %v3291_v29  ;;  %v7074_v29 = vsub.f32 %v6781_v60, %v6854_v26  ;;  %v3315_v46 = vand.u32 4294901760, %v3314_v11  ;;  %v8001_v55 = vand.u32 4294901760, %v7011_v14  ;;  %v8002_v60 = vand.u32 4294901760, %v7020_v57 }
 0x39b   :  { %3166 = vmatpush1.msra.mxu0 %v6886_v41  ;;  %3298 = vmatpush1.msra.mxu1 %v3297_v49  ;;  %v3332_v40 = vsub.f32 %v7002_v37, %v8000_v54  ;;  %v7083_v49 = vsub.f32 %v6777_v47, %v6857_v3  ;;  %v3321_v54 = vand.u32 4294901760, %v3320_v10  ;;  %v8003_v47 = vand.u32 4294901760, %v7029_v61 }
 0x39c   :  { %3168 = vmatprep.subr.mxu0 %v6889_v2  ;;  %3304 = vmatprep.subr.mxu1 %v3303_v32  ;;  %v3338_v48 = vsub.f32 %v7011_v14, %v8001_v55  ;;  %v3344_v21 = vsub.f32 %v7020_v57, %v8002_v60  ;;  %v7092_v32 = vsub.f32 %v6770_v39, %v6841_v17  ;;  %v3327_v55 = vand.u32 4294901760, %v3326_v30 }
 0x39d   :  { %3170 = vmatpush1.msra.mxu0 %v6878_v59  ;;  %3310 = vmatpush1.msra.mxu1 %v3309_v22  ;;  %v3350_v19 = vsub.f32 %v7029_v61, %v8003_v47  ;;  %v7101_v22 = vsub.f32 %v6764_v31, %v6844_v13  ;;  %v3333_v60 = vand.u32 4294901760, %v3332_v40  ;;  %v8004_v39 = vand.u32 4294901760, %v7038_v6 }
 0x39e   :  { %3172 = vmatprep.subr.mxu0 %v6862_v28  ;;  %3316 = vmatprep.subr.mxu1 %v3315_v46  ;;  %v7110_v46 = vsub.f32 %v6759_v7, %v6847_v23  ;;  %v3339_v47 = vand.u32 4294901760, %v3338_v48  ;;  %v8005_v31 = vand.u32 4294901760, %v7047_v9  ;;  %v8006_v7 = vand.u32 4294901760, %v7056_v20 }
 0x39f   :  { %3174 = vmatpush1.msra.mxu0 %v6865_v16  ;;  %3322 = vmatpush1.msra.mxu1 %v3321_v54  ;;  %v3356_v11 = vsub.f32 %v7038_v6, %v8004_v39  ;;  %v7119_v54 = vsub.f32 %v6756_v62, %v6827_v44  ;;  %v3345_v39 = vand.u32 4294901760, %v3344_v21  ;;  %v8007_v62 = vand.u32 4294901760, %v7065_v12 }
 0x3a0   :  { %3176 = vmatprep.subr.mxu0 %v6868_v24  ;;  %3328 = vmatprep.subr.mxu1 %v3327_v55  ;;  %v3362_v10 = vsub.f32 %v7047_v9, %v8005_v31  ;;  %v3368_v30 = vsub.f32 %v7056_v20, %v8006_v7  ;;  %v7128_v55 = vsub.f32 %v6753_v18, %v6830_v8  ;;  %v3351_v31 = vand.u32 4294901760, %v3350_v19 }
 0x3a1   :  { %3178 = vmatpush1.msra.mxu0 %v6854_v26  ;;  %3334 = vmatpush1.msra.mxu1 %v3333_v60  ;;  %v3374_v40 = vsub.f32 %v7065_v12, %v8007_v62  ;;  %v8008_v60 = vld [vmem:[#allocation20_spill] sm:$0xff]  ;;  %v8009_v26 = vld [vmem:[#allocation37_spill] sm:$0xff]  ;;  %v3357_v7 = vand.u32 4294901760, %v3356_v11  ;;  %v8011_v18 = vand.u32 4294901760, %v7074_v29 }
 0x3a2   :  { %3180 = vmatprep.subr.mxu0 %v6857_v3  ;;  %3340 = vmatprep.subr.mxu1 %v3339_v47  ;;  %v7137_v24 = vsub.f32 %v8009_v26, %v8008_v60  ;;  %v8012_v47 = vld [vmem:[#allocation22_spill] sm:$0xff]  ;;  %v8013_v3 = vld [vmem:[#allocation56_spill] sm:$0xff]  ;;  %v3363_v62 = vand.u32 4294901760, %v3362_v10  ;;  %v8015_v26 = vand.u32 4294901760, %v7083_v49 }
 0x3a3   :  { %3182 = vmatpush1.msra.mxu0 %v6841_v17  ;;  %3346 = vmatpush1.msra.mxu1 %v3345_v39  ;;  %v3380_v48 = vsub.f32 %v7074_v29, %v8011_v18  ;;  %v7146_v16 = vsub.f32 %v8013_v3, %v8012_v47  ;;  %v3369_v39 = vand.u32 4294901760, %v3368_v30  ;;  %v8016_v18 = vand.u32 4294901760, %v7092_v32 }
 0x3a4   :  { %8010 = vst [vmem:[#allocation31_spill] sm:$0xff] %v7137_v24  ;;  %3184 = vmatprep.subr.mxu0 %v6844_v13  ;;  %3352 = vmatprep.subr.mxu1 %v3351_v31  ;;  %v3386_v21 = vsub.f32 %v7083_v49, %v8015_v26  ;;  %v3375_v10 = vand.u32 4294901760, %v3374_v40  ;;  %v8017_v31 = vld [vmem:[#allocation33_spill] sm:$0xff]  ;;  %v8018_v26 = vand.u32 4294901760, %v7101_v22 }
 0x3a5   :  { %8014 = vst [vmem:[#allocation59_spill] sm:$0xff] %v7146_v16  ;;  %3186 = vmatpush1.msra.mxu0 %v6847_v23  ;;  %3358 = vmatpush1.msra.mxu1 %v3357_v7  ;;  %v3392_v19 = vsub.f32 %v7092_v32, %v8016_v18  ;;  %v3232_v13 = vand.u32 4294901760, %v8017_v31  ;;  %v7623_v23 = vand.u32 4294901760, %v7137_v24  ;;  %v3381_v30 = vand.u32 4294901760, %v3380_v48 }
 0x3a6   :  { %3188 = vmatprep.subr.mxu0 %v6827_v44  ;;  %3364 = vmatprep.subr.mxu1 %v3363_v62  ;;  %v3398_v11 = vsub.f32 %v7101_v22, %v8018_v26  ;;  %v8019_v7 = vand.u32 4294901760, %v7110_v46  ;;  %v7622_v3 = vand.u32 4294901760, %v7146_v16  ;;  %v3387_v40 = vand.u32 4294901760, %v3386_v21 }
 0x3a7   :  { %3190 = vmatpush1.msra.mxu0 %v6830_v8  ;;  %3370 = vmatpush1.msra.mxu1 %v3369_v39  ;;  %v8020_v62 = vand.u32 4294901760, %v7119_v54  ;;  %v3393_v26 = vand.u32 4294901760, %v3392_v19  ;;  %v8021_v48 = vand.u32 4294901760, %v7128_v55  ;;  %v8022_v19 = vld [vmem:[#allocation60_spill] sm:$0xff] }
 0x3a8   :  { %v3404_v18 = vsub.f32 %v7110_v46, %v8019_v7  ;;  %3192 = vmatprep.subr.mxu0 %v8008_v60  ;;  %3376 = vmatprep.subr.mxu1 %v3375_v10  ;;  %v3399_v7 = vand.u32 4294901760, %v3398_v11  ;;  %v3422_v10 = vsub.f32 %v7137_v24, %v7623_v23  ;;  %v8024_v11 = vld [vmem:[#allocation14_spill] sm:$0xff]  ;;  %v8037_v23 = vld [vmem:[#allocation51_spill] sm:$0xff] }
 0x3a9   :  { %v3410_v31 = vsub.f32 %v7119_v54, %v8020_v62  ;;  %3194 = vmatpush1.msra.mxu0 %v8012_v47  ;;  %3382 = vmatpush1.msra.mxu1 %v3381_v30  ;;  %v3416_v39 = vsub.f32 %v7128_v55, %v8021_v48  ;;  %v3428_v30 = vsub.f32 %v7146_v16, %v7622_v3  ;;  %v8023_v48 = vld [vmem:[#allocation38_spill] sm:$0xff]  ;;  %v8036_v3 = vld [vmem:[#allocation28_spill] sm:$0xff] }
 0x3aa   :  { %3233 = vmatmul.mubr.f32.vlgmr.msra.gmra.mxu0 %v3232_v13  ;;  %3388 = vmatprep.subr.mxu1 %v3387_v40  ;;  %v3405_v21 = vand.u32 4294901760, %v3404_v18  ;;  %v3423_v40 = vand.u32 4294901760, %v3422_v10  ;;  %v8029_v10 = vld [vmem:[#allocation35_spill] sm:$0xff] }
 0x3ab   :  { %3473 = vmatprep.subr.mxu0 %v6914_v56  ;;  %3394 = vmatpush1.msra.mxu1 %v3393_v26  ;;  %v3411_v62 = vand.u32 4294901760, %v3410_v31  ;;  %v3417_v13 = vand.u32 4294901760, %v3416_v39  ;;  %v3429_v18 = vand.u32 4294901760, %v3428_v30  ;;  %v8025_v31 = vld [vmem:[#allocation36_spill] sm:$0xff]  ;;  %v8027_v39 = vld [vmem:[#allocation13_spill] sm:$0xff] }
 0x3ac   :  { %3476 = vmatpush1.msra.mxu0 %v8022_v19  ;;  %3400 = vmatprep.subr.mxu1 %v3399_v7  ;;  %v8026_v26 = vld [vmem:[#allocation48_spill] sm:$0xff]  ;;  %v8028_v7 = vld [vmem:[#allocation61_spill] sm:$0xff] }
 0x3ad   :  { %3479 = vmatprep.subr.mxu0 %v8023_v48  ;;  %3406 = vmatpush1.msra.mxu1 %v3405_v21  ;;  %v8030_v21 = vld [vmem:[#allocation16_spill] sm:$0xff]  ;;  %v8031_v30 = vld [vmem:[#allocation41_spill] sm:$0xff] }
 0x3ae   :  { %3482 = vmatpush1.msra.mxu0 %v8024_v11  ;;  %3412 = vmatprep.subr.mxu1 %v3411_v62  ;;  %v8032_v62 = vld [vmem:[#allocation44_spill] sm:$0xff] }
 0x3af   :  { %3485 = vmatprep.subr.mxu0 %v6899_v35  ;;  %3418 = vmatpush1.msra.mxu1 %v3417_v13  ;;  %v8033_v13 = vld [vmem:[#allocation46_spill] sm:$0xff] }
 0x3b0   :  { %3488 = vmatpush1.msra.mxu0 %v6907_v5  ;;  %3424 = vmatprep.subr.mxu1 %v3423_v40  ;;  %v8034_v40 = vld [vmem:[#allocation45_spill] sm:$0xff] }
 0x3b1   :  { %3491 = vmatprep.subr.mxu0 %v6919_v15  ;;  %3430 = vmatpush1.msra.mxu1 %v3429_v18  ;;  %v8035_v18 = vmov 0.0  }
 0x3b2   :  { %3494 = vmatpush1.msra.mxu0 %v6929_v63  ;;  %3465 = vmatmul.mubr.f32.vlgmr.msra.gmra.mxu1 %v8025_v31  ;;  %v8038_v31 = vld [vmem:[#allocation42_spill] sm:$0xff] }
 0x3b3   :  { %3497 = vmatprep.subr.mxu0 %v6937_v50  ;;  %3609 = vmatprep.subr.mxu1 %v8026_v26 }
 0x3b4   :  { %3500 = vmatpush1.msra.mxu0 %v6947_v27  ;;  %3611 = vmatpush1.msra.mxu1 %v8027_v39 }
 0x3b5   :  { %3503 = vmatprep.subr.mxu0 %v6959_v1  ;;  %3613 = vmatprep.subr.mxu1 %v8028_v7 }
 0x3b6   :  { %3506 = vmatpush1.msra.mxu0 %v6969_v36  ;;  %3615 = vmatpush1.msra.mxu1 %v8029_v10 }
 0x3b7   :  { %3509 = vmatprep.subr.mxu0 %v6977_v58  ;;  %3617 = vmatprep.subr.mxu1 %v8030_v21 }
 0x3b8   :  { %3512 = vmatpush1.msra.mxu0 %v6985_v45  ;;  %3619 = vmatpush1.msra.mxu1 %v8031_v30 }
 0x3b9   :  { %3515 = vmatprep.subr.mxu0 %v6994_v0  ;;  %3621 = vmatprep.subr.mxu1 %v6872_v25 }
 0x3ba   :  { %3518 = vmatpush1.msra.mxu0 %v7002_v37  ;;  %3623 = vmatpush1.msra.mxu1 %v8032_v62 }
 0x3bb   :  { %3521 = vmatprep.subr.mxu0 %v7011_v14  ;;  %3625 = vmatprep.subr.mxu1 %v6893_v52 }
 0x3bc   :  { %3524 = vmatpush1.msra.mxu0 %v7020_v57  ;;  %3627 = vmatpush1.msra.mxu1 %v6901_v42 }
 0x3bd   :  { %3527 = vmatprep.subr.mxu0 %v7029_v61  ;;  %3629 = vmatprep.subr.mxu1 %v6904_v38 }
 0x3be   :  { %3530 = vmatpush1.msra.mxu0 %v7038_v6  ;;  %3631 = vmatpush1.msra.mxu1 %v6922_v43 }
 0x3bf   :  { %3533 = vmatprep.subr.mxu0 %v7047_v9  ;;  %3633 = vmatprep.subr.mxu1 %v6933_v51 }
 0x3c0   :  { %3536 = vmatpush1.msra.mxu0 %v7056_v20  ;;  %3635 = vmatpush1.msra.mxu1 %v6943_v33 }
 0x3c1   :  { %3539 = vmatprep.subr.mxu0 %v7065_v12  ;;  %3637 = vmatprep.subr.mxu1 %v6926_v34 }
 0x3c2   :  { %3542 = vmatpush1.msra.mxu0 %v7074_v29  ;;  %3639 = vmatpush1.msra.mxu1 %v6965_v4 }
 0x3c3   :  { %3545 = vmatprep.subr.mxu0 %v7083_v49  ;;  %3641 = vmatprep.subr.mxu1 %v6910_v53 }
 0x3c4   :  { %3548 = vmatpush1.msra.mxu0 %v7092_v32  ;;  %3643 = vmatpush1.msra.mxu1 %v6886_v41 }
 0x3c5   :  { %3551 = vmatprep.subr.mxu0 %v7101_v22  ;;  %3645 = vmatprep.subr.mxu1 %v6889_v2 }
 0x3c6   :  { %3554 = vmatpush1.msra.mxu0 %v7110_v46  ;;  %3647 = vmatpush1.msra.mxu1 %v6878_v59 }
 0x3c7   :  { %3557 = vmatprep.subr.mxu0 %v7119_v54  ;;  %3649 = vmatprep.subr.mxu1 %v6862_v28  ;;  %v8039_v28 = vand.u32 4294901760, %v6914_v56  ;;  %v8045_v56 = vand.u32 4294901760, %v6899_v35  ;;  %v8049_v35 = vand.u32 4294901760, %v8037_v23 }
 0x3c8   :  { %3560 = vmatpush1.msra.mxu0 %v7128_v55  ;;  %3651 = vmatpush1.msra.mxu1 %v8033_v13  ;;  %v8040_v13 = vand.u32 4294901760, %v8022_v19  ;;  %v8047_v19 = vand.u32 4294901760, %v6919_v15  ;;  %v8052_v15 = vand.u32 4294901760, %v6959_v1  ;;  %v8059_v1 = vand.u32 4294901760, %v7020_v57 }
 0x3c9   :  { %3563 = vmatprep.subr.mxu0 %v7137_v24  ;;  %3653 = vmatprep.subr.mxu1 %v8034_v40  ;;  %v8041_v24 = vld [vmem:[#allocation54_spill] sm:$0xff] }
 0x3ca   :  { %3566 = vmatpush1.msra.mxu0 %v7146_v16  ;;  %3599 = vmatprep.mubr.f32.mxu0 %v8035_v18  ;;  %v8042_v16 = vand.u32 4294901760, %v8023_v48  ;;  %v8043_v40 = vld [vmem:[#allocation62_spill] sm:$0xff]  ;;  %v3129_v48 = vpop.permute.xlu0 %3128 }
 0x3cb   :  { %3655 = vmatpush1.msra.mxu1 %v8036_v3  ;;  %3602 = vmatmul.mubr.f32.vlgmr.msra.gmra.mxu0 %v8037_v23  ;;  %v8044_v3 = vand.u32 4294901760, %v8024_v11  ;;  %v8054_v23 = vand.u32 4294901760, %v6977_v58  ;;  %v8058_v58 = vand.u32 4294901760, %v7011_v14  ;;  %v8073_v14 = vld [vmem:[#allocation46_spill] sm:$0xff] }
 0x3cc   :  { %3657 = vmatprep.subr.mxu1 %v8038_v31  ;;  %3717 = vmatprep.subr.mxu0 %v8039_v28  ;;  %v8046_v28 = vand.u32 4294901760, %v6907_v5  ;;  %v8051_v5 = vand.u32 4294901760, %v6947_v27  ;;  %v8055_v27 = vand.u32 4294901760, %v6985_v45  ;;  %v8060_v45 = vand.u32 4294901760, %v7029_v61  ;;  %v8076_v61 = vld [vmem:[#allocation45_spill] sm:$0xff] }
 0x3cd   :  { %3659 = vmatpush1.msra.mxu1 %v6841_v17  ;;  %3721 = vmatpush1.msra.mxu0 %v8040_v13 }
 0x3ce   :  { %3661 = vmatprep.subr.mxu1 %v8041_v24  ;;  %3725 = vmatprep.subr.mxu0 %v8042_v16  ;;  %v8048_v16 = vand.u32 4294901760, %v6929_v63  ;;  %v8053_v63 = vand.u32 4294901760, %v6969_v36  ;;  %v8057_v36 = vand.u32 4294901760, %v7002_v37  ;;  %v8071_v37 = vld [vmem:[#allocation47_spill] sm:$0xff] }
 0x3cf   :  { %3663 = vmatpush1.msra.mxu1 %v8043_v40  ;;  %3729 = vmatpush1.msra.mxu0 %v8044_v3  ;;  %v8050_v3 = vand.u32 4294901760, %v6937_v50  ;;  %v8056_v50 = vand.u32 4294901760, %v6994_v0  ;;  %v8062_v0 = vand.u32 4294901760, %v7047_v9  ;;  %v8080_v9 = vld [vmem:[#allocation36_spill] sm:$0xff] }
 0x3d0   :  { %3665 = vmatprep.subr.mxu1 %v6827_v44  ;;  %3733 = vmatprep.subr.mxu0 %v8045_v56 }
 0x3d1   :  { %3667 = vmatpush1.msra.mxu1 %v6830_v8  ;;  %3737 = vmatpush1.msra.mxu0 %v8046_v28 }
 0x3d2   :  { %3669 = vmatprep.subr.mxu1 %v8008_v60  ;;  %3741 = vmatprep.subr.mxu0 %v8047_v19 }
 0x3d3   :  { %3671 = vmatpush1.msra.mxu1 %v8012_v47  ;;  %3704 = vmatprep.mubr.f32.mxu1 %v8035_v18 }
 0x3d4   :  { %3745 = vmatpush1.msra.mxu0 %v8048_v16  ;;  %3708 = vmatmul.mubr.f32.vlgmr.msra.gmra.mxu1 %v8049_v35 }
 0x3d5   :  { %3749 = vmatprep.subr.mxu0 %v8050_v3  ;;  %3883 = vmatprep.subr.mxu1 %v8026_v26 }
 0x3d6   :  { %3753 = vmatpush1.msra.mxu0 %v8051_v5  ;;  %3885 = vmatpush1.msra.mxu1 %v8027_v39 }
 0x3d7   :  { %3757 = vmatprep.subr.mxu0 %v8052_v15  ;;  %3887 = vmatprep.subr.mxu1 %v8028_v7 }
 0x3d8   :  { %3761 = vmatpush1.msra.mxu0 %v8053_v63  ;;  %3889 = vmatpush1.msra.mxu1 %v8029_v10 }
 0x3d9   :  { %3765 = vmatprep.subr.mxu0 %v8054_v23  ;;  %3891 = vmatprep.subr.mxu1 %v8030_v21 }
 0x3da   :  { %3769 = vmatpush1.msra.mxu0 %v8055_v27  ;;  %3893 = vmatpush1.msra.mxu1 %v8031_v30 }
 0x3db   :  { %3773 = vmatprep.subr.mxu0 %v8056_v50  ;;  %3895 = vmatprep.subr.mxu1 %v6872_v25  ;;  %v8061_v25 = vand.u32 4294901760, %v7038_v6 }
 0x3dc   :  { %3777 = vmatpush1.msra.mxu0 %v8057_v36  ;;  %3897 = vmatpush1.msra.mxu1 %v8032_v62 }
 0x3dd   :  { %3781 = vmatprep.subr.mxu0 %v8058_v58  ;;  %3899 = vmatprep.subr.mxu1 %v6893_v52  ;;  %v8063_v52 = vand.u32 4294901760, %v7056_v20  ;;  %v7356_v20 = vld [vmem:[%s7445_s0] sm:$0x77]  ;;  %s4589_s0 = smov [#allocation2]  }
 0x3de   :  { %3785 = vmatpush1.msra.mxu0 %v8059_v1  ;;  %3901 = vmatpush1.msra.mxu1 %v6901_v42  ;;  %v8064_v42 = vand.u32 4294901760, %v7065_v12  ;;  %s4378_s22 = sshll.u32 %s4589_s0, 4  ;;  %s4379_s22 = int_to_ptr.vmem [resolvable:$true] %s4378_s22 }
 0x3df   :  { %3789 = vmatprep.subr.mxu0 %v8060_v45  ;;  %3903 = vmatprep.subr.mxu1 %v6904_v38  ;;  %v8065_v38 = vand.u32 4294901760, %v7074_v29  ;;  %s4564_s23 = scalar_lea.vmem %s4379_s22, 128  ;;  %p4569_p1 = scmp.lt.s32.totalorder %s4379_s22, %s4379_s22 }
 0x3e0   :  { %3793 = vmatpush1.msra.mxu0 %v8061_v25  ;;  %3905 = vmatpush1.msra.mxu1 %v6922_v43  ;;  %v8066_v43 = vand.u32 4294901760, %v7083_v49  ;;  %p4565_p0 = scmp.ne.s32.totalorder %s4379_s22, %s4564_s23  ;;  %p4570_p2 = scmp.lt.s32.totalorder %s4564_s23, %s4564_s23 }
 0x3e1   :  { %3797 = vmatprep.subr.mxu0 %v8062_v0  ;;  %3907 = vmatprep.subr.mxu1 %v6933_v51  ;;  %v8067_v51 = vand.u32 4294901760, %v7092_v32  ;;  %v25_v32 = vmul.f32 1.6666666, %v7356_v20  ;;  %v8081_v0 = vld [vmem:[#allocation11_spill] sm:$0xff] }
 0x3e2   :  { %3801 = vmatpush1.msra.mxu0 %v8063_v52  ;;  %3909 = vmatpush1.msra.mxu1 %v6943_v33  ;;  %v8068_v33 = vand.u32 4294901760, %v7101_v22  ;;  %p4571_p3 = por %p4570_p2, %p4569_p1 }
 0x3e3   :  { %3805 = vmatprep.subr.mxu0 %v8064_v42  ;;  %3911 = vmatprep.subr.mxu1 %v6926_v34  ;;  %v8069_v34 = vand.u32 4294901760, %v7110_v46  ;;  %v8082_v42 = vld [vmem:[#allocation9_spill] sm:$0xff] }
 0x3e4   :  { %3809 = vmatpush1.msra.mxu0 %v8065_v38  ;;  %3913 = vmatpush1.msra.mxu1 %v6965_v4  ;;  %v8070_v4 = vand.u32 4294901760, %v7119_v54  ;;  %p4572_p4 = pnand %p4571_p3, %p4565_p0 }
 0x3e5   :  { %3813 = vmatprep.subr.mxu0 %v8066_v43  ;;  %3915 = vmatprep.subr.mxu1 %v6910_v53  ;;  %v8072_v53 = vand.u32 4294901760, %v7128_v55 }
 0x3e6   :  { %3817 = vmatpush1.msra.mxu0 %v8067_v51  ;;  %3917 = vmatpush1.msra.mxu1 %v6886_v41  ;;  %v8074_v41 = vld [vmem:[#allocation31_spill] sm:$0xff] }
 0x3e7   :  { %3821 = vmatprep.subr.mxu0 %v8068_v33  ;;  %3919 = vmatprep.subr.mxu1 %v6889_v2  ;;  %v8075_v57 = vand.u32 4294901760, %v8074_v41  ;;  %v8077_v2 = vld [vmem:[#allocation59_spill] sm:$0xff] }
 0x3e8   :  { %3825 = vmatpush1.msra.mxu0 %v8069_v34  ;;  %3921 = vmatpush1.msra.mxu1 %v6878_v59  ;;  %v8078_v6 = vand.u32 4294901760, %v8077_v2  ;;  %v8079_v59 = vld [vmem:[#allocation28_spill] sm:$0xff] }
 0x3e9   :  { %3829 = vmatprep.subr.mxu0 %v8070_v4  ;;  %3923 = vmatprep.subr.mxu1 %v8071_v37 }
 0x3ea   :  { %3833 = vmatpush1.msra.mxu0 %v8072_v53  ;;  %3925 = vmatpush1.msra.mxu1 %v8073_v14 }
 0x3eb   :  { %3837 = vmatprep.subr.mxu0 %v8075_v57  ;;  %3927 = vmatprep.subr.mxu1 %v8076_v61 }
 0x3ec   :  { %3841 = vmatpush1.msra.mxu0 %v8078_v6  ;;  %3874 = vmatprep.mubr.f32.mxu0 %v8035_v18 }
 0x3ed   :  { %3929 = vmatpush1.msra.mxu1 %v8079_v59  ;;  %3876 = vmatmul.mubr.f32.vlgmr.msra.gmra.mxu0 %v8080_v9 }
 0x3ee   :  { %3931 = vmatprep.subr.mxu1 %v8038_v31  ;;  %3978 = vmatprep.mubr.f32.mxu1 %v8035_v18 }
 0x3ef   :  { %3933 = vmatpush1.msra.mxu1 %v6841_v17  ;;  %v26_v17 = vmul.f32 2.5, %v7356_v20 }
 0x3f0   :  { %3935 = vmatprep.subr.mxu1 %v8041_v24 }
 0x3f1   :  { %3937 = vmatpush1.msra.mxu1 %v8043_v40  ;;  %v4386_v24 = vrot.slane %v26_v17, 9 }
 0x3f2   :  { %3939 = vmatprep.subr.mxu1 %v6827_v44 }
 0x3f3   :  { %3941 = vmatpush1.msra.mxu1 %v6830_v8  ;;  %v31_v12 = vadd.f32 %v7356_v20, %v4386_v24 }
 0x3f4   :  { %3943 = vmatprep.subr.mxu1 %v8008_v60 }
 0x3f5   :  { %3945 = vmatpush1.msra.mxu1 %v8012_v47  ;;  %4525 = vrcp.f32 %v31_v12 }
 0x3f6   :  { %3980 = vmatmul.mubr.f32.vlgmr.msra.gmra.mxu1 %v8080_v9 }
 0x402   :  { %v4526_v44 = vpop.eup %4525 }
 0x403   :  { %v33_v29 = vmul.f32 %v4526_v44, %v31_v12 }
 0x405   :  { %v34_v8 = vsub.f32 2.0, %v33_v29 }
 0x407   :  { %v35_v49 = vmul.f32 %v4526_v44, %v34_v8 }
 0x409   :  { %v37_v22 = vrot.slane %v35_v49, 7 }
 0x40b   :  { %v7361_v46 = vmul.f32 %v37_v22, %v25_v32 }
 0x40d   :  { %4527 = vrsqrt.f32 %v7361_v46  ;;  %vm42_vm5 = vcmp.eq.f32.partialorder %v7361_v46, inf  ;;  %v45_v5 = vand.u32 2147483648, %v7361_v46  ;;  %vm44_vm6 = vcmp.eq.f32.partialorder %v7361_v46, 0.0 }
 0x41a   :  { %v4528_v21 = vpop.eup %4527 }
 0x41b   :  { %v41_v19 = vmul.f32 %v4528_v21, %v7361_v46 }
 0x41d   :  { %v43_v23 = vsel %vm42_vm5, %v7361_v46, %v41_v19 }
 0x41e   :  { %v46_v1 = vsel %vm44_vm6, %v45_v5, %v43_v23  ;;  %v8083_v5 = vld [vmem:[#allocation7_spill] sm:$0xff] }
 0x41f   :  { %v4016_v45 = vadd.f32 0.8164966, %v46_v1  ;;  %v3998_v52 = vrot.slane %v46_v1, %v8081_v0  ;;  %v4002_v38 = vrot.slane %v46_v1, %v8082_v42  ;;  %v4015_v17 = vsub.f32 0.8164966, %v46_v1 }
 0x421   :  { %v4008_v33 = vrot.slane %v3998_v52, %v8081_v0  ;;  %v4012_v53 = vrot.slane %v4002_v38, %v8081_v0 }
 0x46a   :  { %v3234_v54 = vpop.f32.mrf.mxu0 }
 0x46b   :  { %v3235_v31 = vadd.f32 %v3234_v54, %v3129_v48 }
 0x46c   :  { %v3236_v55 = vpop.f32.mrf.mxu0 }
 0x46d   :  { %v3237_v7 = vadd.f32 %v3236_v55, %v3129_v48 }
 0x472   :  { %v3466_v60 = vpop.f32.mrf.mxu1 }
 0x473   :  { %v3467_v10 = vadd.f32 %v3466_v60, %v3235_v31 }
 0x474   :  { %v3468_v11 = vpop.f32.mrf.mxu1 }
 0x475   :  { %v3469_v62 = vadd.f32 %v3468_v11, %v3237_v7 }
 0x48b   :  { %v3603_v47 = vpop.f32.mrf.mxu0 }
 0x48c   :  { %v3604_v13 = vadd.f32 %v3603_v47, %v3467_v10 }
 0x48d   :  { %v3605_v26 = vpop.f32.mrf.mxu0 }
 0x48e   :  { %v3606_v56 = vadd.f32 %v3605_v26, %v3469_v62 }
 0x494   :  { %v3709_v39 = vpop.f32.mrf.mxu1 }
 0x495   :  { %v3710_v28 = vadd.f32 %v3709_v39, %v3604_v13 }
 0x496   :  { %v3711_v40 = vpop.f32.mrf.mxu1 }
 0x497   :  { %v3712_v35 = vadd.f32 %v3711_v40, %v3606_v56 }
 0x4ad   :  { %v3877_v30 = vpop.f32.mrf.mxu0 }
 0x4ae   :  { %v3878_v3 = vadd.f32 %v3877_v30, %v3710_v28 }
 0x4af   :  { %v3879_v16 = vpop.f32.mrf.mxu0 }
 0x4b0   :  { %v3880_v63 = vadd.f32 %v3879_v16, %v3712_v35  ;;  %v4067_v35 = vadd.f32 1.0, %v7356_v20 }
 0x4b6   :  { %v3981_v15 = vpop.f32.mrf.mxu1 }
 0x4b7   :  { %v3982_v27 = vadd.f32 %v3981_v15, %v3878_v3  ;;  %v4068_v3 = vsub.f32 1.0, %v7356_v20  ;;  %v4073_v15 = vrot.slane %v4067_v35, %v8083_v5 }
 0x4b8   :  { %v3983_v50 = vpop.f32.mrf.mxu1 }
 0x4b9   :  { %v3986_v36 = vmul.f32 0.5, %v3982_v27  ;;  %v3984_v58 = vadd.f32 %v3983_v50, %v3880_v63  ;;  %v8084_v63 = vld [vmem:[#allocation6_spill] sm:$0xff]  ;;  %v4094_v27 = vrot.slane %v4068_v3, %v8083_v5  ;;  %v4083_v50 = vrot.slane %v4073_v15, %v8083_v5 }
 0x4ba   :  { %v4077_v23 = vrot.slane %v4067_v35, %v8084_v63 }
 0x4bb   :  { %4529 = vtanh.f32 %v3986_v36  ;;  %v3987_v25 = vmul.f32 0.5, %v3984_v58  ;;  %v4098_v36 = vrot.slane %v4068_v3, %v8084_v63  ;;  %v4104_v58 = vrot.slane %v4094_v27, %v8083_v5 }
 0x4bc   :  { %v4087_v1 = vrot.slane %v4077_v23, %v8083_v5 }
 0x4bd   :  { %4531 = vtanh.f32 %v3987_v25  ;;  %v4108_v52 = vrot.slane %v4098_v36, %v8083_v5 }
 0x4be   :  { %4533 = vrcp.f32 %v4016_v45 }
 0x4c8   :  { %v4530_v43 = vpop.eup %4529 }
 0x4c9   :  { %v3990_v51 = vmul.f32 0.5, %v4530_v43 }
 0x4ca   :  { %v4532_v34 = vpop.eup %4531 }
 0x4cb   :  { %v3992_v4 = vadd.f32 0.5, %v3990_v51  ;;  %v3991_v37 = vmul.f32 0.5, %v4532_v34  ;;  %v4534_v14 = vpop.eup %4533 }
 0x4cc   :  { %v4018_v61 = vmul.f32 %v4534_v14, %v4016_v45 }
 0x4cd   :  { %v7373_v41 = vmul.f32 %v4008_v33, %v3992_v4  ;;  %v3993_v57 = vadd.f32 0.5, %v3991_v37 }
 0x4ce   :  { %v4019_v9 = vsub.f32 2.0, %v4018_v61 }
 0x4cf   :  { %v4024_v2 = vsub.f32 0.8164966, %v7373_v41  ;;  %v7376_v6 = vmul.f32 %v4012_v53, %v3993_v57  ;;  %v4022_v55 = vadd.f32 0.8164966, %v7373_v41 }
 0x4d0   :  { %v4020_v24 = vmul.f32 %v4534_v14, %v4019_v9 }
 0x4d1   :  { %4535 = vrcp.f32 %v4024_v2  ;;  %v4025_v59 = vsub.f32 0.8164966, %v7376_v6  ;;  %v4023_v31 = vadd.f32 0.8164966, %v7376_v6 }
 0x4d2   :  { %v4021_v12 = vmul.f32 %v4020_v24, %v4015_v17 }
 0x4d3   :  { %4537 = vrcp.f32 %v4025_v59 }
 0x4d4   :  { %v4040_v8 = vrot.slane %v4021_v12, %v8081_v0  ;;  %v4044_v54 = vrot.slane %v4021_v12, %v8082_v42 }
 0x4d6   :  { %v4050_v47 = vrot.slane %v4040_v8, %v8081_v0  ;;  %v4054_v39 = vrot.slane %v4044_v54, %v8081_v0 }
 0x4de   :  { %v4536_v44 = vpop.eup %4535 }
 0x4df   :  { %v4028_v29 = vmul.f32 %v4536_v44, %v4024_v2 }
 0x4e0   :  { %v4538_v49 = vpop.eup %4537 }
 0x4e1   :  { %v4030_v32 = vsub.f32 2.0, %v4028_v29  ;;  %v4029_v22 = vmul.f32 %v4538_v49, %v4025_v59 }
 0x4e3   :  { %v4032_v60 = vmul.f32 %v4536_v44, %v4030_v32  ;;  %v4031_v48 = vsub.f32 2.0, %v4029_v22  ;;  %v8085_v44 = vld [vmem:[#allocation5_spill] sm:$0xff] }
 0x4e4   :  { %vm4127_vm7 = vcmp.lt.s32.totalorder %v8085_v44, 4 }
 0x4e5   :  { %v4034_v11 = vmul.f32 %v4032_v60, %v4022_v55  ;;  %v4033_v26 = vmul.f32 %v4538_v49, %v4031_v48 }
 0x4e7   :  { %v4055_v7 = vmul.f32 %v4050_v47, %v4034_v11  ;;  %v4035_v10 = vmul.f32 %v4033_v26, %v4023_v31 }
 0x4e9   :  { %4539 = vlog2.f32 %v4055_v7  ;;  %v4056_v21 = vmul.f32 %v4054_v39, %v4035_v10 }
 0x4eb   :  { %4541 = vlog2.f32 %v4056_v21 }
 0x4f6   :  { %v4540_v30 = vpop.eup %4539 }
 0x4f7   :  { %v4058_v62 = vmul.f32 0.6931472, %v4540_v30 }
 0x4f8   :  { %v4542_v13 = vpop.eup %4541 }
 0x4f9   :  { %v4061_v40 = vmul.f32 2.4494898, %v4058_v62  ;;  %v4060_v56 = vmul.f32 0.6931472, %v4542_v13 }
 0x4fb   :  { %v4063_v28 = vmul.f32 1.442695, %v4061_v40  ;;  %v4062_v19 = vmul.f32 2.4494898, %v4060_v56 }
 0x4fd   :  { %4543 = vpow2.f32 %v4063_v28  ;;  %v4065_v16 = vmul.f32 1.442695, %v4062_v19 }
 0x4ff   :  { %4545 = vpow2.f32 %v4065_v16 }
 0x50a   :  { %v4544_v45 = vpop.eup %4543 }
 0x50b   :  { %v4088_v25 = vmul.f32 %v4544_v45, %v4083_v50 }
 0x50c   :  { %v4546_v38 = vpop.eup %4545 }
 0x50d   :  { %v4111_v43 = vadd.f32 %v4104_v58, %v4088_v25  ;;  %v4089_v51 = vmul.f32 %v4546_v38, %v4087_v1  ;;  %v4109_v57 = vsub.f32 %v4088_v25, %v4104_v58 }
 0x50f   :  { %4547 = vrcp.f32 %v4111_v43  ;;  %v4112_v33 = vadd.f32 %v4108_v52, %v4089_v51  ;;  %v4110_v9 = vsub.f32 %v4089_v51, %v4108_v52 }
 0x511   :  { %4549 = vrcp.f32 %v4112_v33 }
 0x512   :  { %4551 = vrcp.f32 %v7361_v46 }
 0x51c   :  { %v4548_v34 = vpop.eup %4547 }
 0x51d   :  { %v4115_v4 = vmul.f32 %v4548_v34, %v4111_v43  ;;  %v4588_v43 = vmov 1966171168  }
 0x51e   :  { %v4550_v37 = vpop.eup %4549  ;;  %v4293_v51 = vunpack.c.l.s4 %v4588_v43 }
 0x51f   :  { %v4117_v53 = vsub.f32 2.0, %v4115_v4  ;;  %v4116_v14 = vmul.f32 %v4550_v37, %v4112_v33 }
 0x521   :  { %v4119_v61 = vmul.f32 %v4548_v34, %v4117_v53  ;;  %v4118_v2 = vsub.f32 2.0, %v4116_v14 }
 0x523   :  { %v4121_v59 = vmul.f32 %v4119_v61, %v4109_v57  ;;  %v4120_v17 = vmul.f32 %v4550_v37, %v4118_v2 }
 0x525   :  { %v4123_v24 = vsub.f32 %v4121_v59, %v7373_v41  ;;  %v4122_v12 = vmul.f32 %v4120_v17, %v4110_v9  ;;  %v4552_v59 = vpop.eup %4551 }
 0x527   :  { %v4128_v29 = vand.u32 2147483647, %v4123_v24  ;;  %v4124_v8 = vsub.f32 %v4122_v12, %v7376_v6  ;;  %v4213_v12 = vmul.f32 %v4552_v59, %v7361_v46 }
 0x529   :  { %v4130_v49 = vsel %vm4127_vm7, %v4128_v29, 1e+30  ;;  %v4129_v32 = vand.u32 2147483647, %v4124_v8  ;;  %v8086_v29 = vlaneseq }
 0x52a   :  { %v4132_v22 = vrot.slane %v4130_v49, 4 }
 0x52b   :  { %v4131_v54 = vsel %vm4127_vm7, %v4129_v32, 1e+30  ;;  %vm7413_vm2 = vcmp.lt.s32.totalorder %v8086_v29, 256  ;;  %v4214_v32 = vsub.f32 2.0, %v4213_v12 }
 0x52c   :  { %v4133_v55 = vmin.f32 %v4130_v49, %v4132_v22  ;;  %v4138_v60 = vrot.slane %v4131_v54, 4 }
 0x52e   :  { %v4134_v47 = vrot.slane %v4133_v55, 2  ;;  %v4139_v48 = vmin.f32 %v4131_v54, %v4138_v60 }
 0x530   :  { %v4135_v11 = vmin.f32 %v4133_v55, %v4134_v47  ;;  %v4140_v31 = vrot.slane %v4139_v48, 2 }
 0x532   :  { %v4136_v26 = vrot.slane %v4135_v11, 1  ;;  %v4141_v39 = vmin.f32 %v4139_v48, %v4140_v31 }
 0x534   :  { %v4137_v7 = vmin.f32 %v4135_v11, %v4136_v26  ;;  %v4142_v10 = vrot.slane %v4141_v39, 1 }
 0x536   :  { %vm4144_vm8 = vcmp.eq.f32.partialorder %v4130_v49, %v4137_v7  ;;  %v4143_v21 = vmin.f32 %v4141_v39, %v4142_v10 }
 0x537   :  { %v4146_v30 = vsel %vm4144_vm8, %v8085_v44, 8 }
 0x538   :  { %v4148_v62 = vrot.slane %v4146_v30, 4  ;;  %vm4145_vm9 = vcmp.eq.f32.partialorder %v4131_v54, %v4143_v21  ;;  %v4215_v54 = vmul.f32 %v4552_v59, %v4214_v32 }
 0x539   :  { %v4147_v13 = vsel %vm4145_vm9, %v8085_v44, 8 }
 0x53a   :  { %vm4149_vm10 = vcmp.lt.s32.totalorder %v4146_v30, %v4148_v62  ;;  %v4157_v40 = vrot.slane %v4147_v13, 4  ;;  %v4220_v11 = vrot.slane %v4215_v54, %v8081_v0  ;;  %v4224_v10 = vrot.slane %v4215_v54, %v8082_v42 }
 0x53b   :  { %v4150_v56 = vsel %vm4149_vm10, %v4146_v30, %v4148_v62 }
 0x53c   :  { %v4151_v28 = vrot.slane %v4150_v56, 2  ;;  %vm4158_vm11 = vcmp.lt.s32.totalorder %v4147_v13, %v4157_v40 }
 0x53d   :  { %v4159_v19 = vsel %vm4158_vm11, %v4147_v13, %v4157_v40 }
 0x53e   :  { %vm4152_vm12 = vcmp.lt.s32.totalorder %v4150_v56, %v4151_v28  ;;  %v4160_v16 = vrot.slane %v4159_v19, 2 }
 0x53f   :  { %v4153_v35 = vsel %vm4152_vm12, %v4150_v56, %v4151_v28 }
 0x540   :  { %v4154_v3 = vrot.slane %v4153_v35, 1  ;;  %vm4161_vm13 = vcmp.lt.s32.totalorder %v4159_v19, %v4160_v16 }
 0x541   :  { %v4162_v5 = vsel %vm4161_vm13, %v4159_v19, %v4160_v16 }
 0x542   :  { %vm4155_vm14 = vcmp.lt.s32.totalorder %v4153_v35, %v4154_v3  ;;  %v4163_v15 = vrot.slane %v4162_v5, 1 }
 0x543   :  { %v4156_v63 = vsel %vm4155_vm14, %v4153_v35, %v4154_v3 }
 0x544   :  { %vm4166_vm15 = vcmp.eq.s32.totalorder %v8085_v44, %v4156_v63  ;;  %vm4164_vm0 = vcmp.lt.s32.totalorder %v4162_v5, %v4163_v15 }
 0x545   :  { %v4387_v23 = vsel %vm4166_vm15, 1.0, %v8035_v18  ;;  %v4165_v27 = vsel %vm4164_vm0, %v4162_v5, %v4163_v15 }
 0x546   :  { %v4172_v50 = vmul.f32 %v4387_v23, %v7373_v41  ;;  %vm4167_vm1 = vcmp.eq.s32.totalorder %v8085_v44, %v4165_v27  ;;  %v4294_v41 = vunpack.c.0.s8 %v4293_v51 }
 0x547   :  { %v4388_v36 = vsel %vm4167_vm1, 1.0, %v8035_v18 }
 0x548   :  { %v4174_v58 = vrot.slane %v4172_v50, 4  ;;  %v4173_v1 = vmul.f32 %v4388_v36, %v7376_v6  ;;  %v7408_v61 = vsub.s32 %v4294_v41, %v8085_v44  ;;  %v4198_v44 = vsub.f32 0.6666667, %v7361_v46 }
 0x54a   :  { %v4175_v45 = vadd.f32 %v4174_v58, %v4172_v50  ;;  %v4180_v25 = vrot.slane %v4173_v1, 4  ;;  %v4203_v22 = vrot.slane %v4198_v44, %v8081_v0  ;;  %v4207_v55 = vrot.slane %v4198_v44, %v8082_v42 }
 0x54c   :  { %v4176_v52 = vrot.slane %v4175_v45, 2  ;;  %v4181_v38 = vadd.f32 %v4180_v25, %v4173_v1 }
 0x54e   :  { %v4182_v33 = vrot.slane %v4181_v38, 2  ;;  %v4177_v34 = vadd.f32 %v4176_v52, %v4175_v45  ;;  %v8089_v45 = vld [vmem:[#allocation10_spill] sm:$0xff]  ;;  %v8090_v52 = vld [vmem:[#allocation8_spill] sm:$0xff] }
 0x550   :  { %v4178_v4 = vrot.slane %v4177_v34, 1  ;;  %v4183_v37 = vadd.f32 %v4182_v33, %v4181_v38 }
 0x552   :  { %v4179_v53 = vadd.f32 %v4178_v4, %v4177_v34  ;;  %v4184_v14 = vrot.slane %v4183_v37, 1 }
 0x554   :  { %v4185_v57 = vadd.f32 %v4184_v14, %v4183_v37  ;;  %v4186_v18 = vmul.f32 %v4179_v53, %v4179_v53 }
 0x556   :  { %v4187_v6 = vmul.f32 %v4185_v57, %v4185_v57  ;;  %v4188_v2 = vsub.f32 0.6666667, %v4186_v18  ;;  %v4354_v9 = vcombine.low %v4179_v53, %v4185_v57  ;;  %v4210_v48 = vmul.f32 %v4203_v22, %v4186_v18 }
 0x557   :  { %v4252_v58 = vmul.f32 0.6666667, %v4186_v18 }
 0x558   :  { %v4189_v17 = vsub.f32 0.6666667, %v4187_v6  ;;  %4553 = vrcp.f32 %v4188_v2  ;;  %v4361_v24 = vrot.slane %v4354_v9, %v7408_v61  ;;  %v4211_v7 = vmul.f32 %v4207_v55, %v4187_v6 }
 0x559   :  { %v4227_v46 = vmul.f32 %v4220_v11, %v4210_v48  ;;  %v4253_v1 = vmul.f32 0.6666667, %v4187_v6 }
 0x55a   :  { %4555 = vrcp.f32 %v4189_v17  ;;  %v4368_v49 = vrot.slane %v4361_v24, %v7408_v61  ;;  %v4228_v13 = vmul.f32 %v4224_v10, %v4211_v7 }
 0x55c   :  { %4371 = vst.msk [vmem:[#allocation2 + $0x3] ss:$4 sm:$0x3] %vm7413_vm2, %v4368_v49 }
 0x565   :  { %v4554_v60 = vpop.eup %4553 }
 0x566   :  { %v4192_v47 = vmul.f32 %v4554_v60, %v4188_v2 }
 0x567   :  { %v4556_v31 = vpop.eup %4555 }
 0x568   :  { %v4193_v26 = vmul.f32 %v4556_v31, %v4189_v17  ;;  %v4194_v39 = vsub.f32 2.0, %v4192_v47 }
 0x56a   :  { %v4195_v21 = vsub.f32 2.0, %v4193_v26  ;;  %v4196_v30 = vmul.f32 %v4554_v60, %v4194_v39 }
 0x56c   :  { %v4197_v62 = vmul.f32 %v4556_v31, %v4195_v21  ;;  %v4229_v40 = vmul.f32 %v4227_v46, %v4196_v30 }
 0x56e   :  { %v4230_v56 = vmul.f32 %v4228_v13, %v4197_v62  ;;  %4557 = vrsqrt.f32 %v4229_v40  ;;  %vm4233_vm3 = vcmp.eq.f32.partialorder %v4229_v40, inf  ;;  %v4236_v0 = vand.u32 2147483648, %v4229_v40 }
 0x56f   :  { %vm4235_vm4 = vcmp.eq.f32.partialorder %v4229_v40, 0.0 }
 0x570   :  { %4559 = vrsqrt.f32 %v4230_v56  ;;  %vm4240_vm5 = vcmp.eq.f32.partialorder %v4230_v56, inf  ;;  %v4243_v42 = vand.u32 2147483648, %v4230_v56  ;;  %vm4242_vm6 = vcmp.eq.f32.partialorder %v4230_v56, 0.0 }
 0x57b   :  { %v4558_v28 = vpop.eup %4557 }
 0x57c   :  { %v4232_v19 = vmul.f32 %v4558_v28, %v4229_v40 }
 0x57d   :  { %v4560_v16 = vpop.eup %4559 }
 0x57e   :  { %v4234_v35 = vsel %vm4233_vm3, %v4229_v40, %v4232_v19  ;;  %v4239_v3 = vmul.f32 %v4560_v16, %v4230_v56 }
 0x57f   :  { %v4237_v5 = vsel %vm4235_vm4, %v4236_v0, %v4234_v35 }
 0x580   :  { %v4241_v15 = vsel %vm4240_vm5, %v4230_v56, %v4239_v3  ;;  %v4245_v23 = vmul.f32 %v4237_v5, %v4229_v40 }
 0x581   :  { %v4244_v63 = vsel %vm4242_vm6, %v4243_v42, %v4241_v15 }
 0x582   :  { %v4246_v27 = vmul.f32 %v4244_v63, %v4230_v56 }
 0x584   :  { %v4249_v50 = vcombine.low %v4245_v23, %v4246_v27 }
 0x586   :  { %v4251_v36 = vmul.f32 %v7356_v20, %v4249_v50 }
 0x588   :  { %v4258_v25 = vrot.slane %v4251_v36, %v8089_v45  ;;  %v4262_v38 = vrot.slane %v4251_v36, %v8090_v52  ;;  %4561 = vrcp.f32 %v4251_v36  ;;  %v4298_v43 = vrot.slane %v4251_v36, %v7408_v61 }
 0x58a   :  { %v4265_v51 = vmul.f32 %v4258_v25, %v4252_v58  ;;  %v4266_v33 = vmul.f32 %v4262_v38, %v4253_v1  ;;  %v4305_v34 = vrot.slane %v4298_v43, %v7408_v61 }
 0x58c   :  { %v4267_v4 = vmul.f32 %v4265_v51, %v4196_v30  ;;  %v4268_v37 = vmul.f32 %v4266_v33, %v4197_v62  ;;  %4311 = vst.msk [vmem:[#allocation2] ss:$4 sm:$0x3] %vm7413_vm2, %v4305_v34 }
 0x58e   :  { %v4269_v41 = vmul.f32 0.6, %v4267_v4  ;;  %v4270_v20 = vmul.f32 0.6, %v4268_v37 }
 0x590   :  { %v4314_v53 = vcombine.low %v4269_v41, %v4270_v20  ;;  %v4271_v9 = vmul.f32 2.5, %v4269_v41  ;;  %v4272_v17 = vmul.f32 2.5, %v4270_v20 }
 0x592   :  { %v4321_v14 = vrot.slane %v4314_v53, %v7408_v61 }
 0x594   :  { %v4328_v57 = vrot.slane %v4321_v14, %v7408_v61 }
 0x595   :  { %v4562_v18 = vpop.eup %4561 }
 0x596   :  { %v4274_v6 = vmul.f32 %v4562_v18, %v4251_v36  ;;  %4331 = vst.msk [vmem:[#allocation2 + $0x1] ss:$4 sm:$0x3] %vm7413_vm2, %v4328_v57 }
 0x598   :  { %v4275_v2 = vsub.f32 2.0, %v4274_v6 }
 0x59a   :  { %v4276_v59 = vmul.f32 %v4562_v18, %v4275_v2 }
 0x59c   :  { %v4281_v24 = vrot.slane %v4276_v59, %v8089_v45  ;;  %v4285_v12 = vrot.slane %v4276_v59, %v8090_v52 }
 0x59e   :  { %v4288_v29 = vmul.f32 %v4281_v24, %v4271_v9  ;;  %v4289_v49 = vmul.f32 %v4285_v12, %v4272_v17 }
 0x5a0   :  { %v4290_v44 = vadd.f32 1.0, %v4288_v29  ;;  %v4291_v32 = vadd.f32 1.0, %v4289_v49 }
 0x5a2   :  { %v4334_v22 = vcombine.low %v4290_v44, %v4291_v32 }
 0x5a4   :  { %v4341_v54 = vrot.slane %v4334_v22, %v7408_v61 }
 0x5a6   :  { %v4348_v55 = vrot.slane %v4341_v54, %v7408_v61 }
 0x5a8   :  { %4351 = vst.msk [vmem:[#allocation2 + $0x2] ss:$4 sm:$0x3] %vm7413_vm2, %v4348_v55 }
 0x5a9   :  { %4575 = shalt.err (!%p4572_p4)
}
 0x5aa   :  { %4381 = dma.vmem_to_hbm [thread:$0]  %s4379_s22, 128, %s7451_s6, [#allocation3]  }
 0x5ab   :  { %4584 = dma.done.wait [#allocation3], 128  }
 0x5ac   :  { %4585 = vsyncadd [#allocation3], 4294967168 }
 0x5ad   :  { %4385 = vsyncpa [#allocation3], 1 }

</bundles_post_ra>
